<compile_context>
chip_gen: v7x
topology: tpu7x:2x2x1
jax: 0.10.0
libtpu: 0.0.40
codegen_flags: <defaults>
</compile_context>

<pallas_src>
import functools

import jax
import jax.numpy as jnp
import numpy as np
from jax.experimental import pallas as pl
from jax.experimental.pallas import tpu as pltpu


# ---------------------------------------------------------------------------
# Pallas kernel: one (mode-block, k) grid step.
#   att_ref : (B, 1)           attention weight for bank k (real)
#   xr/xi   : (mb, B, Cin)     retained Fourier modes of x (real / imag)
#   wr/wi   : (mb, Cin, Cout)  weight bank k, this mode block
#   or/oi   : (mb, B, Cout)    f32 output, revisited (accumulated) across k
# ---------------------------------------------------------------------------
def _spectral_mix_kernel(att_ref, xr_ref, xi_ref, wr_ref, wi_ref,
                         or_ref, oi_ref):
    k = pl.program_id(1)

    xr = xr_ref[...]
    xi = xi_ref[...]
    wr = wr_ref[...]
    wi = wi_ref[...]
    a = att_ref[...]                      # (B, 1) -> broadcasts to (mb, B, Cout)

    # Mode-batched matmul on the MXU, f32 accumulation, full f32 precision
    # (keeps the tight correctness tolerance; switch inputs to bf16 if the
    # accuracy budget allows).
    dot = functools.partial(jnp.einsum, 'mbi,mio->mbo',
                            preferred_element_type=jnp.float32,
                            precision=jax.lax.Precision.HIGHEST)
    rr = dot(xr, wr)                      # (mb, B, Cout)
    ii = dot(xi, wi)
    ri = dot(xr, wi)
    ir = dot(xi, wr)

    upd_r = a * (rr - ii)                 # cheap VPU scaling by att[:, k]
    upd_i = a * (ri + ir)

    @pl.when(k == 0)
    def _init():
        or_ref[...] = upd_r
        oi_ref[...] = upd_i

    @pl.when(k != 0)
    def _acc():
        or_ref[...] = or_ref[...] + upd_r
        oi_ref[...] = oi_ref[...] + upd_i


# ---------------------------------------------------------------------------
# Tiling / VMEM helpers
# ---------------------------------------------------------------------------
def _ceil_to(x, m):
    return -(-x // m) * m


def _pick_mode_block(Mt, Cin, Cout, budget_bytes=4 << 20):
    """Largest divisor of Mt whose double-buffered (real+imag) weight block
    stays under `budget_bytes` (tile-padding aware).  Also keep >= 2 mode
    blocks when possible so the 'parallel' grid axis can be split across
    TensorCores (v7x megacore)."""
    cin_s = _ceil_to(Cin, 8)
    cout_p = _ceil_to(Cout, 128)
    per_mode = cin_s * cout_p * 4 * 2 * 2       # f32, r+i, double-buffered
    cap = max(1, budget_bytes // per_mode)
    if Mt >= 2:
        cap = min(cap, Mt // 2)
    best = 1
    for d in range(1, Mt + 1):
        if Mt % d == 0 and d <= cap:
            best = d
    return best


def _vmem_limit_bytes(mb, B, Cin, Cout):
    """Scoped-VMEM request: padded block sizes, double-buffered, + headroom,
    clamped to [32 MiB, 64 MiB] so it is safe on all of v5e/v6e/v7x."""
    b_p = _ceil_to(B, 8)
    cin_p = _ceil_to(Cin, 128)
    cout_p = _ceil_to(Cout, 128)
    cin_s = _ceil_to(Cin, 8)
    per_buf = (2 * mb * b_p * cin_p        # xr, xi blocks
               + 2 * mb * cin_s * cout_p   # wr, wi blocks
               + 2 * mb * b_p * cout_p     # out r, i blocks
               + b_p * 128)                # att block
    need = per_buf * 4 * 2                 # f32 bytes, double-buffered
    need = need * 2 + (8 << 20)            # compiler scratch headroom
    return int(min(max(need, 32 << 20), 64 << 20))


def _spectral_mix_pallas(att_kb, xr, xi, wr, wi, mode_block):
    """att_kb:(K,B,1) f32, xr/xi:(Mt,B,Cin) f32, wr/wi:(K,Mt,Cin,Cout) f32
       -> (out_r, out_i): (Mt,B,Cout) f32"""
    K, B, _ = att_kb.shape
    Mt, _, Cin = xr.shape
    Cout = wr.shape[-1]
    n_mb = Mt // mode_block

    return pl.pallas_call(
        _spectral_mix_kernel,
        out_shape=(jax.ShapeDtypeStruct((Mt, B, Cout), jnp.float32),
                   jax.ShapeDtypeStruct((Mt, B, Cout), jnp.float32)),
        grid=(n_mb, K),                     # reduction axis (k) last
        in_specs=[
            pl.BlockSpec((None, B, 1), lambda m, k: (k, 0, 0)),            # att
            pl.BlockSpec((mode_block, B, Cin), lambda m, k: (m, 0, 0)),    # xr
            pl.BlockSpec((mode_block, B, Cin), lambda m, k: (m, 0, 0)),    # xi
            pl.BlockSpec((None, mode_block, Cin, Cout),
                         lambda m, k: (k, m, 0, 0)),                       # wr
            pl.BlockSpec((None, mode_block, Cin, Cout),
                         lambda m, k: (k, m, 0, 0)),                       # wi
        ],
        out_specs=(
            pl.BlockSpec((mode_block, B, Cout), lambda m, k: (m, 0, 0)),
            pl.BlockSpec((mode_block, B, Cout), lambda m, k: (m, 0, 0)),
        ),
        compiler_params=pltpu.CompilerParams(
            dimension_semantics=("parallel", "arbitrary"),
            vmem_limit_bytes=_vmem_limit_bytes(mode_block, B, Cin, Cout)),
    )(att_kb, xr, xi, wr, wi)


# ---------------------------------------------------------------------------
# Forward pass matching SpectralConv2d_dy.forward
# ---------------------------------------------------------------------------
@functools.partial(jax.jit, static_argnames=("modes1", "modes2"))
def spectral_conv2d_dy(x, att, w1_r, w1_i, w2_r, w2_i, *, modes1, modes2):
    B, Cin, H, W = x.shape
    K, _, Cout, m1, m2 = w1_r.shape
    assert (m1, m2) == (modes1, modes2)
    Wf = W // 2 + 1
    M = m1 * m2
    Mt = 2 * M                              # low-row + high-row regions fused

    x_ft = jnp.fft.rfft2(x)                 # (B, Cin, H, Wf) complex64

    # Gather both retained mode regions once, modes on the leading (grid)
    # axis, channels on the minor (MXU) dims: (Mt, B, Cin).
    x_modes = jnp.concatenate(
        [x_ft[:, :, :m1, :m2].reshape(B, Cin, M),
         x_ft[:, :, H - m1:, :m2].reshape(B, Cin, M)], axis=-1)
    x_modes = jnp.transpose(x_modes, (2, 0, 1))            # (Mt, B, Cin)
    xr = jnp.real(x_modes).astype(jnp.float32)
    xi = jnp.imag(x_modes).astype(jnp.float32)

    # Weights: fuse the two regions and reorder to (K, Mt, Cin, Cout) so each
    # (k, mode-block) slice is a stack of (Cin, Cout) matmul tiles.
    # TODO(synk): in a real model, store the weights in this layout once
    # instead of transposing on every call.
    def pack_w(wa, wb):
        w = jnp.concatenate([wa.reshape(K, Cin, Cout, M),
                             wb.reshape(K, Cin, Cout, M)], axis=-1)
        return jnp.transpose(w, (0, 3, 1, 2)).astype(jnp.float32)

    wr = pack_w(w1_r, w2_r)
    wi = pack_w(w1_i, w2_i)

    att_kb = jnp.transpose(att, (1, 0)).reshape(K, B, 1).astype(jnp.float32)

    mode_block = _pick_mode_block(Mt, Cin, Cout)
    out_r, out_i = _spectral_mix_pallas(att_kb, xr, xi, wr, wi, mode_block)

    out_c = jax.lax.complex(out_r, out_i)                  # (Mt, B, Cout)
    out_c = jnp.transpose(out_c, (1, 2, 0))                # (B, Cout, Mt)

    out_ft = jnp.zeros((B, Cout, H, Wf), dtype=jnp.complex64)
    out_ft = out_ft.at[:, :, :m1, :m2].set(
        out_c[:, :, :M].reshape(B, Cout, m1, m2))
    out_ft = out_ft.at[:, :, H - m1:, :m2].set(
        out_c[:, :, M:].reshape(B, Cout, m1, m2))
    return jnp.fft.irfft2(out_ft, s=(H, W))                # (B, Cout, H, W) f32


# ---------------------------------------------------------------------------
# Pure-JAX reference (mirrors the PyTorch code) for a correctness check.
# ---------------------------------------------------------------------------
def _reference(x, att, w1, w2, modes1, modes2):
    B, Cin, H, W = x.shape
    Cout = w1.shape[2]
    x_ft = jnp.fft.rfft2(x)
    attc = att.astype(jnp.complex64)

    def compl_mul2d(inp, w):
        weff = jnp.einsum('bk,kioxy->bioxy', attc, w)
        return jnp.einsum('bixy,bioxy->boxy', inp, weff)

    out_ft = jnp.zeros((B, Cout, H, W // 2 + 1), dtype=jnp.complex64)
    out_ft = out_ft.at[:, :, :modes1, :modes2].set(
        compl_mul2d(x_ft[:, :, :modes1, :modes2], w1))
    out_ft = out_ft.at[:, :, -modes1:, :modes2].set(
        compl_mul2d(x_ft[:, :, -modes1:, :modes2], w2))
    return jnp.fft.irfft2(out_ft, s=(H, W))


if __name__ == "__main__":
    # Small shapes consistent with the module.
    B, Cin, Cout = 2, 4, 6
    H, W = 16, 16
    modes1, modes2 = 4, 4
    K = 3

    key = jax.random.PRNGKey(0)
    k1r, k1i, k2r, k2i, kx, ka = jax.random.split(key, 6)

    scale = 1.0 / (Cin * Cout)
    wshape = (K, Cin, Cout, modes1, modes2)
    # torch.rand(..., dtype=cfloat) => real & imag ~ U[0,1), scaled.
    w1_r = scale * jax.random.uniform(k1r, wshape, dtype=jnp.float32)
    w1_i = scale * jax.random.uniform(k1i, wshape, dtype=jnp.float32)
    w2_r = scale * jax.random.uniform(k2r, wshape, dtype=jnp.float32)
    w2_i = scale * jax.random.uniform(k2i, wshape, dtype=jnp.float32)

    x = jax.random.normal(kx, (B, Cin, H, W), dtype=jnp.float32)
    att = jax.nn.softmax(jax.random.normal(ka, (B, K), dtype=jnp.float32),
                         axis=-1)

    out = spectral_conv2d_dy(x, att, w1_r, w1_i, w2_r, w2_i,
                             modes1=modes1, modes2=modes2)
    out = jax.block_until_ready(out)

    ref = _reference(x, att,
                     jax.lax.complex(w1_r, w1_i),
                     jax.lax.complex(w2_r, w2_i),
                     modes1, modes2)
    ref = jax.block_until_ready(ref)

    assert out.shape == (B, Cout, H, W), out.shape
    np.testing.assert_allclose(np.asarray(out), np.asarray(ref),
                               rtol=2e-4, atol=2e-5)
    print("KERNEL_OK")
</pallas_src>

<mosaic_0001>
module attributes {stable_mosaic.version = 11 : i64} {
  func.func @_spectral_mix_kernel(%arg0: i32, %arg1: i32, %arg2: memref<1x2x1xf32, #tpu.memory_space<vmem>>, %arg3: memref<16x2x4xf32, #tpu.memory_space<vmem>>, %arg4: memref<16x2x4xf32, #tpu.memory_space<vmem>>, %arg5: memref<1x16x4x6xf32, #tpu.memory_space<vmem>>, %arg6: memref<1x16x4x6xf32, #tpu.memory_space<vmem>>, %arg7: memref<16x2x6xf32, #tpu.memory_space<vmem>>, %arg8: memref<16x2x6xf32, #tpu.memory_space<vmem>>) attributes {dimension_semantics = [#tpu.dimension_semantics<parallel>, #tpu.dimension_semantics<arbitrary>], iteration_bounds = array<i64: 2, 3>, scalar_prefetch = 0 : i64, scratch_operands = 0 : i64, tpu.core_type = #tpu.core_type<tc>, window_params = [{transform_indices = @transform_0, window_bounds = array<i64: 1, 2, 1>}, {transform_indices = @transform_1, window_bounds = array<i64: 16, 2, 4>}, {transform_indices = @transform_2, window_bounds = array<i64: 16, 2, 4>}, {transform_indices = @transform_3, window_bounds = array<i64: 1, 16, 4, 6>}, {transform_indices = @transform_4, window_bounds = array<i64: 1, 16, 4, 6>}, {transform_indices = @transform_5, window_bounds = array<i64: 16, 2, 6>}, {transform_indices = @transform_6, window_bounds = array<i64: 16, 2, 6>}]} {
    %c0 = arith.constant 0 : index
    %c0_0 = arith.constant 0 : index
    %c0_1 = arith.constant 0 : index
    %0 = vector.load %arg3[%c0, %c0_0, %c0_1] : memref<16x2x4xf32, #tpu.memory_space<vmem>>, vector<16x2x4xf32>
    %c0_2 = arith.constant 0 : index
    %c0_3 = arith.constant 0 : index
    %c0_4 = arith.constant 0 : index
    %1 = vector.load %arg4[%c0_2, %c0_3, %c0_4] : memref<16x2x4xf32, #tpu.memory_space<vmem>>, vector<16x2x4xf32>
    %c0_5 = arith.constant 0 : index
    %c0_6 = arith.constant 0 : index
    %c0_7 = arith.constant 0 : index
    %c0_8 = arith.constant 0 : index
    %2 = vector.load %arg5[%c0_5, %c0_6, %c0_7, %c0_8] : memref<1x16x4x6xf32, #tpu.memory_space<vmem>>, vector<1x16x4x6xf32>
    %3 = vector.shape_cast %2 : vector<1x16x4x6xf32> to vector<16x4x6xf32>
    %c0_9 = arith.constant 0 : index
    %c0_10 = arith.constant 0 : index
    %c0_11 = arith.constant 0 : index
    %c0_12 = arith.constant 0 : index
    %4 = vector.load %arg6[%c0_9, %c0_10, %c0_11, %c0_12] : memref<1x16x4x6xf32, #tpu.memory_space<vmem>>, vector<1x16x4x6xf32>
    %5 = vector.shape_cast %4 : vector<1x16x4x6xf32> to vector<16x4x6xf32>
    %c0_13 = arith.constant 0 : index
    %c0_14 = arith.constant 0 : index
    %c0_15 = arith.constant 0 : index
    %6 = vector.load %arg2[%c0_13, %c0_14, %c0_15] : memref<1x2x1xf32, #tpu.memory_space<vmem>>, vector<1x2x1xf32>
    %7 = vector.shape_cast %6 : vector<1x2x1xf32> to vector<2x1xf32>
    "tpu.trace_start"() <{level = 10 : i32, message = "mbi,mio->mbo"}> : () -> ()
    %cst = arith.constant dense<0.000000e+00> : vector<16x2x6xf32>
    %8 = tpu.matmul %0, %3, %cst {dimension_numbers = #tpu.dot_dimension_numbers<[2], [1], [1], [2], [0, 0, 0, 1, 1, 2], [0], [0]>, precision = #tpu.contract_precision<fp32>} : vector<16x2x4xf32>, vector<16x4x6xf32>, vector<16x2x6xf32> -> vector<16x2x6xf32>
    %cst_16 = arith.constant dense<0.000000e+00> : vector<16x2x6xf32>
    %9 = tpu.matmul %1, %5, %cst_16 {dimension_numbers = #tpu.dot_dimension_numbers<[2], [1], [1], [2], [0, 0, 0, 1, 1, 2], [0], [0]>, precision = #tpu.contract_precision<fp32>} : vector<16x2x4xf32>, vector<16x4x6xf32>, vector<16x2x6xf32> -> vector<16x2x6xf32>
    %cst_17 = arith.constant dense<0.000000e+00> : vector<16x2x6xf32>
    %10 = tpu.matmul %0, %5, %cst_17 {dimension_numbers = #tpu.dot_dimension_numbers<[2], [1], [1], [2], [0, 0, 0, 1, 1, 2], [0], [0]>, precision = #tpu.contract_precision<fp32>} : vector<16x2x4xf32>, vector<16x4x6xf32>, vector<16x2x6xf32> -> vector<16x2x6xf32>
    %cst_18 = arith.constant dense<0.000000e+00> : vector<16x2x6xf32>
    %11 = tpu.matmul %1, %3, %cst_18 {dimension_numbers = #tpu.dot_dimension_numbers<[2], [1], [1], [2], [0, 0, 0, 1, 1, 2], [0], [0]>, precision = #tpu.contract_precision<fp32>} : vector<16x2x4xf32>, vector<16x4x6xf32>, vector<16x2x6xf32> -> vector<16x2x6xf32>
    "tpu.trace_stop"() : () -> ()
    %12 = arith.subf %8, %9 : vector<16x2x6xf32>
    %13 = vector.shape_cast %7 : vector<2x1xf32> to vector<1x2x1xf32>
    %14 = vector.broadcast %13 : vector<1x2x1xf32> to vector<16x2x6xf32>
    %15 = arith.mulf %14, %12 : vector<16x2x6xf32>
    %16 = arith.addf %10, %11 : vector<16x2x6xf32>
    %17 = vector.shape_cast %7 : vector<2x1xf32> to vector<1x2x1xf32>
    %18 = vector.broadcast %17 : vector<1x2x1xf32> to vector<16x2x6xf32>
    %19 = arith.mulf %18, %16 : vector<16x2x6xf32>
    %c0_i32 = arith.constant 0 : i32
    %20 = arith.cmpi eq, %arg1, %c0_i32 : i32
    %21 = arith.extui %20 : i1 to i32
    %c0_i32_19 = arith.constant 0 : i32
    %22 = arith.cmpi ne, %21, %c0_i32_19 : i32
    scf.if %22 {
      %c0_22 = arith.constant 0 : index
      %c0_23 = arith.constant 0 : index
      %c0_24 = arith.constant 0 : index
      %26 = vector.load %arg7[%c0_22, %c0_23, %c0_24] : memref<16x2x6xf32, #tpu.memory_space<vmem>>, vector<16x2x6xf32>
      tpu.vector_store %arg7[%c0_22, %c0_23, %c0_24], %15 {strides = array<i32>} : memref<16x2x6xf32, #tpu.memory_space<vmem>>, vector<16x2x6xf32>,
      %c0_25 = arith.constant 0 : index
      %c0_26 = arith.constant 0 : index
      %c0_27 = arith.constant 0 : index
      %27 = vector.load %arg8[%c0_25, %c0_26, %c0_27] : memref<16x2x6xf32, #tpu.memory_space<vmem>>, vector<16x2x6xf32>
      tpu.vector_store %arg8[%c0_25, %c0_26, %c0_27], %19 {strides = array<i32>} : memref<16x2x6xf32, #tpu.memory_space<vmem>>, vector<16x2x6xf32>,
    } else {
    }
    %c0_i32_20 = arith.constant 0 : i32
    %23 = arith.cmpi ne, %arg1, %c0_i32_20 : i32
    %24 = arith.extui %23 : i1 to i32
    %c0_i32_21 = arith.constant 0 : i32
    %25 = arith.cmpi ne, %24, %c0_i32_21 : i32
    scf.if %25 {
      %c0_22 = arith.constant 0 : index
      %c0_23 = arith.constant 0 : index
      %c0_24 = arith.constant 0 : index
      %26 = vector.load %arg7[%c0_22, %c0_23, %c0_24] : memref<16x2x6xf32, #tpu.memory_space<vmem>>, vector<16x2x6xf32>
      %27 = arith.addf %26, %15 : vector<16x2x6xf32>
      %c0_25 = arith.constant 0 : index
      %c0_26 = arith.constant 0 : index
      %c0_27 = arith.constant 0 : index
      %28 = vector.load %arg7[%c0_25, %c0_26, %c0_27] : memref<16x2x6xf32, #tpu.memory_space<vmem>>, vector<16x2x6xf32>
      tpu.vector_store %arg7[%c0_25, %c0_26, %c0_27], %27 {strides = array<i32>} : memref<16x2x6xf32, #tpu.memory_space<vmem>>, vector<16x2x6xf32>,
      %c0_28 = arith.constant 0 : index
      %c0_29 = arith.constant 0 : index
      %c0_30 = arith.constant 0 : index
      %29 = vector.load %arg8[%c0_28, %c0_29, %c0_30] : memref<16x2x6xf32, #tpu.memory_space<vmem>>, vector<16x2x6xf32>
      %30 = arith.addf %29, %19 : vector<16x2x6xf32>
      %c0_31 = arith.constant 0 : index
      %c0_32 = arith.constant 0 : index
      %c0_33 = arith.constant 0 : index
      %31 = vector.load %arg8[%c0_31, %c0_32, %c0_33] : memref<16x2x6xf32, #tpu.memory_space<vmem>>, vector<16x2x6xf32>
      tpu.vector_store %arg8[%c0_31, %c0_32, %c0_33], %30 {strides = array<i32>} : memref<16x2x6xf32, #tpu.memory_space<vmem>>, vector<16x2x6xf32>,
    } else {
    }
    return
  }
  func.func @transform_0(%arg0: i32, %arg1: i32) -> (i32, i32, i32) {
    %c0_i32 = arith.constant 0 : i32
    %c0_i32_0 = arith.constant 0 : i32
    %c0_i32_1 = arith.constant 0 : i32
    return %arg1, %c0_i32, %c0_i32_0 : i32, i32, i32
  }
  func.func @transform_1(%arg0: i32, %arg1: i32) -> (i32, i32, i32) {
    %c0_i32 = arith.constant 0 : i32
    %c0_i32_0 = arith.constant 0 : i32
    %c0_i32_1 = arith.constant 0 : i32
    return %arg0, %c0_i32, %c0_i32_0 : i32, i32, i32
  }
  func.func @transform_2(%arg0: i32, %arg1: i32) -> (i32, i32, i32) {
    %c0_i32 = arith.constant 0 : i32
    %c0_i32_0 = arith.constant 0 : i32
    %c0_i32_1 = arith.constant 0 : i32
    return %arg0, %c0_i32, %c0_i32_0 : i32, i32, i32
  }
  func.func @transform_3(%arg0: i32, %arg1: i32) -> (i32, i32, i32, i32) {
    %c0_i32 = arith.constant 0 : i32
    %c0_i32_0 = arith.constant 0 : i32
    %c0_i32_1 = arith.constant 0 : i32
    return %arg1, %arg0, %c0_i32, %c0_i32_0 : i32, i32, i32, i32
  }
  func.func @transform_4(%arg0: i32, %arg1: i32) -> (i32, i32, i32, i32) {
    %c0_i32 = arith.constant 0 : i32
    %c0_i32_0 = arith.constant 0 : i32
    %c0_i32_1 = arith.constant 0 : i32
    return %arg1, %arg0, %c0_i32, %c0_i32_0 : i32, i32, i32, i32
  }
  func.func @transform_5(%arg0: i32, %arg1: i32) -> (i32, i32, i32) {
    %c0_i32 = arith.constant 0 : i32
    %c0_i32_0 = arith.constant 0 : i32
    %c0_i32_1 = arith.constant 0 : i32
    return %arg0, %c0_i32, %c0_i32_0 : i32, i32, i32
  }
  func.func @transform_6(%arg0: i32, %arg1: i32) -> (i32, i32, i32) {
    %c0_i32 = arith.constant 0 : i32
    %c0_i32_0 = arith.constant 0 : i32
    %c0_i32_1 = arith.constant 0 : i32
    return %arg0, %c0_i32, %c0_i32_0 : i32, i32, i32
  }
}

</mosaic_0001>

<bundles_post_ra>
// kernel: reverse.1
= control target key start
LH: loop header
LB: loop body
LE: loop exit
PB: predicated region body
PF: predicated region fallthrough
CT: control target
= control target key end

     0   :  { %v87_v3 = vlaneseq  ;;  %v80_v14 = vld [vmem:[#allocation0 + $0x7] ss:$-1 sm:$0xff]  ;;  %v94_v15 = vld [vmem:[#allocation0 + $0x17] ss:$-1 sm:$0xff]  ;;  %s472_s0 = inlined_call_operand.vmem [shape: f32[2,6,16,7], index: 0, kind: input, shape index: {}]   ;;  %s473_s1 = inlined_call_operand.vmem [shape: f32[2,6,16,7], index: 1, kind: output, shape index: {}]  }
   0x1   :  { %v52_v0 = vld [vmem:[%s472_s0] sm:$0xff]  ;;  %v54_v1 = vld [vmem:[%s472_s0 + $0x8] sm:$0xff]  ;;  %v56_v2 = vld [vmem:[%s472_s0 + $0x10] sm:$0xff]  ;;  %v81_v16 = vrot.slane %v80_v14, 1  ;;  %v95_v17 = vrot.slane %v94_v15, 1 }
   0x2   :  { %53 = vst [vmem:[#allocation0 + $0x8] sm:$0xff] %v52_v0  ;;  %55 = vst [vmem:[#allocation0 + $0x18] sm:$0xff] %v54_v1  ;;  %v58_v4 = vld [vmem:[%s472_s0 + $0x18] sm:$0xff]  ;;  %v60_v5 = vld [vmem:[%s472_s0 + $0x20] sm:$0xff]  ;;  %v400_v10 = vshrl.u32 %v87_v3, 7 }
   0x3   :  { %57 = vst [vmem:[#allocation0 + $0x28] sm:$0xff] %v56_v2  ;;  %v62_v6 = vld [vmem:[%s472_s0 + $0x28] sm:$0xff]  ;;  %59 = vst [vmem:[#allocation0 + $0x38] sm:$0xff] %v58_v4  ;;  %v64_v7 = vld [vmem:[%s472_s0 + $0x30] sm:$0xff] }
   0x4   :  { %61 = vst [vmem:[#allocation0 + $0x48] sm:$0xff] %v60_v5  ;;  %63 = vst [vmem:[#allocation0 + $0x58] sm:$0xff] %v62_v6  ;;  %v66_v8 = vld [vmem:[%s472_s0 + $0x38] sm:$0xff]  ;;  %v68_v9 = vld [vmem:[%s472_s0 + $0x40] sm:$0xff]  ;;  %vm89_vm0 = vcmp.lt.s32.totalorder %v400_v10, 7 }
   0x5   :  { %65 = vst [vmem:[#allocation0 + $0x68] sm:$0xff] %v64_v7  ;;  %67 = vst [vmem:[#allocation0 + $0x78] sm:$0xff] %v66_v8  ;;  %v70_v11 = vld [vmem:[%s472_s0 + $0x48] sm:$0xff]  ;;  %v72_v12 = vld [vmem:[%s472_s0 + $0x50] sm:$0xff] }
   0x6   :  { %69 = vst [vmem:[#allocation0 + $0x88] sm:$0xff] %v68_v9  ;;  %v74_v13 = vld [vmem:[%s472_s0 + $0x58] sm:$0xff]  ;;  %71 = vst [vmem:[#allocation0 + $0x98] sm:$0xff] %v70_v11  ;;  %v108_v18 = vld [vmem:[#allocation0 + $0x27] ss:$-1 sm:$0xff] }
   0x7   :  { %73 = vst [vmem:[#allocation0 + $0xa8] sm:$0xff] %v72_v12  ;;  %75 = vst [vmem:[#allocation0 + $0xb8] sm:$0xff] %v74_v13  ;;  %v122_v19 = vld [vmem:[#allocation0 + $0x37] ss:$-1 sm:$0xff]  ;;  %v109_v20 = vrot.slane %v108_v18, 1 }
   0x8   :  { %v123_v21 = vrot.slane %v122_v19, 1  ;;  %v136_v22 = vld [vmem:[#allocation0 + $0x47] ss:$-1 sm:$0xff]  ;;  %v150_v23 = vld [vmem:[#allocation0 + $0x57] ss:$-1 sm:$0xff]  ;;  %82 = vst [vmem:[#allocation1] sm:$0xff] %v81_v16 }
   0x9   :  { %96 = vst [vmem:[#allocation1 + $0x8] sm:$0xff] %v95_v17  ;;  %v137_v24 = vrot.slane %v136_v22, 1  ;;  %v151_v25 = vrot.slane %v150_v23, 1  ;;  %v164_v26 = vld [vmem:[#allocation0 + $0x67] ss:$-1 sm:$0xff]  ;;  %110 = vst [vmem:[#allocation1 + $0x10] sm:$0xff] %v109_v20 }
   0xa   :  { %v178_v27 = vld [vmem:[#allocation0 + $0x77] ss:$-1 sm:$0xff]  ;;  %v85_v28 = vld [vmem:[#allocation0 + $0xf] ss:$-1 sm:$0xff]  ;;  %v99_v29 = vld [vmem:[#allocation0 + $0x1f] ss:$-1 sm:$0xff] }
   0xb   :  { %v113_v30 = vld [vmem:[#allocation0 + $0x2f] ss:$-1 sm:$0xff]  ;;  %124 = vst [vmem:[#allocation1 + $0x18] sm:$0xff] %v123_v21  ;;  %v86_v31 = vrot.slane %v85_v28, 1  ;;  %v100_v32 = vrot.slane %v99_v29, 1  ;;  %138 = vst [vmem:[#allocation1 + $0x20] sm:$0xff] %v137_v24 }
   0xc   :  { %v114_v33 = vrot.slane %v113_v30, 1  ;;  %v127_v34 = vld [vmem:[#allocation0 + $0x3f] ss:$-1 sm:$0xff]  ;;  %152 = vst [vmem:[#allocation1 + $0x28] sm:$0xff] %v151_v25  ;;  %v165_v35 = vrot.slane %v164_v26, 1  ;;  %v179_v39 = vrot.slane %v178_v27, 1 }
   0xd   :  { %v128_v36 = vrot.slane %v127_v34, 1  ;;  %v141_v37 = vld [vmem:[#allocation0 + $0x4f] ss:$-1 sm:$0xff]  ;;  %v155_v38 = vld [vmem:[#allocation0 + $0x5f] ss:$-1 sm:$0xff]  ;;  %90 = vst.msk [vmem:[#allocation1] sm:$0xff] %vm89_vm0, %v86_v31 }
   0xe   :  { %104 = vst.msk [vmem:[#allocation1 + $0x8] sm:$0xff] %vm89_vm0, %v100_v32  ;;  %118 = vst.msk [vmem:[#allocation1 + $0x10] sm:$0xff] %vm89_vm0, %v114_v33  ;;  %v142_v40 = vrot.slane %v141_v37, 1  ;;  %v156_v41 = vrot.slane %v155_v38, 1  ;;  %v169_v42 = vld [vmem:[#allocation0 + $0x6f] ss:$-1 sm:$0xff] }
   0xf   :  { %166 = vst [vmem:[#allocation1 + $0x30] sm:$0xff] %v165_v35  ;;  %v183_v43 = vld [vmem:[#allocation0 + $0x7f] ss:$-1 sm:$0xff]  ;;  %132 = vst.msk [vmem:[#allocation1 + $0x18] sm:$0xff] %vm89_vm0, %v128_v36  ;;  %v170_v44 = vrot.slane %v169_v42, 1 }
  0x10   :  { %180 = vst [vmem:[#allocation1 + $0x38] sm:$0xff] %v179_v39  ;;  %v184_v45 = vrot.slane %v183_v43, 1  ;;  %v192_v46 = vld [vmem:[#allocation0 + $0x87] ss:$-1 sm:$0xff]  ;;  %v197_v47 = vld [vmem:[#allocation0 + $0x8f] ss:$-1 sm:$0xff] }
  0x11   :  { %146 = vst.msk [vmem:[#allocation1 + $0x20] sm:$0xff] %vm89_vm0, %v142_v40  ;;  %160 = vst.msk [vmem:[#allocation1 + $0x28] sm:$0xff] %vm89_vm0, %v156_v41  ;;  %v193_v48 = vrot.slane %v192_v46, 1  ;;  %v198_v49 = vrot.slane %v197_v47, 1  ;;  %v206_v50 = vld [vmem:[#allocation0 + $0x97] ss:$-1 sm:$0xff] }
  0x12   :  { %v211_v51 = vld [vmem:[#allocation0 + $0x9f] ss:$-1 sm:$0xff]  ;;  %174 = vst.msk [vmem:[#allocation1 + $0x30] sm:$0xff] %vm89_vm0, %v170_v44  ;;  %188 = vst.msk [vmem:[#allocation1 + $0x38] sm:$0xff] %vm89_vm0, %v184_v45  ;;  %v207_v52 = vrot.slane %v206_v50, 1 }
  0x13   :  { %v212_v53 = vrot.slane %v211_v51, 1  ;;  %v220_v54 = vld [vmem:[#allocation0 + $0xa7] ss:$-1 sm:$0xff]  ;;  %v225_v55 = vld [vmem:[#allocation0 + $0xaf] ss:$-1 sm:$0xff]  ;;  %194 = vst [vmem:[#allocation1 + $0x40] sm:$0xff] %v193_v48 }
  0x14   :  { %v221_v56 = vrot.slane %v220_v54, 1  ;;  %v226_v57 = vrot.slane %v225_v55, 1  ;;  %v234_v58 = vld [vmem:[#allocation0 + $0xb7] ss:$-1 sm:$0xff]  ;;  %v239_v59 = vld [vmem:[#allocation0 + $0xbf] ss:$-1 sm:$0xff] }
  0x15   :  { %202 = vst.msk [vmem:[#allocation1 + $0x40] sm:$0xff] %vm89_vm0, %v198_v49  ;;  %208 = vst [vmem:[#allocation1 + $0x48] sm:$0xff] %v207_v52  ;;  %v235_v60 = vrot.slane %v234_v58, 1  ;;  %v240_v61 = vrot.slane %v239_v59, 1  ;;  %v294_v62 = vld [vmem:[#allocation1] sm:$0xff]  ;;  %v296_v63 = vld [vmem:[#allocation1 + $0x8] sm:$0xff] }
  0x16   :  { %216 = vst.msk [vmem:[#allocation1 + $0x48] sm:$0xff] %vm89_vm0, %v212_v53  ;;  %222 = vst [vmem:[#allocation1 + $0x50] sm:$0xff] %v221_v56  ;;  %v298_v0 = vld [vmem:[#allocation1 + $0x10] sm:$0xff]  ;;  %v300_v1 = vld [vmem:[#allocation1 + $0x18] sm:$0xff] }
  0x17   :  { %230 = vst.msk [vmem:[#allocation1 + $0x50] sm:$0xff] %vm89_vm0, %v226_v57  ;;  %236 = vst [vmem:[#allocation1 + $0x58] sm:$0xff] %v235_v60 }
  0x18   :  { %244 = vst.msk [vmem:[#allocation1 + $0x58] sm:$0xff] %vm89_vm0, %v240_v61  ;;  %295 = vst [vmem:[%s473_s1] sm:$0xff] %v294_v62  ;;  %v302_v2 = vld [vmem:[#allocation1 + $0x20] sm:$0xff]  ;;  %v304_v3 = vld [vmem:[#allocation1 + $0x28] sm:$0xff] }
  0x19   :  { %297 = vst [vmem:[%s473_s1 + $0x8] sm:$0xff] %v296_v63  ;;  %299 = vst [vmem:[%s473_s1 + $0x10] sm:$0xff] %v298_v0  ;;  %v306_v4 = vld [vmem:[#allocation1 + $0x30] sm:$0xff]  ;;  %v308_v5 = vld [vmem:[#allocation1 + $0x38] sm:$0xff] }
  0x1a   :  { %301 = vst [vmem:[%s473_s1 + $0x18] sm:$0xff] %v300_v1  ;;  %303 = vst [vmem:[%s473_s1 + $0x20] sm:$0xff] %v302_v2 }
  0x1b   :  { %305 = vst [vmem:[%s473_s1 + $0x28] sm:$0xff] %v304_v3  ;;  %307 = vst [vmem:[%s473_s1 + $0x30] sm:$0xff] %v306_v4 }
  0x1c   :  { %309 = vst [vmem:[%s473_s1 + $0x38] sm:$0xff] %v308_v5  ;;  %v310_v6 = vld [vmem:[#allocation1 + $0x40] sm:$0xff] }
  0x1d   :  { %311 = vst [vmem:[%s473_s1 + $0x40] sm:$0xff] %v310_v6  ;;  %v312_v7 = vld [vmem:[#allocation1 + $0x48] sm:$0xff] }
  0x1e   :  { %313 = vst [vmem:[%s473_s1 + $0x48] sm:$0xff] %v312_v7  ;;  %v314_v8 = vld [vmem:[#allocation1 + $0x50] sm:$0xff] }
  0x1f   :  { %315 = vst [vmem:[%s473_s1 + $0x50] sm:$0xff] %v314_v8  ;;  %v316_v9 = vld [vmem:[#allocation1 + $0x58] sm:$0xff] }
  0x20   :  { %317 = vst [vmem:[%s473_s1 + $0x58] sm:$0xff] %v316_v9 }

// kernel: spectral_conv2d_dy.1
= control target key start
LH: loop header
LB: loop body
LE: loop exit
PB: predicated region body
PF: predicated region fallthrough
CT: control target
= control target key end

     0   :  { %s33054_s21 = smov 0   ;;  %s33056_s22 = smov 0   ;;  %s36341_s0 = inlined_call_operand.vmem [shape: f32[3,2,1], index: 0, kind: input, shape index: {}]   ;;  %s36342_s1 = inlined_call_operand.vmem [shape: f32[32,2,4], index: 1, kind: input, shape index: {}]   ;;  %s36343_s2 = inlined_call_operand.vmem [shape: f32[32,2,4], index: 2, kind: input, shape index: {}]   ;;  %s36344_s3 = inlined_call_operand.vmem [shape: f32[3,32,4,6], index: 3, kind: input, shape index: {}]   ;;  %s36345_s4 = inlined_call_operand.vmem [shape: f32[3,32,4,6], index: 4, kind: input, shape index: {}]   ;;  %s36346_s5 = inlined_call_operand.vmem [shape: f32[32,2,6], index: 5, kind: output, shape index: {0}]   ;;  %s36347_s6 = inlined_call_operand.vmem [shape: f32[32,2,6], index: 6, kind: output, shape index: {1}]  }
   0x1   :  { %s33058_s23 = smov 0   ;;  %s33060_s24 = smov 0  }
   0x2   :  { %s33062_s25 = smov 0  }
   0x3 LB: > { %s26_s26 = sadd.s32 1, %s33006_s23  ;;  %s29_s27 = sadd.s32 1, %s33010_s24  ;;  %s33014_s25 = sphi %s33062_s25, %s17_s25   ;;  %s33010_s24 = sphi %s33060_s24, %s37048_s24   ;;  %s33006_s23 = sphi %s33058_s23, %s37047_s23   ;;  %s33002_s22 = sphi %s33056_s22, %s37046_s22   ;;  %s32998_s21 = sphi %s33054_s21, %s37045_s21  }
   0x4   : > { %p27_p0 = scmp.ge.s32.totalorder %s26_s26, 3  ;;  %p29552_p1 = scmp.ge.s32.totalorder %s33014_s25, 1 }
   0x5   : > { %p282_p2 = scmp.lt.s32.totalorder %s33014_s25, 7 }
   0x6   : > { %s37050_s26 = smov (%p27_p0, %s26_s26), 0  ;;  %s37052_s27 = smov (!%p27_p0, %s29_s27), %s33010_s24 }
   0x7   : > { %p283_p3 = pnand %p29552_p1, %p282_p2  ;;  %p31_p4 = scmp.ge.s32.totalorder %s37052_s27, 2 }
   0x9   : > { %s37054_s27 = smov (%p31_p4, %s37052_s27), 0  ;;  %286 = sbr.rel (%p283_p3) target bundleno = 1679 (0x68f), region = 40 }
  0x10   : > { %p344_p5 = scmp.lt.s32.totalorder %s32998_s21, 2  ;;  %s29554_s28 = sshll.u32 %s33002_s22, 4  ;;  %v36351_v0 = vmov 0.0   ;;  %vm33017_vm0 = vmmov 0   ;;  %vm457_vm1 = vcmask 31744   ;;  %vm461_vm2 = vcmask 1043456  }
  0x11   : > { %30340 = vmatprep.subr.mxu0 %v36351_v0  ;;  %30370 = vmatprep.subr.mxu1 %v36351_v0  ;;  %p349_p6 = scmp.lt.s32.totalorder %s29554_s28, 31  ;;  %p29568_p7 = scmp.ne.s32.totalorder %s32998_s21, 0 }
  0x12   : > { %s33090_s29 = scalar_select %p344_p5, %s32998_s21, 2  ;;  %30342 = vmatprep.mubr.msk.f32.mxu0 %vm33017_vm0, %v36351_v0  ;;  %30372 = vmatprep.mubr.msk.f32.mxu1 %vm33017_vm0, %v36351_v0 }
  0x13   : > { %s37056_s28 = smov (!%p349_p6, %s29554_s28), 31  ;;  %vm29252_vm3 = vcmask (!%p29568_p7), 41984  }
  0x14   : > { %s29559_s30 = sshll.u32 %s33090_s29, 5  ;;  %s33099_s8 = sshll.u32 %s37056_s28, 1 }
  0x15   : > { %s33097_s7 = sadd.s32 %s29559_s30, %s37056_s28  ;;  %s33106_s12 = scalar_lea.vmem %s36342_s1, %s33099_s8 }
  0x16   : > { %s29560_s9 = sshll.u32 %s33097_s7, 2  ;;  %s33119_s18 = scalar_lea.vmem %s36346_s5, %s33099_s8  ;;  %v392_v1 = vld [vmem:[%s33106_s12] sm:$0x3]  ;;  %v393_v2 = vld [vmem:[%s33106_s12 + $0x2] sm:$0x3] }
  0x17   : > { %s33113_s15 = scalar_lea.vmem %s36344_s3, %s29560_s9  ;;  %s33129_s22 = scalar_lea.vmem %s36347_s6, %s33099_s8  ;;  %v459_v5 = vsel %vm457_vm1, %v392_v1, 0  ;;  %v912_v6 = vsel %vm457_vm1, %v393_v2, 0  ;;  %v394_v29 = vld [vmem:[%s33106_s12 + $0x4] sm:$0x3]  ;;  %v395_v30 = vld [vmem:[%s33106_s12 + $0x6] sm:$0x3] }
  0x18   : > { %v424_v3 = vld [vmem:[%s33113_s15] sm:$0xf]  ;;  %v425_v4 = vld [vmem:[%s33113_s15 + $0x4] sm:$0xf]  ;;  %v33135_v9 = vand.u32 4294901760, %v459_v5  ;;  %v33137_v10 = vand.u32 4294901760, %v912_v6  ;;  %s34031_s10 = scalar_lea.vmem %s36343_s2, %s33099_s8  ;;  %s34040_s13 = scalar_lea.vmem %s36345_s4, %s29560_s9 }
  0x19   : > { %v463_v7 = vsel %vm461_vm2, %v424_v3, 0  ;;  %v915_v8 = vsel %vm461_vm2, %v425_v4, 0  ;;  %v426_v31 = vld [vmem:[%s33113_s15 + $0x8] sm:$0xf]  ;;  %v427_v32 = vld [vmem:[%s33113_s15 + $0xc] sm:$0xf] }
  0x1a   : > { %36604 = vst [vmem:[#allocation2_spill] sm:$0xff] %v33135_v9  ;;  %36605 = vst [vmem:[#allocation3_spill] sm:$0xff] %v33137_v10  ;;  %v33139_v11 = vand.u32 4294901760, %v463_v7  ;;  %v33141_v12 = vand.u32 4294901760, %v915_v8  ;;  %v33144_v13 = vsub.f32 %v459_v5, %v33135_v9  ;;  %v33147_v14 = vsub.f32 %v912_v6, %v33137_v10  ;;  %v396_v57 = vld [vmem:[%s33106_s12 + $0x8] sm:$0x3] }
  0x1b   : > { %v1364_v33 = vsel %vm457_vm1, %v394_v29, 0  ;;  %v1816_v34 = vsel %vm457_vm1, %v395_v30, 0  ;;  %v1367_v35 = vsel %vm461_vm2, %v426_v31, 0  ;;  %v1819_v36 = vsel %vm461_vm2, %v427_v32, 0  ;;  %v397_v58 = vld [vmem:[%s33106_s12 + $0xa] sm:$0x3] }
  0x1c   : > { %36606 = vst [vmem:[#allocation4_spill] sm:$0xff] %v33144_v13  ;;  %36607 = vst [vmem:[#allocation5_spill] sm:$0xff] %v33147_v14  ;;  %30341 = vmatpush3.msra.mxu0 %v33139_v11  ;;  %30371 = vmatpush3.msra.mxu1 %v33141_v12  ;;  %v33152_v15 = vsub.f32 %v463_v7, %v33139_v11  ;;  %v33155_v16 = vsub.f32 %v915_v8, %v33141_v12  ;;  %v33158_v17 = vand.u32 4294901760, %v33144_v13  ;;  %v428_v59 = vld [vmem:[%s33113_s15 + $0x10] sm:$0xf]  ;;  %s29553_s7 = sshll.u32 %s33090_s29, 1 }
  0x1d   : > { %30345 = vmatprep.subr.mxu0 %v36351_v0  ;;  %v33162_v18 = vand.u32 4294901760, %v33147_v14  ;;  %30375 = vmatprep.subr.mxu1 %v36351_v0  ;;  %v33227_v37 = vand.u32 4294901760, %v1364_v33  ;;  %v33229_v38 = vand.u32 4294901760, %v1816_v34  ;;  %v33233_v39 = vand.u32 4294901760, %v1367_v35  ;;  %v429_v60 = vld [vmem:[%s33113_s15 + $0x14] sm:$0xf]  ;;  %s347_s9 = scalar_lea.vmem %s36341_s0, %s29553_s7 }
  0x1e   : > { %36608 = vst [vmem:[#allocation6_spill] sm:$0xff] %v33158_v17  ;;  %v33166_v19 = vand.u32 4294901760, %v33152_v15  ;;  %v33169_v20 = vand.u32 4294901760, %v33155_v16  ;;  %v534_v21 = vsub.f32 %v33144_v13, %v33158_v17  ;;  %v33235_v40 = vand.u32 4294901760, %v1819_v36 }
  0x1f   : > { %36609 = vst [vmem:[#allocation7_spill] sm:$0xff] %v33162_v18  ;;  %v986_v22 = vsub.f32 %v33147_v14, %v33162_v18  ;;  %36612 = vst [vmem:[#allocation10_spill] sm:$0xff] %v33227_v37  ;;  %v33244_v41 = vsub.f32 %v1364_v33, %v33227_v37  ;;  %v33247_v42 = vsub.f32 %v1816_v34, %v33229_v38  ;;  %v2268_v61 = vsel %vm457_vm1, %v396_v57, 0  ;;  %v431_v57 = vld [vmem:[%s33113_s15 + $0x1c] sm:$0xf] }
  0x20   : > { %v545_v23 = vsub.f32 %v33152_v15, %v33166_v19  ;;  %v997_v24 = vsub.f32 %v33155_v16, %v33169_v20  ;;  %v33179_v25 = vand.u32 4294901760, %v534_v21  ;;  %36613 = vst [vmem:[#allocation11_spill] sm:$0xff] %v33229_v38  ;;  %v33250_v43 = vsub.f32 %v1367_v35, %v33233_v39 }
  0x21   : > { %v33181_v26 = vand.u32 4294901760, %v986_v22  ;;  %36614 = vst [vmem:[#allocation12_spill] sm:$0xff] %v33244_v41  ;;  %36615 = vst [vmem:[#allocation13_spill] sm:$0xff] %v33247_v42  ;;  %v33253_v44 = vsub.f32 %v1819_v36, %v33235_v40  ;;  %v33258_v45 = vand.u32 4294901760, %v33244_v41  ;;  %v33261_v46 = vand.u32 4294901760, %v33247_v42 }
  0x22   : > { %36610 = vst [vmem:[#allocation8_spill] sm:$0xff] %v33179_v25  ;;  %v33183_v27 = vand.u32 4294901760, %v545_v23  ;;  %v33185_v28 = vand.u32 4294901760, %v997_v24  ;;  %30343 = vmatmul.mubr.f32.vlgmr.msra.gmra.mrb[0].mxu0 %v33179_v25  ;;  %v33266_v47 = vand.u32 4294901760, %v33250_v43  ;;  %v2720_v62 = vsel %vm457_vm1, %v397_v58, 0 }
  0x23   : > { %36611 = vst [vmem:[#allocation9_spill] sm:$0xff] %v33181_v26  ;;  %30373 = vmatmul.mubr.f32.vlgmr.msra.gmra.mrb[0].mxu1 %v33181_v26  ;;  %30347 = vmatprep.mubr.msk.f32.mxu0 %vm33017_vm0, %v36351_v0  ;;  %36616 = vst [vmem:[#allocation14_spill] sm:$0xff] %v33258_v45  ;;  %v33269_v48 = vand.u32 4294901760, %v33253_v44  ;;  %v1438_v49 = vsub.f32 %v33244_v41, %v33258_v45  ;;  %v1890_v50 = vsub.f32 %v33247_v42, %v33261_v46 }
  0x24   : > { %30346 = vmatpush3.msra.mxu0 %v33183_v27  ;;  %30376 = vmatpush3.msra.mxu1 %v33185_v28  ;;  %36617 = vst [vmem:[#allocation15_spill] sm:$0xff] %v33261_v46  ;;  %v1449_v51 = vsub.f32 %v33250_v43, %v33266_v47  ;;  %v2271_v63 = vsel %vm461_vm2, %v428_v59, 0  ;;  %v2723_v1 = vsel %vm461_vm2, %v429_v60, 0  ;;  %v33343_v2 = vand.u32 4294901760, %v2268_v61 }
  0x25   : > { %30377 = vmatprep.mubr.msk.f32.mxu1 %vm33017_vm0, %v36351_v0  ;;  %30350 = vmatprep.subr.mxu0 %v36351_v0  ;;  %v1901_v52 = vsub.f32 %v33253_v44, %v33269_v48  ;;  %v33287_v53 = vand.u32 4294901760, %v1438_v49  ;;  %v33289_v54 = vand.u32 4294901760, %v1890_v50  ;;  %v33345_v3 = vand.u32 4294901760, %v2720_v62  ;;  %v398_v50 = vld [vmem:[%s33106_s12 + $0xc] sm:$0x3] }
  0x26   : > { %30380 = vmatprep.subr.mxu1 %v36351_v0  ;;  %v33293_v55 = vand.u32 4294901760, %v1449_v51  ;;  %36620 = vst [vmem:[#allocation18_spill] sm:$0xff] %v33343_v2  ;;  %v33349_v4 = vand.u32 4294901760, %v2271_v63  ;;  %v33351_v5 = vand.u32 4294901760, %v2723_v1  ;;  %v33360_v6 = vsub.f32 %v2268_v61, %v33343_v2  ;;  %v399_v51 = vld [vmem:[%s33106_s12 + $0xe] sm:$0x3] }
  0x27   : > { %36618 = vst [vmem:[#allocation16_spill] sm:$0xff] %v33287_v53  ;;  %36619 = vst [vmem:[#allocation17_spill] sm:$0xff] %v33289_v54  ;;  %v33295_v56 = vand.u32 4294901760, %v1901_v52  ;;  %v33363_v7 = vsub.f32 %v2720_v62, %v33345_v3  ;;  %v430_v52 = vld [vmem:[%s33113_s15 + $0x18] sm:$0xf]  ;;  %v3172_v58 = vsel %vm457_vm1, %v398_v50, 0 }
  0x28   : > { %36621 = vst [vmem:[#allocation19_spill] sm:$0xff] %v33345_v3  ;;  %36622 = vst [vmem:[#allocation20_spill] sm:$0xff] %v33349_v4  ;;  %v33366_v8 = vsub.f32 %v2271_v63, %v33349_v4  ;;  %v33369_v21 = vsub.f32 %v2723_v1, %v33351_v5  ;;  %v33374_v22 = vand.u32 4294901760, %v33360_v6  ;;  %v3624_v59 = vsel %vm457_vm1, %v399_v51, 0 }
  0x29   : > { %36623 = vst [vmem:[#allocation21_spill] sm:$0xff] %v33351_v5  ;;  %36624 = vst [vmem:[#allocation22_spill] sm:$0xff] %v33360_v6  ;;  %v33377_v23 = vand.u32 4294901760, %v33363_v7  ;;  %v3175_v60 = vsel %vm461_vm2, %v430_v52, 0  ;;  %v3627_v61 = vsel %vm461_vm2, %v431_v57, 0  ;;  %v33459_v62 = vand.u32 4294901760, %v3172_v58 }
  0x2a   : > { %30348 = vmatmul.mubr.f32.vlgmr.msra.gmra.mrb[0].mxu0 %v33135_v9  ;;  %36625 = vst [vmem:[#allocation23_spill] sm:$0xff] %v33363_v7  ;;  %36626 = vst [vmem:[#allocation24_spill] sm:$0xff] %v33366_v8  ;;  %v33382_v24 = vand.u32 4294901760, %v33366_v8  ;;  %v33385_v29 = vand.u32 4294901760, %v33369_v21  ;;  %v2342_v30 = vsub.f32 %v33360_v6, %v33374_v22  ;;  %v33461_v63 = vand.u32 4294901760, %v3624_v59 }
  0x2b   : > { %30378 = vmatmul.mubr.f32.vlgmr.msra.gmra.mrb[0].mxu1 %v33137_v10  ;;  %30351 = vmatpush3.msra.mxu0 %v33152_v15  ;;  %36627 = vst [vmem:[#allocation25_spill] sm:$0xff] %v33369_v21  ;;  %36628 = vst [vmem:[#allocation26_spill] sm:$0xff] %v33374_v22  ;;  %v2794_v31 = vsub.f32 %v33363_v7, %v33377_v23  ;;  %v33465_v1 = vand.u32 4294901760, %v3175_v60 }
  0x2c   : > { %30381 = vmatpush3.msra.mxu1 %v33155_v16  ;;  %30352 = vmatprep.mubr.msk.f32.mxu0 %vm33017_vm0, %v36351_v0  ;;  %36629 = vst [vmem:[#allocation27_spill] sm:$0xff] %v33377_v23  ;;  %36630 = vst [vmem:[#allocation28_spill] sm:$0xff] %v33382_v24  ;;  %v2353_v32 = vsub.f32 %v33366_v8, %v33382_v24  ;;  %v2805_v33 = vsub.f32 %v33369_v21, %v33385_v29  ;;  %v33403_v34 = vand.u32 4294901760, %v2342_v30 }
  0x2d   : > { %30382 = vmatprep.mubr.msk.f32.mxu1 %vm33017_vm0, %v36351_v0  ;;  %30355 = vmatprep.subr.mxu0 %v36351_v0  ;;  %36631 = vst [vmem:[#allocation29_spill] sm:$0xff] %v33385_v29  ;;  %v33405_v35 = vand.u32 4294901760, %v2794_v31  ;;  %36636 = vst [vmem:[#allocation34_spill] sm:$0xff] %v33459_v62  ;;  %v33467_v30 = vand.u32 4294901760, %v3627_v61  ;;  %v33476_v31 = vsub.f32 %v3172_v58, %v33459_v62 }
  0x2e   : > { %30385 = vmatprep.subr.mxu1 %v36351_v0  ;;  %36632 = vst [vmem:[#allocation30_spill] sm:$0xff] %v33403_v34  ;;  %v33409_v36 = vand.u32 4294901760, %v2353_v32  ;;  %v33411_v49 = vand.u32 4294901760, %v2805_v33  ;;  %36637 = vst [vmem:[#allocation35_spill] sm:$0xff] %v33461_v63  ;;  %v33479_v32 = vsub.f32 %v3624_v59, %v33461_v63  ;;  %v33482_v33 = vsub.f32 %v3175_v60, %v33465_v1 }
  0x2f   : > { %36633 = vst [vmem:[#allocation31_spill] sm:$0xff] %v33405_v35  ;;  %36638 = vst [vmem:[#allocation36_spill] sm:$0xff] %v33465_v1  ;;  %v33485_v50 = vsub.f32 %v3627_v61, %v33467_v30  ;;  %v33490_v51 = vand.u32 4294901760, %v33476_v31 }
  0x30   : > { %36634 = vst [vmem:[#allocation32_spill] sm:$0xff] %v33409_v36  ;;  %36635 = vst [vmem:[#allocation33_spill] sm:$0xff] %v33411_v49  ;;  %v33493_v52 = vand.u32 4294901760, %v33479_v32  ;;  %v33498_v57 = vand.u32 4294901760, %v33482_v33 }
  0x31   : > { %36639 = vst [vmem:[#allocation37_spill] sm:$0xff] %v33467_v30  ;;  %36640 = vst [vmem:[#allocation38_spill] sm:$0xff] %v33476_v31  ;;  %v33501_v58 = vand.u32 4294901760, %v33485_v50  ;;  %v3246_v59 = vsub.f32 %v33476_v31, %v33490_v51 }
  0x32   : > { %30353 = vmatmul.mubr.f32.vlgmr.msra.gmra.mrb[0].mxu0 %v33144_v13  ;;  %36641 = vst [vmem:[#allocation39_spill] sm:$0xff] %v33479_v32  ;;  %36642 = vst [vmem:[#allocation40_spill] sm:$0xff] %v33482_v33  ;;  %v3698_v60 = vsub.f32 %v33479_v32, %v33493_v52  ;;  %v3257_v61 = vsub.f32 %v33482_v33, %v33498_v57 }
  0x33   : > { %30383 = vmatmul.mubr.f32.vlgmr.msra.gmra.mrb[0].mxu1 %v33147_v14  ;;  %30356 = vmatpush3.msra.mxu0 %v33139_v11  ;;  %36643 = vst [vmem:[#allocation41_spill] sm:$0xff] %v33485_v50  ;;  %36644 = vst [vmem:[#allocation42_spill] sm:$0xff] %v33490_v51 }
  0x34   : > { %30386 = vmatpush3.msra.mxu1 %v33141_v12  ;;  %30357 = vmatprep.mubr.msk.f32.mxu0 %vm33017_vm0, %v36351_v0  ;;  %36645 = vst [vmem:[#allocation43_spill] sm:$0xff] %v33493_v52  ;;  %36646 = vst [vmem:[#allocation44_spill] sm:$0xff] %v33498_v57 }
  0x35   : > { %30387 = vmatprep.mubr.msk.f32.mxu1 %vm33017_vm0, %v36351_v0  ;;  %30360 = vmatprep.subr.mxu0 %v36351_v0  ;;  %36647 = vst [vmem:[#allocation45_spill] sm:$0xff] %v33501_v58 }
  0x36   : > { %30390 = vmatprep.subr.mxu1 %v36351_v0 }
  0x3a   : > { %30358 = vmatmul.mubr.f32.vlgmr.msra.gmra.mrb[0].mxu0 %v33158_v17 }
  0x3b   : > { %30388 = vmatmul.mubr.f32.vlgmr.msra.gmra.mrb[0].mxu1 %v33162_v18  ;;  %30361 = vmatpush3.msra.mxu0 %v33166_v19 }
  0x3c   : > { %30391 = vmatpush3.msra.mxu1 %v33169_v20  ;;  %30362 = vmatprep.mubr.msk.f32.mxu0 %vm33017_vm0, %v36351_v0 }
  0x3d   : > { %30392 = vmatprep.mubr.msk.f32.mxu1 %vm33017_vm0, %v36351_v0  ;;  %30365 = vmatprep.subr.mxu0 %v36351_v0 }
  0x3e   : > { %30395 = vmatprep.subr.mxu1 %v36351_v0 }
  0x42   : > { %30363 = vmatmul.mubr.f32.vlgmr.msra.gmra.mrb[0].mxu0 %v33135_v9 }
  0x43   : > { %30393 = vmatmul.mubr.f32.vlgmr.msra.gmra.mrb[0].mxu1 %v33137_v10  ;;  %30366 = vmatpush3.msra.mxu0 %v33139_v11 }
  0x44   : > { %30396 = vmatpush3.msra.mxu1 %v33141_v12  ;;  %30367 = vmatprep.mubr.msk.f32.mxu0 %vm33017_vm0, %v36351_v0 }
  0x45   : > { %30397 = vmatprep.mubr.msk.f32.mxu1 %vm33017_vm0, %v36351_v0  ;;  %30400 = vmatprep.subr.mxu0 %v36351_v0 }
  0x46   : > { %30430 = vmatprep.subr.mxu1 %v36351_v0 }
  0x4a   : > { %30368 = vmatmul.mubr.f32.vlgmr.msra.gmra.mrb[0].mxu0 %v33135_v9 }
  0x4b   : > { %30398 = vmatmul.mubr.f32.vlgmr.msra.gmra.mrb[0].mxu1 %v33137_v10  ;;  %30401 = vmatpush3.msra.mxu0 %v33233_v39 }
  0x4c   : > { %30431 = vmatpush3.msra.mxu1 %v33235_v40  ;;  %30402 = vmatprep.mubr.msk.f32.mxu0 %vm33017_vm0, %v36351_v0 }
  0x4d   : > { %30432 = vmatprep.mubr.msk.f32.mxu1 %vm33017_vm0, %v36351_v0  ;;  %30405 = vmatprep.subr.mxu0 %v36351_v0 }
  0x4e   : > { %30435 = vmatprep.subr.mxu1 %v36351_v0  ;;  %30403 = vmatmul.mubr.f32.vlgmr.msra.gmra.mrb[2].mxu0 %v33287_v53 }
  0x4f   : > { %30433 = vmatmul.mubr.f32.vlgmr.msra.gmra.mrb[2].mxu1 %v33289_v54  ;;  %30406 = vmatpush3.msra.mxu0 %v33293_v55 }
  0x50   : > { %30436 = vmatpush3.msra.mxu1 %v33295_v56  ;;  %30407 = vmatprep.mubr.msk.f32.mxu0 %vm33017_vm0, %v36351_v0 }
  0x51   : > { %30437 = vmatprep.mubr.msk.f32.mxu1 %vm33017_vm0, %v36351_v0  ;;  %30410 = vmatprep.subr.mxu0 %v36351_v0 }
  0x52   : > { %30440 = vmatprep.subr.mxu1 %v36351_v0 }
  0x56   : > { %30408 = vmatmul.mubr.f32.vlgmr.msra.gmra.mrb[2].mxu0 %v33227_v37 }
  0x57   : > { %30438 = vmatmul.mubr.f32.vlgmr.msra.gmra.mrb[2].mxu1 %v33229_v38  ;;  %30411 = vmatpush3.msra.mxu0 %v33250_v43 }
  0x58   : > { %30441 = vmatpush3.msra.mxu1 %v33253_v44  ;;  %30412 = vmatprep.mubr.msk.f32.mxu0 %vm33017_vm0, %v36351_v0 }
  0x59   : > { %30442 = vmatprep.mubr.msk.f32.mxu1 %vm33017_vm0, %v36351_v0  ;;  %30415 = vmatprep.subr.mxu0 %v36351_v0 }
  0x5a   : > { %30445 = vmatprep.subr.mxu1 %v36351_v0 }
  0x5e   : > { %30413 = vmatmul.mubr.f32.vlgmr.msra.gmra.mrb[2].mxu0 %v33244_v41 }
  0x5f   : > { %30443 = vmatmul.mubr.f32.vlgmr.msra.gmra.mrb[2].mxu1 %v33247_v42  ;;  %30416 = vmatpush3.msra.mxu0 %v33233_v39 }
  0x60   : > { %30446 = vmatpush3.msra.mxu1 %v33235_v40  ;;  %30417 = vmatprep.mubr.msk.f32.mxu0 %vm33017_vm0, %v36351_v0 }
  0x61   : > { %30447 = vmatprep.mubr.msk.f32.mxu1 %vm33017_vm0, %v36351_v0  ;;  %30420 = vmatprep.subr.mxu0 %v36351_v0 }
  0x62   : > { %30450 = vmatprep.subr.mxu1 %v36351_v0 }
  0x66   : > { %30418 = vmatmul.mubr.f32.vlgmr.msra.gmra.mrb[2].mxu0 %v33258_v45 }
  0x67   : > { %30448 = vmatmul.mubr.f32.vlgmr.msra.gmra.mrb[2].mxu1 %v33261_v46  ;;  %30421 = vmatpush3.msra.mxu0 %v33266_v47 }
  0x68   : > { %30451 = vmatpush3.msra.mxu1 %v33269_v48  ;;  %30422 = vmatprep.mubr.msk.f32.mxu0 %vm33017_vm0, %v36351_v0 }
  0x69   : > { %30452 = vmatprep.mubr.msk.f32.mxu1 %vm33017_vm0, %v36351_v0  ;;  %30425 = vmatprep.subr.mxu0 %v36351_v0 }
  0x6a   : > { %30455 = vmatprep.subr.mxu1 %v36351_v0 }
  0x6e   : > { %30423 = vmatmul.mubr.f32.vlgmr.msra.gmra.mrb[2].mxu0 %v33227_v37 }
  0x6f   : > { %30453 = vmatmul.mubr.f32.vlgmr.msra.gmra.mrb[2].mxu1 %v33229_v38  ;;  %30426 = vmatpush3.msra.mxu0 %v33233_v39 }
  0x70   : > { %30456 = vmatpush3.msra.mxu1 %v33235_v40  ;;  %30427 = vmatprep.mubr.msk.f32.mxu0 %vm33017_vm0, %v36351_v0 }
  0x71   : > { %30457 = vmatprep.mubr.msk.f32.mxu1 %vm33017_vm0, %v36351_v0  ;;  %30460 = vmatprep.subr.mxu0 %v36351_v0 }
  0x72   : > { %30490 = vmatprep.subr.mxu1 %v36351_v0 }
  0x76   : > { %30428 = vmatmul.mubr.f32.vlgmr.msra.gmra.mrb[2].mxu0 %v33227_v37 }
  0x77   : > { %30458 = vmatmul.mubr.f32.vlgmr.msra.gmra.mrb[2].mxu1 %v33229_v38  ;;  %30461 = vmatpush3.msra.mxu0 %v33349_v4 }
  0x78   : > { %30491 = vmatpush3.msra.mxu1 %v33351_v5  ;;  %30462 = vmatprep.mubr.msk.f32.mxu0 %vm33017_vm0, %v36351_v0 }
  0x79   : > { %30492 = vmatprep.mubr.msk.f32.mxu1 %vm33017_vm0, %v36351_v0  ;;  %30465 = vmatprep.subr.mxu0 %v36351_v0 }
  0x7a   : > { %30495 = vmatprep.subr.mxu1 %v36351_v0  ;;  %30463 = vmatmul.mubr.f32.vlgmr.msra.gmra.mrb[4].mxu0 %v33403_v34 }
  0x7b   : > { %30493 = vmatmul.mubr.f32.vlgmr.msra.gmra.mrb[4].mxu1 %v33405_v35  ;;  %30466 = vmatpush3.msra.mxu0 %v33409_v36  ;;  %v36652_v35 = vmov 0.0  }
  0x7c   : > { %30496 = vmatpush3.msra.mxu1 %v33411_v49  ;;  %30467 = vmatprep.mubr.msk.f32.mxu0 %vm33017_vm0, %v36351_v0 }
  0x7d   : > { %30497 = vmatprep.mubr.msk.f32.mxu1 %vm33017_vm0, %v36351_v0  ;;  %30470 = vmatprep.subr.mxu0 %v36351_v0 }
  0x7e   : > { %30500 = vmatprep.subr.mxu1 %v36351_v0 }
  0x82   : > { %30468 = vmatmul.mubr.f32.vlgmr.msra.gmra.mrb[4].mxu0 %v33343_v2 }
  0x83   : > { %30498 = vmatmul.mubr.f32.vlgmr.msra.gmra.mrb[4].mxu1 %v33345_v3  ;;  %30471 = vmatpush3.msra.mxu0 %v33366_v8 }
  0x84   : > { %30501 = vmatpush3.msra.mxu1 %v33369_v21  ;;  %30472 = vmatprep.mubr.msk.f32.mxu0 %vm33017_vm0, %v36351_v0 }
  0x85   : > { %30502 = vmatprep.mubr.msk.f32.mxu1 %vm33017_vm0, %v36351_v0  ;;  %30475 = vmatprep.subr.mxu0 %v36351_v0 }
  0x86   : > { %30505 = vmatprep.subr.mxu1 %v36351_v0 }
  0x8a   : > { %30473 = vmatmul.mubr.f32.vlgmr.msra.gmra.mrb[4].mxu0 %v33360_v6 }
  0x8b   : > { %30503 = vmatmul.mubr.f32.vlgmr.msra.gmra.mrb[4].mxu1 %v33363_v7  ;;  %30476 = vmatpush3.msra.mxu0 %v33349_v4  ;;  %v33521_v7 = vand.u32 4294901760, %v3698_v60  ;;  %v432_v60 = vld [vmem:[%s33113_s15 + $0x20] sm:$0xf] }
  0x8c   : > { %30506 = vmatpush3.msra.mxu1 %v33351_v5  ;;  %30477 = vmatprep.mubr.msk.f32.mxu0 %vm33017_vm0, %v36351_v0 }
  0x8d   : > { %30507 = vmatprep.mubr.msk.f32.mxu1 %vm33017_vm0, %v36351_v0  ;;  %30480 = vmatprep.subr.mxu0 %v36351_v0  ;;  %36649 = vst [vmem:[#allocation47_spill] sm:$0xff] %v33521_v7 }
  0x8e   : > { %30510 = vmatprep.subr.mxu1 %v36351_v0 }
  0x92   : > { %30478 = vmatmul.mubr.f32.vlgmr.msra.gmra.mrb[4].mxu0 %v33374_v22  ;;  %v33519_v22 = vand.u32 4294901760, %v3246_v59  ;;  %v401_v59 = vld [vmem:[%s33106_s12 + $0x12] sm:$0x3] }
  0x93   : > { %30508 = vmatmul.mubr.f32.vlgmr.msra.gmra.mrb[4].mxu1 %v33377_v23  ;;  %30481 = vmatpush3.msra.mxu0 %v33382_v24  ;;  %v3709_v23 = vsub.f32 %v33485_v50, %v33501_v58 }
  0x94   : > { %30511 = vmatpush3.msra.mxu1 %v33385_v29  ;;  %30482 = vmatprep.mubr.msk.f32.mxu0 %vm33017_vm0, %v36351_v0  ;;  %36648 = vst [vmem:[#allocation46_spill] sm:$0xff] %v33519_v22 }
  0x95   : > { %30512 = vmatprep.mubr.msk.f32.mxu1 %vm33017_vm0, %v36351_v0  ;;  %30485 = vmatprep.subr.mxu0 %v36351_v0  ;;  %v33527_v6 = vand.u32 4294901760, %v3709_v23  ;;  %v400_v23 = vld [vmem:[%s33106_s12 + $0x10] sm:$0x3] }
  0x96   : > { %30515 = vmatprep.subr.mxu1 %v36351_v0 }
  0x97   : > { %36651 = vst [vmem:[#allocation49_spill] sm:$0xff] %v33527_v6 }
  0x9a   : > { %30483 = vmatmul.mubr.f32.vlgmr.msra.gmra.mrb[4].mxu0 %v33343_v2 }
  0x9b   : > { %30513 = vmatmul.mubr.f32.vlgmr.msra.gmra.mrb[4].mxu1 %v33345_v3  ;;  %30486 = vmatpush3.msra.mxu0 %v33349_v4 }
  0x9c   : > { %30516 = vmatpush3.msra.mxu1 %v33351_v5  ;;  %30487 = vmatprep.mubr.msk.f32.mxu0 %vm33017_vm0, %v36351_v0 }
  0x9d   : > { %30517 = vmatprep.mubr.msk.f32.mxu1 %vm33017_vm0, %v36351_v0  ;;  %30520 = vmatprep.subr.mxu0 %v36351_v0 }
  0x9e   : > { %30550 = vmatprep.subr.mxu1 %v36351_v0  ;;  %v33525_v0 = vand.u32 4294901760, %v3257_v61  ;;  %v433_v61 = vld [vmem:[%s33113_s15 + $0x24] sm:$0xf] }
  0xa0   : > { %36650 = vst [vmem:[#allocation48_spill] sm:$0xff] %v33525_v0 }
  0xa2   : > { %30488 = vmatmul.mubr.f32.vlgmr.msra.gmra.mrb[4].mxu0 %v33343_v2 }
  0xa3   : > { %30518 = vmatmul.mubr.f32.vlgmr.msra.gmra.mrb[4].mxu1 %v33345_v3  ;;  %30521 = vmatpush3.msra.mxu0 %v33465_v1 }
  0xa4   : > { %30551 = vmatpush3.msra.mxu1 %v33467_v30  ;;  %30522 = vmatprep.mubr.msk.f32.mxu0 %vm33017_vm0, %v36652_v35 }
  0xa5   : > { %30552 = vmatprep.mubr.msk.f32.mxu1 %vm33017_vm0, %v36652_v35  ;;  %30525 = vmatprep.subr.mxu0 %v36652_v35 }
  0xa6   : > { %30555 = vmatprep.subr.mxu1 %v36652_v35  ;;  %30523 = vmatmul.mubr.f32.vlgmr.msra.gmra.mrb[6].mxu0 %v33519_v22  ;;  %v4531_v22 = vsel %vm461_vm2, %v433_v61, 0 }
  0xa7   : > { %30553 = vmatmul.mubr.f32.vlgmr.msra.gmra.mrb[6].mxu1 %v33521_v7  ;;  %30526 = vmatpush3.msra.mxu0 %v33525_v0  ;;  %v4079_v7 = vsel %vm461_vm2, %v432_v60, 0 }
  0xa8   : > { %30556 = vmatpush3.msra.mxu1 %v33527_v6  ;;  %30527 = vmatprep.mubr.msk.f32.mxu0 %vm33017_vm0, %v36652_v35  ;;  %v33581_v34 = vand.u32 4294901760, %v4079_v7 }
  0xa9   : > { %30557 = vmatprep.mubr.msk.f32.mxu1 %vm33017_vm0, %v36652_v35  ;;  %30530 = vmatprep.subr.mxu0 %v36652_v35 }
  0xaa   : > { %30560 = vmatprep.subr.mxu1 %v36652_v35  ;;  %36655 = vst [vmem:[#allocation52_spill] sm:$0xff] %v33581_v34  ;;  %v33598_v61 = vsub.f32 %v4079_v7, %v33581_v34 }
  0xac   : > { %36659 = vst [vmem:[#allocation56_spill] sm:$0xff] %v33598_v61  ;;  %v33614_v7 = vand.u32 4294901760, %v33598_v61 }
  0xae   : > { %30528 = vmatmul.mubr.f32.vlgmr.msra.gmra.mrb[6].mxu0 %v33459_v62  ;;  %36663 = vst [vmem:[#allocation60_spill] sm:$0xff] %v33614_v7  ;;  %v4161_v45 = vsub.f32 %v33598_v61, %v33614_v7 }
  0xaf   : > { %30558 = vmatmul.mubr.f32.vlgmr.msra.gmra.mrb[6].mxu1 %v33461_v63  ;;  %30531 = vmatpush3.msra.mxu0 %v33482_v33 }
  0xb0   : > { %30561 = vmatpush3.msra.mxu1 %v33485_v50  ;;  %30532 = vmatprep.mubr.msk.f32.mxu0 %vm33017_vm0, %v36652_v35  ;;  %v33641_v37 = vand.u32 4294901760, %v4161_v45  ;;  %v403_v45 = vld [vmem:[%s33106_s12 + $0x16] sm:$0x3] }
  0xb1   : > { %30562 = vmatprep.mubr.msk.f32.mxu1 %vm33017_vm0, %v36652_v35  ;;  %30535 = vmatprep.subr.mxu0 %v36652_v35 }
  0xb2   : > { %30565 = vmatprep.subr.mxu1 %v36652_v35  ;;  %36667 = vst [vmem:[#allocation64_spill] sm:$0xff] %v33641_v37 }
  0xb6   : > { %30533 = vmatmul.mubr.f32.vlgmr.msra.gmra.mrb[6].mxu0 %v33476_v31  ;;  %v4528_v31 = vsel %vm457_vm1, %v401_v59, 0 }
  0xb7   : > { %30563 = vmatmul.mubr.f32.vlgmr.msra.gmra.mrb[6].mxu1 %v33479_v32  ;;  %30536 = vmatpush3.msra.mxu0 %v33465_v1  ;;  %v4076_v32 = vsel %vm457_vm1, %v400_v23, 0  ;;  %v33577_v2 = vand.u32 4294901760, %v4528_v31  ;;  %v33583_v23 = vand.u32 4294901760, %v4531_v22 }
  0xb8   : > { %30566 = vmatpush3.msra.mxu1 %v33467_v30  ;;  %30537 = vmatprep.mubr.msk.f32.mxu0 %vm33017_vm0, %v36652_v35  ;;  %v33575_v3 = vand.u32 4294901760, %v4076_v32 }
  0xb9   : > { %30567 = vmatprep.mubr.msk.f32.mxu1 %vm33017_vm0, %v36652_v35  ;;  %30540 = vmatprep.subr.mxu0 %v36652_v35  ;;  %36654 = vst [vmem:[#allocation51_spill] sm:$0xff] %v33577_v2  ;;  %36656 = vst [vmem:[#allocation53_spill] sm:$0xff] %v33583_v23  ;;  %v33595_v60 = vsub.f32 %v4528_v31, %v33577_v2 }
  0xba   : > { %30570 = vmatprep.subr.mxu1 %v36652_v35  ;;  %36653 = vst [vmem:[#allocation50_spill] sm:$0xff] %v33575_v3  ;;  %v33592_v59 = vsub.f32 %v4076_v32, %v33575_v3 }
  0xbb   : > { %36658 = vst [vmem:[#allocation55_spill] sm:$0xff] %v33595_v60  ;;  %v33609_v46 = vand.u32 4294901760, %v33595_v60 }
  0xbc   : > { %36657 = vst [vmem:[#allocation54_spill] sm:$0xff] %v33592_v59 }
  0xbd   : > { %36662 = vst [vmem:[#allocation59_spill] sm:$0xff] %v33609_v46  ;;  %v4602_v32 = vsub.f32 %v33595_v60, %v33609_v46 }
  0xbe   : > { %30538 = vmatmul.mubr.f32.vlgmr.msra.gmra.mrb[6].mxu0 %v33490_v51  ;;  %v33606_v51 = vand.u32 4294901760, %v33592_v59 }
  0xbf   : > { %30568 = vmatmul.mubr.f32.vlgmr.msra.gmra.mrb[6].mxu1 %v33493_v52  ;;  %30541 = vmatpush3.msra.mxu0 %v33498_v57  ;;  %v33601_v52 = vsub.f32 %v4531_v22, %v33583_v23  ;;  %v33637_v38 = vand.u32 4294901760, %v4602_v32  ;;  %v435_v32 = vld [vmem:[%s33113_s15 + $0x2c] sm:$0xf] }
  0xc0   : > { %30571 = vmatpush3.msra.mxu1 %v33501_v58  ;;  %30542 = vmatprep.mubr.msk.f32.mxu0 %vm33017_vm0, %v36652_v35  ;;  %36661 = vst [vmem:[#allocation58_spill] sm:$0xff] %v33606_v51  ;;  %v4150_v31 = vsub.f32 %v33592_v59, %v33606_v51 }
  0xc1   : > { %30572 = vmatprep.mubr.msk.f32.mxu1 %vm33017_vm0, %v36652_v35  ;;  %30545 = vmatprep.subr.mxu0 %v36652_v35  ;;  %36660 = vst [vmem:[#allocation57_spill] sm:$0xff] %v33601_v52  ;;  %v33617_v22 = vand.u32 4294901760, %v33601_v52  ;;  %36666 = vst [vmem:[#allocation63_spill] sm:$0xff] %v33637_v38 }
  0xc2   : > { %30575 = vmatprep.subr.mxu1 %v36652_v35  ;;  %v33635_v41 = vand.u32 4294901760, %v4150_v31  ;;  %v434_v31 = vld [vmem:[%s33113_s15 + $0x28] sm:$0xf] }
  0xc3   : > { %36664 = vst [vmem:[#allocation61_spill] sm:$0xff] %v33617_v22  ;;  %v4613_v42 = vsub.f32 %v33601_v52, %v33617_v22 }
  0xc4   : > { %36665 = vst [vmem:[#allocation62_spill] sm:$0xff] %v33635_v41 }
  0xc5   : > { %v33643_v54 = vand.u32 4294901760, %v4613_v42  ;;  %v402_v42 = vld [vmem:[%s33106_s12 + $0x14] sm:$0x3] }
  0xc6   : > { %30543 = vmatmul.mubr.f32.vlgmr.msra.gmra.mrb[6].mxu0 %v33459_v62 }
  0xc7   : > { %30573 = vmatmul.mubr.f32.vlgmr.msra.gmra.mrb[6].mxu1 %v33461_v63  ;;  %30546 = vmatpush3.msra.mxu0 %v33465_v1  ;;  %36668 = vst [vmem:[#allocation65_spill] sm:$0xff] %v33643_v54 }
  0xc8   : > { %30576 = vmatpush3.msra.mxu1 %v33467_v30  ;;  %30547 = vmatprep.mubr.msk.f32.mxu0 %vm33017_vm0, %v36652_v35 }
  0xc9   : > { %30577 = vmatprep.mubr.msk.f32.mxu1 %vm33017_vm0, %v36652_v35  ;;  %30580 = vmatprep.subr.mxu0 %v36652_v35 }
  0xca   : > { %30610 = vmatprep.subr.mxu1 %v36652_v35 }
  0xce   : > { %30548 = vmatmul.mubr.f32.vlgmr.msra.gmra.mrb[6].mxu0 %v33459_v62 }
  0xcf   : > { %30578 = vmatmul.mubr.f32.vlgmr.msra.gmra.mrb[6].mxu1 %v33461_v63  ;;  %30581 = vmatpush3.msra.mxu0 %v33581_v34 }
  0xd0   : > { %30611 = vmatpush3.msra.mxu1 %v33583_v23  ;;  %30582 = vmatprep.mubr.msk.f32.mxu0 %vm33017_vm0, %v36652_v35 }
  0xd1   : > { %30612 = vmatprep.mubr.msk.f32.mxu1 %vm33017_vm0, %v36652_v35  ;;  %30585 = vmatprep.subr.mxu0 %v36652_v35 }
  0xd2   : > { %30615 = vmatprep.subr.mxu1 %v36652_v35  ;;  %30583 = vmatmul.mubr.f32.vlgmr.msra.gmra.mrb[8].mxu0 %v33635_v41  ;;  %v5435_v41 = vsel %vm461_vm2, %v435_v32, 0 }
  0xd3   : > { %30613 = vmatmul.mubr.f32.vlgmr.msra.gmra.mrb[8].mxu1 %v33637_v38  ;;  %30586 = vmatpush3.msra.mxu0 %v33641_v37  ;;  %v4983_v38 = vsel %vm461_vm2, %v434_v31, 0 }
  0xd4   : > { %30616 = vmatpush3.msra.mxu1 %v33643_v54  ;;  %30587 = vmatprep.mubr.msk.f32.mxu0 %vm33017_vm0, %v36652_v35  ;;  %v33697_v53 = vand.u32 4294901760, %v4983_v38 }
  0xd5   : > { %30617 = vmatprep.mubr.msk.f32.mxu1 %vm33017_vm0, %v36652_v35  ;;  %30590 = vmatprep.subr.mxu0 %v36652_v35 }
  0xd6   : > { %30620 = vmatprep.subr.mxu1 %v36652_v35  ;;  %36671 = vst [vmem:[#allocation68_spill] sm:$0xff] %v33697_v53  ;;  %v33714_v32 = vsub.f32 %v4983_v38, %v33697_v53 }
  0xd8   : > { %36675 = vst [vmem:[#allocation72_spill] sm:$0xff] %v33714_v32  ;;  %v33730_v38 = vand.u32 4294901760, %v33714_v32 }
  0xda   : > { %30588 = vmatmul.mubr.f32.vlgmr.msra.gmra.mrb[8].mxu0 %v33575_v3  ;;  %36679 = vst [vmem:[#allocation76_spill] sm:$0xff] %v33730_v38  ;;  %v5065_v17 = vsub.f32 %v33714_v32, %v33730_v38 }
  0xdb   : > { %30618 = vmatmul.mubr.f32.vlgmr.msra.gmra.mrb[8].mxu1 %v33577_v2  ;;  %30591 = vmatpush3.msra.mxu0 %v33598_v61 }
  0xdc   : > { %30621 = vmatpush3.msra.mxu1 %v33601_v52  ;;  %30592 = vmatprep.mubr.msk.f32.mxu0 %vm33017_vm0, %v36652_v35  ;;  %v33757_v9 = vand.u32 4294901760, %v5065_v17  ;;  %v405_v17 = vld [vmem:[%s33106_s12 + $0x1a] sm:$0x3] }
  0xdd   : > { %30622 = vmatprep.mubr.msk.f32.mxu1 %vm33017_vm0, %v36652_v35  ;;  %30595 = vmatprep.subr.mxu0 %v36652_v35 }
  0xde   : > { %30625 = vmatprep.subr.mxu1 %v36652_v35  ;;  %36683 = vst [vmem:[#allocation80_spill] sm:$0xff] %v33757_v9 }
  0xe2   : > { %30593 = vmatmul.mubr.f32.vlgmr.msra.gmra.mrb[8].mxu0 %v33592_v59  ;;  %v5432_v59 = vsel %vm457_vm1, %v403_v45, 0 }
  0xe3   : > { %30623 = vmatmul.mubr.f32.vlgmr.msra.gmra.mrb[8].mxu1 %v33595_v60  ;;  %30596 = vmatpush3.msra.mxu0 %v33581_v34  ;;  %v4980_v60 = vsel %vm457_vm1, %v402_v42, 0  ;;  %v33693_v62 = vand.u32 4294901760, %v5432_v59  ;;  %v33699_v42 = vand.u32 4294901760, %v5435_v41 }
  0xe4   : > { %30626 = vmatpush3.msra.mxu1 %v33583_v23  ;;  %30597 = vmatprep.mubr.msk.f32.mxu0 %vm33017_vm0, %v36652_v35  ;;  %v33691_v63 = vand.u32 4294901760, %v4980_v60 }
  0xe5   : > { %30627 = vmatprep.mubr.msk.f32.mxu1 %vm33017_vm0, %v36652_v35  ;;  %30600 = vmatprep.subr.mxu0 %v36652_v35  ;;  %36670 = vst [vmem:[#allocation67_spill] sm:$0xff] %v33693_v62  ;;  %36672 = vst [vmem:[#allocation69_spill] sm:$0xff] %v33699_v42  ;;  %v33711_v31 = vsub.f32 %v5432_v59, %v33693_v62 }
  0xe6   : > { %30630 = vmatprep.subr.mxu1 %v36652_v35  ;;  %36669 = vst [vmem:[#allocation66_spill] sm:$0xff] %v33691_v63  ;;  %v33708_v45 = vsub.f32 %v4980_v60, %v33691_v63 }
  0xe7   : > { %36674 = vst [vmem:[#allocation71_spill] sm:$0xff] %v33711_v31  ;;  %v33725_v18 = vand.u32 4294901760, %v33711_v31 }
  0xe8   : > { %36673 = vst [vmem:[#allocation70_spill] sm:$0xff] %v33708_v45 }
  0xe9   : > { %36678 = vst [vmem:[#allocation75_spill] sm:$0xff] %v33725_v18  ;;  %v5506_v60 = vsub.f32 %v33711_v31, %v33725_v18 }
  0xea   : > { %30598 = vmatmul.mubr.f32.vlgmr.msra.gmra.mrb[8].mxu0 %v33606_v51  ;;  %v33722_v51 = vand.u32 4294901760, %v33708_v45 }
  0xeb   : > { %30628 = vmatmul.mubr.f32.vlgmr.msra.gmra.mrb[8].mxu1 %v33609_v46  ;;  %30601 = vmatpush3.msra.mxu0 %v33614_v7  ;;  %v33717_v46 = vsub.f32 %v5435_v41, %v33699_v42  ;;  %v33753_v10 = vand.u32 4294901760, %v5506_v60  ;;  %v437_v60 = vld [vmem:[%s33113_s15 + $0x34] sm:$0xf] }
  0xec   : > { %30631 = vmatpush3.msra.mxu1 %v33617_v22  ;;  %30602 = vmatprep.mubr.msk.f32.mxu0 %vm33017_vm0, %v36652_v35  ;;  %36677 = vst [vmem:[#allocation74_spill] sm:$0xff] %v33722_v51  ;;  %v5054_v59 = vsub.f32 %v33708_v45, %v33722_v51 }
  0xed   : > { %30632 = vmatprep.mubr.msk.f32.mxu1 %vm33017_vm0, %v36652_v35  ;;  %30605 = vmatprep.subr.mxu0 %v36652_v35  ;;  %36676 = vst [vmem:[#allocation73_spill] sm:$0xff] %v33717_v46  ;;  %v33733_v41 = vand.u32 4294901760, %v33717_v46  ;;  %36682 = vst [vmem:[#allocation79_spill] sm:$0xff] %v33753_v10 }
  0xee   : > { %30635 = vmatprep.subr.mxu1 %v36652_v35  ;;  %v33751_v13 = vand.u32 4294901760, %v5054_v59  ;;  %v436_v59 = vld [vmem:[%s33113_s15 + $0x30] sm:$0xf] }
  0xef   : > { %36680 = vst [vmem:[#allocation77_spill] sm:$0xff] %v33733_v41  ;;  %v5517_v14 = vsub.f32 %v33717_v46, %v33733_v41 }
  0xf0   : > { %36681 = vst [vmem:[#allocation78_spill] sm:$0xff] %v33751_v13 }
  0xf1   : > { %v33759_v26 = vand.u32 4294901760, %v5517_v14  ;;  %v404_v14 = vld [vmem:[%s33106_s12 + $0x18] sm:$0x3] }
  0xf2   : > { %30603 = vmatmul.mubr.f32.vlgmr.msra.gmra.mrb[8].mxu0 %v33575_v3 }
  0xf3   : > { %30633 = vmatmul.mubr.f32.vlgmr.msra.gmra.mrb[8].mxu1 %v33577_v2  ;;  %30606 = vmatpush3.msra.mxu0 %v33581_v34  ;;  %36684 = vst [vmem:[#allocation81_spill] sm:$0xff] %v33759_v26 }
  0xf4   : > { %30636 = vmatpush3.msra.mxu1 %v33583_v23  ;;  %30607 = vmatprep.mubr.msk.f32.mxu0 %vm33017_vm0, %v36652_v35 }
  0xf5   : > { %30637 = vmatprep.mubr.msk.f32.mxu1 %vm33017_vm0, %v36652_v35  ;;  %30640 = vmatprep.subr.mxu0 %v36652_v35 }
  0xf6   : > { %30670 = vmatprep.subr.mxu1 %v36652_v35 }
  0xfa   : > { %30608 = vmatmul.mubr.f32.vlgmr.msra.gmra.mrb[8].mxu0 %v33575_v3 }
  0xfb   : > { %30638 = vmatmul.mubr.f32.vlgmr.msra.gmra.mrb[8].mxu1 %v33577_v2  ;;  %30641 = vmatpush3.msra.mxu0 %v33697_v53 }
  0xfc   : > { %30671 = vmatpush3.msra.mxu1 %v33699_v42  ;;  %30642 = vmatprep.mubr.msk.f32.mxu0 %vm33017_vm0, %v36652_v35 }
  0xfd   : > { %30672 = vmatprep.mubr.msk.f32.mxu1 %vm33017_vm0, %v36652_v35  ;;  %30645 = vmatprep.subr.mxu0 %v36652_v35 }
  0xfe   : > { %30675 = vmatprep.subr.mxu1 %v36652_v35  ;;  %30643 = vmatmul.mubr.f32.vlgmr.msra.gmra.mrb[10].mxu0 %v33751_v13  ;;  %v6339_v13 = vsel %vm461_vm2, %v437_v60, 0 }
  0xff   : > { %30673 = vmatmul.mubr.f32.vlgmr.msra.gmra.mrb[10].mxu1 %v33753_v10  ;;  %30646 = vmatpush3.msra.mxu0 %v33757_v9  ;;  %v5887_v10 = vsel %vm461_vm2, %v436_v59, 0 }
 0x100   : > { %30676 = vmatpush3.msra.mxu1 %v33759_v26  ;;  %30647 = vmatprep.mubr.msk.f32.mxu0 %vm33017_vm0, %v36652_v35  ;;  %v33813_v25 = vand.u32 4294901760, %v5887_v10 }
 0x101   : > { %30677 = vmatprep.mubr.msk.f32.mxu1 %vm33017_vm0, %v36652_v35  ;;  %30650 = vmatprep.subr.mxu0 %v36652_v35 }
 0x102   : > { %30680 = vmatprep.subr.mxu1 %v36652_v35  ;;  %36687 = vst [vmem:[#allocation84_spill] sm:$0xff] %v33813_v25  ;;  %v33830_v60 = vsub.f32 %v5887_v10, %v33813_v25 }
 0x104   : > { %36691 = vst [vmem:[#allocation88_spill] sm:$0xff] %v33830_v60  ;;  %v33850_v10 = vand.u32 4294901760, %v33830_v60 }
 0x106   : > { %30648 = vmatmul.mubr.f32.vlgmr.msra.gmra.mrb[10].mxu0 %v33691_v63  ;;  %36695 = vst [vmem:[#allocation92_spill] sm:$0xff] %v33850_v10 }
 0x107   : > { %30678 = vmatmul.mubr.f32.vlgmr.msra.gmra.mrb[10].mxu1 %v33693_v62  ;;  %30651 = vmatpush3.msra.mxu0 %v33714_v32  ;;  %v5969_v32 = vsub.f32 %v33830_v60, %v33850_v10 }
 0x108   : > { %30681 = vmatpush3.msra.mxu1 %v33717_v46  ;;  %30652 = vmatprep.mubr.msk.f32.mxu0 %vm33017_vm0, %v36652_v35 }
 0x109   : > { %30682 = vmatprep.mubr.msk.f32.mxu1 %vm33017_vm0, %v36652_v35  ;;  %30655 = vmatprep.subr.mxu0 %v36652_v35 }
 0x10a   : > { %30685 = vmatprep.subr.mxu1 %v36652_v35 }
 0x10e   : > { %30653 = vmatmul.mubr.f32.vlgmr.msra.gmra.mrb[10].mxu0 %v33708_v45  ;;  %v6336_v45 = vsel %vm457_vm1, %v405_v17, 0 }
 0x10f   : > { %30683 = vmatmul.mubr.f32.vlgmr.msra.gmra.mrb[10].mxu1 %v33711_v31  ;;  %30656 = vmatpush3.msra.mxu0 %v33697_v53  ;;  %v5884_v31 = vsel %vm457_vm1, %v404_v14, 0  ;;  %v33809_v3 = vand.u32 4294901760, %v6336_v45  ;;  %v33815_v14 = vand.u32 4294901760, %v6339_v13 }
 0x110   : > { %30686 = vmatpush3.msra.mxu1 %v33699_v42  ;;  %30657 = vmatprep.mubr.msk.f32.mxu0 %vm33017_vm0, %v36652_v35  ;;  %v33807_v2 = vand.u32 4294901760, %v5884_v31 }
 0x111   : > { %30687 = vmatprep.mubr.msk.f32.mxu1 %vm33017_vm0, %v36652_v35  ;;  %30660 = vmatprep.subr.mxu0 %v36652_v35  ;;  %36686 = vst [vmem:[#allocation83_spill] sm:$0xff] %v33809_v3  ;;  %36688 = vst [vmem:[#allocation85_spill] sm:$0xff] %v33815_v14  ;;  %v33827_v59 = vsub.f32 %v6336_v45, %v33809_v3 }
 0x112   : > { %30690 = vmatprep.subr.mxu1 %v36652_v35  ;;  %36685 = vst [vmem:[#allocation82_spill] sm:$0xff] %v33807_v2  ;;  %v33824_v17 = vsub.f32 %v5884_v31, %v33807_v2 }
 0x113   : > { %36690 = vst [vmem:[#allocation87_spill] sm:$0xff] %v33827_v59  ;;  %v33845_v45 = vand.u32 4294901760, %v33827_v59 }
 0x114   : > { %36689 = vst [vmem:[#allocation86_spill] sm:$0xff] %v33824_v17  ;;  %v33842_v31 = vand.u32 4294901760, %v33824_v17 }
 0x115   : > { %36694 = vst [vmem:[#allocation91_spill] sm:$0xff] %v33845_v45 }
 0x116   : > { %30658 = vmatmul.mubr.f32.vlgmr.msra.gmra.mrb[10].mxu0 %v33722_v51  ;;  %36693 = vst [vmem:[#allocation90_spill] sm:$0xff] %v33842_v31 }
 0x117   : > { %30688 = vmatmul.mubr.f32.vlgmr.msra.gmra.mrb[10].mxu1 %v33725_v18  ;;  %30661 = vmatpush3.msra.mxu0 %v33730_v38  ;;  %v33833_v18 = vsub.f32 %v6339_v13, %v33815_v14 }
 0x118   : > { %30691 = vmatpush3.msra.mxu1 %v33733_v41  ;;  %30662 = vmatprep.mubr.msk.f32.mxu0 %vm33017_vm0, %v36652_v35 }
 0x119   : > { %30692 = vmatprep.mubr.msk.f32.mxu1 %vm33017_vm0, %v36652_v35  ;;  %30665 = vmatprep.subr.mxu0 %v36652_v35  ;;  %36692 = vst [vmem:[#allocation89_spill] sm:$0xff] %v33833_v18  ;;  %v33853_v13 = vand.u32 4294901760, %v33833_v18 }
 0x11a   : > { %30695 = vmatprep.subr.mxu1 %v36652_v35 }
 0x11b   : > { %36696 = vst [vmem:[#allocation93_spill] sm:$0xff] %v33853_v13  ;;  %v6421_v26 = vsub.f32 %v33833_v18, %v33853_v13 }
 0x11d   : > { %v33835_v51 = vpop.f32.mrb[0].mxu0  ;;  %v33879_v22 = vand.u32 4294901760, %v6421_v26  ;;  %v406_v26 = vld [vmem:[%s33106_s12 + $0x1c] sm:$0x3] }
 0x11e   : > { %v33837_v41 = vpop.f32.mrb[0].mxu1  ;;  %v30369_v38 = vpop.f32.mrb[1].mxu0  ;;  %30663 = vmatmul.mubr.f32.vlgmr.msra.gmra.mrb[10].mxu0 %v33691_v63 }
 0x11f   : > { %v30399_v46 = vpop.f32.mrb[1].mxu1  ;;  %30693 = vmatmul.mubr.f32.vlgmr.msra.gmra.mrb[10].mxu1 %v33693_v62  ;;  %30666 = vmatpush3.msra.mxu0 %v33697_v53  ;;  %v6410_v38 = vsub.f32 %v33827_v59, %v33845_v45  ;;  %v33877_v53 = vand.u32 4294901760, %v5969_v32  ;;  %36700 = vst [vmem:[#allocation97_spill] sm:$0xff] %v33879_v22  ;;  %v407_v32 = vld [vmem:[%s33106_s12 + $0x1e] sm:$0x3] }
 0x120   : > { %30696 = vmatpush3.msra.mxu1 %v33699_v42  ;;  %30667 = vmatprep.mubr.msk.f32.mxu0 %vm33017_vm0, %v36652_v35  ;;  %v5958_v46 = vsub.f32 %v33824_v17, %v33842_v31 }
 0x121   : > { %30697 = vmatprep.mubr.msk.f32.mxu1 %vm33017_vm0, %v36652_v35  ;;  %30700 = vmatprep.subr.mxu0 %v36652_v35  ;;  %v33873_v42 = vand.u32 4294901760, %v6410_v38  ;;  %36699 = vst [vmem:[#allocation96_spill] sm:$0xff] %v33877_v53  ;;  %v439_v38 = vld [vmem:[%s33113_s15 + $0x3c] sm:$0xf] }
 0x122   : > { %30730 = vmatprep.subr.mxu1 %v36652_v35  ;;  %v33871_v9 = vand.u32 4294901760, %v5958_v46  ;;  %v438_v46 = vld [vmem:[%s33113_s15 + $0x38] sm:$0xf] }
 0x123   : > { %36698 = vst [vmem:[#allocation95_spill] sm:$0xff] %v33873_v42 }
 0x124   : > { %36697 = vst [vmem:[#allocation94_spill] sm:$0xff] %v33871_v9 }
 0x126   : > { %30668 = vmatmul.mubr.f32.vlgmr.msra.gmra.mrb[10].mxu0 %v33691_v63 }
 0x127   : > { %30698 = vmatmul.mubr.f32.vlgmr.msra.gmra.mrb[10].mxu1 %v33693_v62  ;;  %30701 = vmatpush3.msra.mxu0 %v33813_v25 }
 0x128   : > { %30731 = vmatpush3.msra.mxu1 %v33815_v14  ;;  %30702 = vmatprep.mubr.msk.f32.mxu0 %vm33017_vm0, %v36652_v35 }
 0x129   : > { %30732 = vmatprep.mubr.msk.f32.mxu1 %vm33017_vm0, %v36652_v35  ;;  %30705 = vmatprep.subr.mxu0 %v36652_v35 }
 0x12a   : > { %30735 = vmatprep.subr.mxu1 %v36652_v35  ;;  %30703 = vmatmul.mubr.f32.vlgmr.msra.gmra.mrb[12].mxu0 %v33871_v9  ;;  %v7243_v9 = vsel %vm461_vm2, %v439_v38, 0 }
 0x12b   : > { %30733 = vmatmul.mubr.f32.vlgmr.msra.gmra.mrb[12].mxu1 %v33873_v42  ;;  %30706 = vmatpush3.msra.mxu0 %v33877_v53  ;;  %v6791_v42 = vsel %vm461_vm2, %v438_v46, 0 }
 0x12c   : > { %30736 = vmatpush3.msra.mxu1 %v33879_v22  ;;  %30707 = vmatprep.mubr.msk.f32.mxu0 %vm33017_vm0, %v36652_v35 }
 0x12d   : > { %30737 = vmatprep.mubr.msk.f32.mxu1 %vm33017_vm0, %v36652_v35  ;;  %30710 = vmatprep.subr.mxu0 %v36652_v35 }
 0x12e   : > { %30740 = vmatprep.subr.mxu1 %v36652_v35 }
 0x132   : > { %30708 = vmatmul.mubr.f32.vlgmr.msra.gmra.mrb[12].mxu0 %v33807_v2 }
 0x133   : > { %30738 = vmatmul.mubr.f32.vlgmr.msra.gmra.mrb[12].mxu1 %v33809_v3  ;;  %30711 = vmatpush3.msra.mxu0 %v33830_v60 }
 0x134   : > { %30741 = vmatpush3.msra.mxu1 %v33833_v18  ;;  %30712 = vmatprep.mubr.msk.f32.mxu0 %vm33017_vm0, %v36652_v35  ;;  %v33933_v18 = vand.u32 4294901760, %v6791_v42 }
 0x135   : > { %30742 = vmatprep.mubr.msk.f32.mxu1 %vm33017_vm0, %v36652_v35  ;;  %30715 = vmatprep.subr.mxu0 %v36652_v35 }
 0x136   : > { %30745 = vmatprep.subr.mxu1 %v36652_v35  ;;  %36703 = vst [vmem:[#allocation100_spill] sm:$0xff] %v33933_v18  ;;  %v33950_v38 = vsub.f32 %v6791_v42, %v33933_v18 }
 0x138   : > { %36707 = vst [vmem:[#allocation104_spill] sm:$0xff] %v33950_v38 }
 0x13a   : > { %30713 = vmatmul.mubr.f32.vlgmr.msra.gmra.mrb[12].mxu0 %v33824_v17  ;;  %v7240_v17 = vsel %vm457_vm1, %v407_v32, 0 }
 0x13b   : > { %30743 = vmatmul.mubr.f32.vlgmr.msra.gmra.mrb[12].mxu1 %v33827_v59  ;;  %30716 = vmatpush3.msra.mxu0 %v33813_v25  ;;  %v6788_v59 = vsel %vm457_vm1, %v406_v26, 0  ;;  %v33929_v63 = vand.u32 4294901760, %v7240_v17  ;;  %v33935_v26 = vand.u32 4294901760, %v7243_v9 }
 0x13c   : > { %30746 = vmatpush3.msra.mxu1 %v33815_v14  ;;  %30717 = vmatprep.mubr.msk.f32.mxu0 %vm33017_vm0, %v36652_v35  ;;  %v33927_v62 = vand.u32 4294901760, %v6788_v59 }
 0x13d   : > { %30747 = vmatprep.mubr.msk.f32.mxu1 %vm33017_vm0, %v36652_v35  ;;  %30720 = vmatprep.subr.mxu0 %v36652_v35  ;;  %36702 = vst [vmem:[#allocation99_spill] sm:$0xff] %v33929_v63  ;;  %36704 = vst [vmem:[#allocation101_spill] sm:$0xff] %v33935_v26  ;;  %v33947_v46 = vsub.f32 %v7240_v17, %v33929_v63 }
 0x13e   : > { %30750 = vmatprep.subr.mxu1 %v36652_v35  ;;  %36701 = vst [vmem:[#allocation98_spill] sm:$0xff] %v33927_v62  ;;  %v33944_v32 = vsub.f32 %v6788_v59, %v33927_v62 }
 0x13f   : > { %36706 = vst [vmem:[#allocation103_spill] sm:$0xff] %v33947_v46  ;;  %v33965_v17 = vand.u32 4294901760, %v33947_v46 }
 0x140   : > { %36705 = vst [vmem:[#allocation102_spill] sm:$0xff] %v33944_v32  ;;  %v33962_v59 = vand.u32 4294901760, %v33944_v32 }
 0x141   : > { %36710 = vst [vmem:[#allocation107_spill] sm:$0xff] %v33965_v17 }
 0x142   : > { %30718 = vmatmul.mubr.f32.vlgmr.msra.gmra.mrb[12].mxu0 %v33842_v31  ;;  %36709 = vst [vmem:[#allocation106_spill] sm:$0xff] %v33962_v59 }
 0x143   : > { %30748 = vmatmul.mubr.f32.vlgmr.msra.gmra.mrb[12].mxu1 %v33845_v45  ;;  %30721 = vmatpush3.msra.mxu0 %v33850_v10  ;;  %v33953_v45 = vsub.f32 %v7243_v9, %v33935_v26  ;;  %v33970_v9 = vand.u32 4294901760, %v33950_v38 }
 0x144   : > { %30751 = vmatpush3.msra.mxu1 %v33853_v13  ;;  %30722 = vmatprep.mubr.msk.f32.mxu0 %vm33017_vm0, %v36652_v35 }
 0x145   : > { %30752 = vmatprep.mubr.msk.f32.mxu1 %vm33017_vm0, %v36652_v35  ;;  %30725 = vmatprep.subr.mxu0 %v36652_v35  ;;  %36708 = vst [vmem:[#allocation105_spill] sm:$0xff] %v33953_v45  ;;  %36711 = vst [vmem:[#allocation108_spill] sm:$0xff] %v33970_v9  ;;  %v33973_v42 = vand.u32 4294901760, %v33953_v45  ;;  %v6873_v22 = vsub.f32 %v33950_v38, %v33970_v9 }
 0x146   : > { %30755 = vmatprep.subr.mxu1 %v36652_v35 }
 0x147   : > { %36712 = vst [vmem:[#allocation109_spill] sm:$0xff] %v33973_v42  ;;  %v7325_v53 = vsub.f32 %v33953_v45, %v33973_v42  ;;  %v33997_v7 = vand.u32 4294901760, %v6873_v22  ;;  %v409_v22 = vld [vmem:[%s34031_s10 + $0x2] sm:$0x3] }
 0x149   : > { %v33955_v31 = vpop.f32.mrb[2].mxu0  ;;  %36715 = vst [vmem:[#allocation112_spill] sm:$0xff] %v33997_v7  ;;  %v33999_v52 = vand.u32 4294901760, %v7325_v53  ;;  %v408_v53 = vld [vmem:[%s34031_s10] sm:$0x3] }
 0x14a   : > { %v33957_v13 = vpop.f32.mrb[2].mxu1  ;;  %v30429_v10 = vpop.f32.mrb[3].mxu0  ;;  %30723 = vmatmul.mubr.f32.vlgmr.msra.gmra.mrb[12].mxu0 %v33807_v2 }
 0x14b   : > { %v30459_v60 = vpop.f32.mrb[3].mxu1  ;;  %30753 = vmatmul.mubr.f32.vlgmr.msra.gmra.mrb[12].mxu1 %v33809_v3  ;;  %30726 = vmatpush3.msra.mxu0 %v33813_v25  ;;  %v7314_v10 = vsub.f32 %v33947_v46, %v33965_v17  ;;  %36716 = vst [vmem:[#allocation113_spill] sm:$0xff] %v33999_v52 }
 0x14c   : > { %30756 = vmatpush3.msra.mxu1 %v33815_v14  ;;  %30727 = vmatprep.mubr.msk.f32.mxu0 %vm33017_vm0, %v36652_v35  ;;  %v6862_v60 = vsub.f32 %v33944_v32, %v33962_v59 }
 0x14d   : > { %30757 = vmatprep.mubr.msk.f32.mxu1 %vm33017_vm0, %v36652_v35  ;;  %30760 = vmatprep.subr.mxu0 %v36652_v35  ;;  %v33993_v25 = vand.u32 4294901760, %v7314_v10  ;;  %v441_v10 = vld [vmem:[%s34040_s13 + $0x4] sm:$0xf] }
 0x14e   : > { %30790 = vmatprep.subr.mxu1 %v36652_v35  ;;  %v33991_v14 = vand.u32 4294901760, %v6862_v60  ;;  %v440_v60 = vld [vmem:[%s34040_s13] sm:$0xf] }
 0x14f   : > { %36714 = vst [vmem:[#allocation111_spill] sm:$0xff] %v33993_v25 }
 0x150   : > { %36713 = vst [vmem:[#allocation110_spill] sm:$0xff] %v33991_v14 }
 0x152   : > { %30728 = vmatmul.mubr.f32.vlgmr.msra.gmra.mrb[12].mxu0 %v33807_v2 }
 0x153   : > { %30758 = vmatmul.mubr.f32.vlgmr.msra.gmra.mrb[12].mxu1 %v33809_v3  ;;  %30761 = vmatpush3.msra.mxu0 %v33933_v18 }
 0x154   : > { %30791 = vmatpush3.msra.mxu1 %v33935_v26  ;;  %30762 = vmatprep.mubr.msk.f32.mxu0 %vm33017_vm0, %v36652_v35 }
 0x155   : > { %30792 = vmatprep.mubr.msk.f32.mxu1 %vm33017_vm0, %v36652_v35  ;;  %30765 = vmatprep.subr.mxu0 %v36652_v35 }
 0x156   : > { %30795 = vmatprep.subr.mxu1 %v36652_v35  ;;  %30763 = vmatmul.mubr.f32.vlgmr.msra.gmra.mrb[14].mxu0 %v33991_v14  ;;  %v8147_v14 = vsel %vm461_vm2, %v441_v10, 0 }
 0x157   : > { %30793 = vmatmul.mubr.f32.vlgmr.msra.gmra.mrb[14].mxu1 %v33993_v25  ;;  %30766 = vmatpush3.msra.mxu0 %v33997_v7  ;;  %v7695_v25 = vsel %vm461_vm2, %v440_v60, 0 }
 0x158   : > { %30796 = vmatpush3.msra.mxu1 %v33999_v52  ;;  %30767 = vmatprep.mubr.msk.f32.mxu0 %vm33017_vm0, %v36652_v35 }
 0x159   : > { %30797 = vmatprep.mubr.msk.f32.mxu1 %vm33017_vm0, %v36652_v35  ;;  %30770 = vmatprep.subr.mxu0 %v36652_v35 }
 0x15a   : > { %30800 = vmatprep.subr.mxu1 %v36652_v35 }
 0x15e   : > { %30768 = vmatmul.mubr.f32.vlgmr.msra.gmra.mrb[14].mxu0 %v33927_v62 }
 0x15f   : > { %30798 = vmatmul.mubr.f32.vlgmr.msra.gmra.mrb[14].mxu1 %v33929_v63  ;;  %30771 = vmatpush3.msra.mxu0 %v33950_v38 }
 0x160   : > { %30801 = vmatpush3.msra.mxu1 %v33953_v45  ;;  %30772 = vmatprep.mubr.msk.f32.mxu0 %vm33017_vm0, %v36652_v35  ;;  %v34066_v45 = vand.u32 4294901760, %v7695_v25 }
 0x161   : > { %30802 = vmatprep.mubr.msk.f32.mxu1 %vm33017_vm0, %v36652_v35  ;;  %30775 = vmatprep.subr.mxu0 %v36652_v35 }
 0x162   : > { %30805 = vmatprep.subr.mxu1 %v36652_v35  ;;  %36717 = vst [vmem:[#allocation114_spill] sm:$0xff] %v34066_v45  ;;  %v34083_v10 = vsub.f32 %v7695_v25, %v34066_v45 }
 0x164   : > { %36719 = vst [vmem:[#allocation116_spill] sm:$0xff] %v34083_v10 }
 0x166   : > { %30773 = vmatmul.mubr.f32.vlgmr.msra.gmra.mrb[14].mxu0 %v33944_v32  ;;  %v8144_v32 = vsel %vm457_vm1, %v409_v22, 0 }
 0x167   : > { %30803 = vmatmul.mubr.f32.vlgmr.msra.gmra.mrb[14].mxu1 %v33947_v46  ;;  %30776 = vmatpush3.msra.mxu0 %v33933_v18  ;;  %v7692_v46 = vsel %vm457_vm1, %v408_v53, 0  ;;  %v34062_v2 = vand.u32 4294901760, %v8144_v32  ;;  %v34068_v53 = vand.u32 4294901760, %v8147_v14 }
 0x168   : > { %30806 = vmatpush3.msra.mxu1 %v33935_v26  ;;  %30777 = vmatprep.mubr.msk.f32.mxu0 %vm33017_vm0, %v36652_v35  ;;  %v34060_v3 = vand.u32 4294901760, %v7692_v46 }
 0x169   : > { %30807 = vmatprep.mubr.msk.f32.mxu1 %vm33017_vm0, %v36652_v35  ;;  %30780 = vmatprep.subr.mxu0 %v36652_v35  ;;  %36718 = vst [vmem:[#allocation115_spill] sm:$0xff] %v34068_v53  ;;  %v34080_v60 = vsub.f32 %v8144_v32, %v34062_v2 }
 0x16a   : > { %30810 = vmatprep.subr.mxu1 %v36652_v35  ;;  %v34077_v22 = vsub.f32 %v7692_v46, %v34060_v3 }
 0x16b   : > { %v34098_v25 = vand.u32 4294901760, %v34080_v60 }
 0x16c   : > { %v34095_v46 = vand.u32 4294901760, %v34077_v22 }
 0x16e   : > { %30778 = vmatmul.mubr.f32.vlgmr.msra.gmra.mrb[14].mxu0 %v33962_v59 }
 0x16f   : > { %30808 = vmatmul.mubr.f32.vlgmr.msra.gmra.mrb[14].mxu1 %v33965_v17  ;;  %30781 = vmatpush3.msra.mxu0 %v33970_v9  ;;  %v34086_v17 = vsub.f32 %v8147_v14, %v34068_v53  ;;  %v34103_v14 = vand.u32 4294901760, %v34083_v10 }
 0x170   : > { %30811 = vmatpush3.msra.mxu1 %v33973_v42  ;;  %30782 = vmatprep.mubr.msk.f32.mxu0 %vm33017_vm0, %v36652_v35 }
 0x171   : > { %30812 = vmatprep.mubr.msk.f32.mxu1 %vm33017_vm0, %v36652_v35  ;;  %30785 = vmatprep.subr.mxu0 %v36652_v35  ;;  %36720 = vst [vmem:[#allocation117_spill] sm:$0xff] %v34086_v17  ;;  %36721 = vst [vmem:[#allocation118_spill] sm:$0xff] %v34103_v14  ;;  %v34106_v32 = vand.u32 4294901760, %v34086_v17  ;;  %v7777_v52 = vsub.f32 %v34083_v10, %v34103_v14 }
 0x172   : > { %30815 = vmatprep.subr.mxu1 %v36652_v35 }
 0x173   : > { %36722 = vst [vmem:[#allocation119_spill] sm:$0xff] %v34106_v32  ;;  %v8229_v7 = vsub.f32 %v34086_v17, %v34106_v32  ;;  %v34131_v54 = vand.u32 4294901760, %v7777_v52  ;;  %v456_v52 = vld [vmem:[%s347_s9] sm:$0x3] }
 0x175   : > { %v34088_v59 = vpop.f32.mrb[4].mxu0  ;;  %36723 = vst [vmem:[#allocation120_spill] sm:$0xff] %v34131_v54  ;;  %v34133_v37 = vand.u32 4294901760, %v8229_v7  ;;  %v410_v7 = vld [vmem:[%s34031_s10 + $0x4] sm:$0x3] }
 0x176   : > { %v34090_v42 = vpop.f32.mrb[4].mxu1  ;;  %v30489_v9 = vpop.f32.mrb[5].mxu0  ;;  %30783 = vmatmul.mubr.f32.vlgmr.msra.gmra.mrb[14].mxu0 %v33927_v62 }
 0x177   : > { %v30519_v38 = vpop.f32.mrb[5].mxu1  ;;  %30813 = vmatmul.mubr.f32.vlgmr.msra.gmra.mrb[14].mxu1 %v33929_v63  ;;  %30786 = vmatpush3.msra.mxu0 %v33933_v18  ;;  %v8218_v9 = vsub.f32 %v34080_v60, %v34098_v25  ;;  %36724 = vst [vmem:[#allocation121_spill] sm:$0xff] %v34133_v37 }
 0x178   : > { %30816 = vmatpush3.msra.mxu1 %v33935_v26  ;;  %30787 = vmatprep.mubr.msk.f32.mxu0 %vm33017_vm0, %v36652_v35  ;;  %v7766_v38 = vsub.f32 %v34077_v22, %v34095_v46  ;;  %v33018_v26 = vmov 0  }
 0x179   : > { %30817 = vmatprep.mubr.msk.f32.mxu1 %vm33017_vm0, %v36652_v35  ;;  %30820 = vmatprep.subr.mxu0 %v36652_v35  ;;  %v34127_v61 = vand.u32 4294901760, %v8218_v9  ;;  %v443_v9 = vld [vmem:[%s34040_s13 + $0xc] sm:$0xf] }
 0x17a   : > { %30850 = vmatprep.subr.mxu1 %v36652_v35  ;;  %32975 = vset.pattern.permute.xlu0 %v33018_v26  ;;  %v34125_v18 = vand.u32 4294901760, %v7766_v38  ;;  %v411_v26 = vld [vmem:[%s34031_s10 + $0x6] sm:$0x3]  ;;  %v442_v38 = vld [vmem:[%s34040_s13 + $0x8] sm:$0xf] }
 0x17b   : > { %22077 = vperm.xlu0 %32975, %v456_v52   ;;  %v8596_v52 = vsel %vm457_vm1, %v410_v7, 0 }
 0x17e   : > { %30788 = vmatmul.mubr.f32.vlgmr.msra.gmra.mrb[14].mxu0 %v33927_v62  ;;  %v8599_v62 = vsel %vm461_vm2, %v442_v38, 0 }
 0x17f   : > { %30818 = vmatmul.mubr.f32.vlgmr.msra.gmra.mrb[14].mxu1 %v33929_v63  ;;  %30821 = vmatpush3.msra.mxu0 %v34066_v45  ;;  %v9048_v63 = vsel %vm457_vm1, %v411_v26, 0 }
 0x180   : > { %30851 = vmatpush3.msra.mxu1 %v34068_v53  ;;  %30822 = vmatprep.mubr.msk.f32.mxu0 %vm33017_vm0, %v36652_v35 }
 0x181   : > { %30852 = vmatprep.mubr.msk.f32.mxu1 %vm33017_vm0, %v36652_v35  ;;  %30825 = vmatprep.subr.mxu0 %v36652_v35 }
 0x182   : > { %30855 = vmatprep.subr.mxu1 %v36652_v35  ;;  %30823 = vmatmul.mubr.f32.vlgmr.msra.gmra.mrb[16].mxu0 %v34125_v18 }
 0x183   : > { %30853 = vmatmul.mubr.f32.vlgmr.msra.gmra.mrb[16].mxu1 %v34127_v61  ;;  %30826 = vmatpush3.msra.mxu0 %v34131_v54  ;;  %v34190_v54 = vand.u32 4294901760, %v8599_v62 }
 0x184   : > { %30856 = vmatpush3.msra.mxu1 %v34133_v37  ;;  %30827 = vmatprep.mubr.msk.f32.mxu0 %vm33017_vm0, %v36652_v35  ;;  %v34186_v37 = vand.u32 4294901760, %v9048_v63 }
 0x185   : > { %30857 = vmatprep.mubr.msk.f32.mxu1 %vm33017_vm0, %v36652_v35  ;;  %30830 = vmatprep.subr.mxu0 %v36652_v35  ;;  %36725 = vst [vmem:[#allocation122_spill] sm:$0xff] %v34190_v54 }
 0x186   : > { %30860 = vmatprep.subr.mxu1 %v36652_v35  ;;  %v34204_v38 = vsub.f32 %v9048_v63, %v34186_v37 }
 0x188   : > { %v34222_v63 = vand.u32 4294901760, %v34204_v38 }
 0x18a   : > { %30828 = vmatmul.mubr.f32.vlgmr.msra.gmra.mrb[16].mxu0 %v34060_v3 }
 0x18b   : > { %30858 = vmatmul.mubr.f32.vlgmr.msra.gmra.mrb[16].mxu1 %v34062_v2  ;;  %30831 = vmatpush3.msra.mxu0 %v34083_v10  ;;  %v34184_v10 = vand.u32 4294901760, %v8596_v52 }
 0x18c   : > { %30861 = vmatpush3.msra.mxu1 %v34086_v17  ;;  %30832 = vmatprep.mubr.msk.f32.mxu0 %vm33017_vm0, %v36652_v35  ;;  %v9051_v17 = vsel %vm461_vm2, %v443_v9, 0  ;;  %v34207_v9 = vsub.f32 %v8599_v62, %v34190_v54 }
 0x18d   : > { %30862 = vmatprep.mubr.msk.f32.mxu1 %vm33017_vm0, %v36652_v35  ;;  %30835 = vmatprep.subr.mxu0 %v36652_v35  ;;  %v34192_v7 = vand.u32 4294901760, %v9051_v17  ;;  %v34201_v26 = vsub.f32 %v8596_v52, %v34184_v10 }
 0x18e   : > { %30865 = vmatprep.subr.mxu1 %v36652_v35  ;;  %36727 = vst [vmem:[#allocation124_spill] sm:$0xff] %v34207_v9  ;;  %v34227_v62 = vand.u32 4294901760, %v34207_v9 }
 0x18f   : > { %36726 = vst [vmem:[#allocation123_spill] sm:$0xff] %v34192_v7  ;;  %v34219_v52 = vand.u32 4294901760, %v34201_v26 }
 0x190   : > { %36729 = vst [vmem:[#allocation126_spill] sm:$0xff] %v34227_v62 }
 0x192   : > { %30833 = vmatmul.mubr.f32.vlgmr.msra.gmra.mrb[16].mxu0 %v34077_v22 }
 0x193   : > { %30863 = vmatmul.mubr.f32.vlgmr.msra.gmra.mrb[16].mxu1 %v34080_v60  ;;  %30836 = vmatpush3.msra.mxu0 %v34066_v45 }
 0x194   : > { %30866 = vmatpush3.msra.mxu1 %v34068_v53  ;;  %30837 = vmatprep.mubr.msk.f32.mxu0 %vm33017_vm0, %v36652_v35 }
 0x195   : > { %30867 = vmatprep.mubr.msk.f32.mxu1 %vm33017_vm0, %v36652_v35  ;;  %30840 = vmatprep.subr.mxu0 %v36652_v35 }
 0x196   : > { %30870 = vmatprep.subr.mxu1 %v36652_v35 }
 0x19a   : > { %30838 = vmatmul.mubr.f32.vlgmr.msra.gmra.mrb[16].mxu0 %v34095_v46 }
 0x19b   : > { %30868 = vmatmul.mubr.f32.vlgmr.msra.gmra.mrb[16].mxu1 %v34098_v25  ;;  %30841 = vmatpush3.msra.mxu0 %v34103_v14 }
 0x19c   : > { %30871 = vmatpush3.msra.mxu1 %v34106_v32  ;;  %30842 = vmatprep.mubr.msk.f32.mxu0 %vm33017_vm0, %v36652_v35  ;;  %v34210_v32 = vsub.f32 %v9051_v17, %v34192_v7  ;;  %v9122_v17 = vsub.f32 %v34204_v38, %v34222_v63 }
 0x19d   : > { %30872 = vmatprep.mubr.msk.f32.mxu1 %vm33017_vm0, %v36652_v35  ;;  %30845 = vmatprep.subr.mxu0 %v36652_v35 }
 0x19e   : > { %30875 = vmatprep.subr.mxu1 %v36652_v35  ;;  %36728 = vst [vmem:[#allocation125_spill] sm:$0xff] %v34210_v32  ;;  %v34250_v50 = vand.u32 4294901760, %v9122_v17  ;;  %v445_v17 = vld [vmem:[%s34040_s13 + $0x14] sm:$0xf] }
 0x1a1   : > { %v34212_v14 = vpop.f32.mrb[6].mxu0 }
 0x1a2   : > { %v34214_v23 = vpop.f32.mrb[6].mxu1  ;;  %v30549_v34 = vpop.f32.mrb[7].mxu0  ;;  %30843 = vmatmul.mubr.f32.vlgmr.msra.gmra.mrb[16].mxu0 %v34060_v3 }
 0x1a3   : > { %v30579_v58 = vpop.f32.mrb[7].mxu1  ;;  %30873 = vmatmul.mubr.f32.vlgmr.msra.gmra.mrb[16].mxu1 %v34062_v2  ;;  %30846 = vmatpush3.msra.mxu0 %v34066_v45  ;;  %v34230_v34 = vand.u32 4294901760, %v34210_v32 }
 0x1a4   : > { %30876 = vmatpush3.msra.mxu1 %v34068_v53  ;;  %30847 = vmatprep.mubr.msk.f32.mxu0 %vm33017_vm0, %v36652_v35  ;;  %v8670_v58 = vsub.f32 %v34201_v26, %v34219_v52  ;;  %v8681_v53 = vsub.f32 %v34207_v9, %v34227_v62 }
 0x1a5   : > { %36730 = vst [vmem:[#allocation127_spill] sm:$0xff] %v34230_v34  ;;  %30877 = vmatprep.mubr.msk.f32.mxu1 %vm33017_vm0, %v36652_v35  ;;  %30880 = vmatprep.subr.mxu0 %v36652_v35  ;;  %v9133_v45 = vsub.f32 %v34210_v32, %v34230_v34 }
 0x1a6   : > { %30910 = vmatprep.subr.mxu1 %v36652_v35  ;;  %v34248_v57 = vand.u32 4294901760, %v8670_v58  ;;  %v34254_v33 = vand.u32 4294901760, %v8681_v53  ;;  %v413_v53 = vld [vmem:[%s34031_s10 + $0xa] sm:$0x3]  ;;  %v444_v58 = vld [vmem:[%s34040_s13 + $0x10] sm:$0xf] }
 0x1a7   : > { %v34256_v6 = vand.u32 4294901760, %v9133_v45  ;;  %v412_v45 = vld [vmem:[%s34031_s10 + $0x8] sm:$0x3] }
 0x1a8   : > { %36731 = vst [vmem:[#allocation128_spill] sm:$0xff] %v34254_v33 }
 0x1a9   : > { %36732 = vst [vmem:[#allocation129_spill] sm:$0xff] %v34256_v6 }
 0x1aa   : > { %30848 = vmatmul.mubr.f32.vlgmr.msra.gmra.mrb[16].mxu0 %v34060_v3 }
 0x1ab   : > { %30878 = vmatmul.mubr.f32.vlgmr.msra.gmra.mrb[16].mxu1 %v34062_v2  ;;  %30881 = vmatpush3.msra.mxu0 %v34190_v54 }
 0x1ac   : > { %30911 = vmatpush3.msra.mxu1 %v34192_v7  ;;  %30882 = vmatprep.mubr.msk.f32.mxu0 %vm33017_vm0, %v36652_v35 }
 0x1ad   : > { %30912 = vmatprep.mubr.msk.f32.mxu1 %vm33017_vm0, %v36652_v35  ;;  %30885 = vmatprep.subr.mxu0 %v36652_v35 }
 0x1ae   : > { %30915 = vmatprep.subr.mxu1 %v36652_v35  ;;  %30883 = vmatmul.mubr.f32.vlgmr.msra.gmra.mrb[18].mxu0 %v34248_v57 }
 0x1af   : > { %30913 = vmatmul.mubr.f32.vlgmr.msra.gmra.mrb[18].mxu1 %v34250_v50  ;;  %30886 = vmatpush3.msra.mxu0 %v34254_v33  ;;  %v9955_v33 = vsel %vm461_vm2, %v445_v17, 0 }
 0x1b0   : > { %30916 = vmatpush3.msra.mxu1 %v34256_v6  ;;  %30887 = vmatprep.mubr.msk.f32.mxu0 %vm33017_vm0, %v36652_v35  ;;  %v9503_v6 = vsel %vm461_vm2, %v444_v58, 0 }
 0x1b1   : > { %30917 = vmatprep.mubr.msk.f32.mxu1 %vm33017_vm0, %v36652_v35  ;;  %30890 = vmatprep.subr.mxu0 %v36652_v35  ;;  %v34310_v1 = vand.u32 4294901760, %v9503_v6 }
 0x1b2   : > { %30920 = vmatprep.subr.mxu1 %v36652_v35 }
 0x1b3   : > { %36735 = vst [vmem:[#allocation132_spill] sm:$0xff] %v34310_v1  ;;  %v34327_v17 = vsub.f32 %v9503_v6, %v34310_v1 }
 0x1b5   : > { %36739 = vst [vmem:[#allocation136_spill] sm:$0xff] %v34327_v17  ;;  %v34347_v6 = vand.u32 4294901760, %v34327_v17 }
 0x1b6   : > { %30888 = vmatmul.mubr.f32.vlgmr.msra.gmra.mrb[18].mxu0 %v34184_v10 }
 0x1b7   : > { %30918 = vmatmul.mubr.f32.vlgmr.msra.gmra.mrb[18].mxu1 %v34186_v37  ;;  %30891 = vmatpush3.msra.mxu0 %v34207_v9  ;;  %v9952_v9 = vsel %vm457_vm1, %v413_v53, 0  ;;  %36744 = vst [vmem:[#allocation141_spill] sm:$0xff] %v34347_v6 }
 0x1b8   : > { %30921 = vmatpush3.msra.mxu1 %v34210_v32  ;;  %30892 = vmatprep.mubr.msk.f32.mxu0 %vm33017_vm0, %v36652_v35  ;;  %v9500_v32 = vsel %vm457_vm1, %v412_v45, 0  ;;  %v34306_v30 = vand.u32 4294901760, %v9952_v9  ;;  %v34312_v45 = vand.u32 4294901760, %v9955_v33 }
 0x1b9   : > { %30922 = vmatprep.mubr.msk.f32.mxu1 %vm33017_vm0, %v36652_v35  ;;  %30895 = vmatprep.subr.mxu0 %v36652_v35  ;;  %v34304_v0 = vand.u32 4294901760, %v9500_v32 }
 0x1ba   : > { %30925 = vmatprep.subr.mxu1 %v36652_v35  ;;  %36734 = vst [vmem:[#allocation131_spill] sm:$0xff] %v34306_v30  ;;  %36736 = vst [vmem:[#allocation133_spill] sm:$0xff] %v34312_v45  ;;  %v34324_v58 = vsub.f32 %v9952_v9, %v34306_v30 }
 0x1bb   : > { %36733 = vst [vmem:[#allocation130_spill] sm:$0xff] %v34304_v0  ;;  %v34321_v53 = vsub.f32 %v9500_v32, %v34304_v0 }
 0x1bc   : > { %36738 = vst [vmem:[#allocation135_spill] sm:$0xff] %v34324_v58  ;;  %v34342_v9 = vand.u32 4294901760, %v34324_v58 }
 0x1bd   : > { %36737 = vst [vmem:[#allocation134_spill] sm:$0xff] %v34321_v53  ;;  %v34339_v32 = vand.u32 4294901760, %v34321_v53 }
 0x1be   : > { %30893 = vmatmul.mubr.f32.vlgmr.msra.gmra.mrb[18].mxu0 %v34201_v26  ;;  %36743 = vst [vmem:[#allocation140_spill] sm:$0xff] %v34342_v9 }
 0x1bf   : > { %30923 = vmatmul.mubr.f32.vlgmr.msra.gmra.mrb[18].mxu1 %v34204_v38  ;;  %30896 = vmatpush3.msra.mxu0 %v34190_v54  ;;  %36742 = vst [vmem:[#allocation139_spill] sm:$0xff] %v34339_v32 }
 0x1c0   : > { %30926 = vmatpush3.msra.mxu1 %v34192_v7  ;;  %30897 = vmatprep.mubr.msk.f32.mxu0 %vm33017_vm0, %v36652_v35 }
 0x1c1   : > { %30927 = vmatprep.mubr.msk.f32.mxu1 %vm33017_vm0, %v36652_v35  ;;  %30900 = vmatprep.subr.mxu0 %v36652_v35 }
 0x1c2   : > { %30930 = vmatprep.subr.mxu1 %v36652_v35 }
 0x1c6   : > { %30898 = vmatmul.mubr.f32.vlgmr.msra.gmra.mrb[18].mxu0 %v34219_v52 }
 0x1c7   : > { %30928 = vmatmul.mubr.f32.vlgmr.msra.gmra.mrb[18].mxu1 %v34222_v63  ;;  %30901 = vmatpush3.msra.mxu0 %v34227_v62 }
 0x1c8   : > { %30931 = vmatpush3.msra.mxu1 %v34230_v34  ;;  %30902 = vmatprep.mubr.msk.f32.mxu0 %vm33017_vm0, %v36652_v35  ;;  %v34330_v34 = vsub.f32 %v9955_v33, %v34312_v45  ;;  %v10026_v33 = vsub.f32 %v34324_v58, %v34342_v9 }
 0x1c9   : > { %30932 = vmatprep.mubr.msk.f32.mxu1 %vm33017_vm0, %v36652_v35  ;;  %30905 = vmatprep.subr.mxu0 %v36652_v35 }
 0x1ca   : > { %30935 = vmatprep.subr.mxu1 %v36652_v35  ;;  %36740 = vst [vmem:[#allocation137_spill] sm:$0xff] %v34330_v34  ;;  %v34370_v49 = vand.u32 4294901760, %v10026_v33  ;;  %v447_v33 = vld [vmem:[%s34040_s13 + $0x1c] sm:$0xf] }
 0x1cc   : > { %36747 = vst [vmem:[#allocation144_spill] sm:$0xff] %v34370_v49 }
 0x1cd   : > { %v34332_v62 = vpop.f32.mrb[8].mxu0 }
 0x1ce   : > { %v34334_v29 = vpop.f32.mrb[8].mxu1  ;;  %v30609_v24 = vpop.f32.mrb[9].mxu0  ;;  %30903 = vmatmul.mubr.f32.vlgmr.msra.gmra.mrb[18].mxu0 %v34184_v10 }
 0x1cf   : > { %36741 = vst [vmem:[#allocation138_spill] sm:$0xff] %v34334_v29  ;;  %v30639_v21 = vpop.f32.mrb[9].mxu1  ;;  %30933 = vmatmul.mubr.f32.vlgmr.msra.gmra.mrb[18].mxu1 %v34186_v37  ;;  %30906 = vmatpush3.msra.mxu0 %v34190_v54  ;;  %v34350_v24 = vand.u32 4294901760, %v34330_v34 }
 0x1d0   : > { %30936 = vmatpush3.msra.mxu1 %v34192_v7  ;;  %30907 = vmatprep.mubr.msk.f32.mxu0 %vm33017_vm0, %v36652_v35  ;;  %v9574_v21 = vsub.f32 %v34321_v53, %v34339_v32  ;;  %v9585_v7 = vsub.f32 %v34327_v17, %v34347_v6 }
 0x1d1   : > { %36745 = vst [vmem:[#allocation142_spill] sm:$0xff] %v34350_v24  ;;  %30937 = vmatprep.mubr.msk.f32.mxu1 %vm33017_vm0, %v36652_v35  ;;  %30940 = vmatprep.subr.mxu0 %v36652_v35  ;;  %v10037_v54 = vsub.f32 %v34330_v34, %v34350_v24 }
 0x1d2   : > { %30970 = vmatprep.subr.mxu1 %v36652_v35  ;;  %v34368_v8 = vand.u32 4294901760, %v9574_v21  ;;  %v34374_v36 = vand.u32 4294901760, %v9585_v7  ;;  %v415_v7 = vld [vmem:[%s34031_s10 + $0xe] sm:$0x3]  ;;  %v446_v21 = vld [vmem:[%s34040_s13 + $0x18] sm:$0xf] }
 0x1d3   : > { %v34376_v5 = vand.u32 4294901760, %v10037_v54  ;;  %v414_v54 = vld [vmem:[%s34031_s10 + $0xc] sm:$0x3] }
 0x1d4   : > { %36746 = vst [vmem:[#allocation143_spill] sm:$0xff] %v34368_v8  ;;  %36748 = vst [vmem:[#allocation145_spill] sm:$0xff] %v34374_v36 }
 0x1d5   : > { %36749 = vst [vmem:[#allocation146_spill] sm:$0xff] %v34376_v5 }
 0x1d6   : > { %30908 = vmatmul.mubr.f32.vlgmr.msra.gmra.mrb[18].mxu0 %v34184_v10 }
 0x1d7   : > { %30938 = vmatmul.mubr.f32.vlgmr.msra.gmra.mrb[18].mxu1 %v34186_v37  ;;  %30941 = vmatpush3.msra.mxu0 %v34310_v1 }
 0x1d8   : > { %30971 = vmatpush3.msra.mxu1 %v34312_v45  ;;  %30942 = vmatprep.mubr.msk.f32.mxu0 %vm33017_vm0, %v36652_v35 }
 0x1d9   : > { %30972 = vmatprep.mubr.msk.f32.mxu1 %vm33017_vm0, %v36652_v35  ;;  %30945 = vmatprep.subr.mxu0 %v36652_v35 }
 0x1da   : > { %30975 = vmatprep.subr.mxu1 %v36652_v35  ;;  %30943 = vmatmul.mubr.f32.vlgmr.msra.gmra.mrb[20].mxu0 %v34368_v8 }
 0x1db   : > { %30973 = vmatmul.mubr.f32.vlgmr.msra.gmra.mrb[20].mxu1 %v34370_v49  ;;  %30946 = vmatpush3.msra.mxu0 %v34374_v36  ;;  %v10859_v36 = vsel %vm461_vm2, %v447_v33, 0 }
 0x1dc   : > { %30976 = vmatpush3.msra.mxu1 %v34376_v5  ;;  %30947 = vmatprep.mubr.msk.f32.mxu0 %vm33017_vm0, %v36652_v35  ;;  %v10407_v5 = vsel %vm461_vm2, %v446_v21, 0 }
 0x1dd   : > { %30977 = vmatprep.mubr.msk.f32.mxu1 %vm33017_vm0, %v36652_v35  ;;  %30950 = vmatprep.subr.mxu0 %v36652_v35  ;;  %v34430_v49 = vand.u32 4294901760, %v10407_v5 }
 0x1de   : > { %30980 = vmatprep.subr.mxu1 %v36652_v35 }
 0x1df   : > { %36752 = vst [vmem:[#allocation149_spill] sm:$0xff] %v34430_v49  ;;  %v34447_v33 = vsub.f32 %v10407_v5, %v34430_v49 }
 0x1e1   : > { %36756 = vst [vmem:[#allocation153_spill] sm:$0xff] %v34447_v33  ;;  %v34467_v5 = vand.u32 4294901760, %v34447_v33 }
 0x1e2   : > { %30948 = vmatmul.mubr.f32.vlgmr.msra.gmra.mrb[20].mxu0 %v34304_v0 }
 0x1e3   : > { %30978 = vmatmul.mubr.f32.vlgmr.msra.gmra.mrb[20].mxu1 %v34306_v30  ;;  %30951 = vmatpush3.msra.mxu0 %v34327_v17  ;;  %v10856_v17 = vsel %vm457_vm1, %v415_v7, 0  ;;  %36762 = vst [vmem:[#allocation159_spill] sm:$0xff] %v34467_v5 }
 0x1e4   : > { %30981 = vmatpush3.msra.mxu1 %v34330_v34  ;;  %30952 = vmatprep.mubr.msk.f32.mxu0 %vm33017_vm0, %v36652_v35  ;;  %v10404_v34 = vsel %vm457_vm1, %v414_v54, 0  ;;  %v34432_v54 = vand.u32 4294901760, %v10859_v36 }
 0x1e5   : > { %30982 = vmatprep.mubr.msk.f32.mxu1 %vm33017_vm0, %v36652_v35  ;;  %30955 = vmatprep.subr.mxu0 %v36652_v35 }
 0x1e6   : > { %30985 = vmatprep.subr.mxu1 %v36652_v35  ;;  %36753 = vst [vmem:[#allocation150_spill] sm:$0xff] %v34432_v54 }
 0x1ea   : > { %30953 = vmatmul.mubr.f32.vlgmr.msra.gmra.mrb[20].mxu0 %v34321_v53  ;;  %v34426_v53 = vand.u32 4294901760, %v10856_v17 }
 0x1eb   : > { %30983 = vmatmul.mubr.f32.vlgmr.msra.gmra.mrb[20].mxu1 %v34324_v58  ;;  %30956 = vmatpush3.msra.mxu0 %v34310_v1  ;;  %v34424_v58 = vand.u32 4294901760, %v10404_v34 }
 0x1ec   : > { %30986 = vmatpush3.msra.mxu1 %v34312_v45  ;;  %30957 = vmatprep.mubr.msk.f32.mxu0 %vm33017_vm0, %v36652_v35  ;;  %36751 = vst [vmem:[#allocation148_spill] sm:$0xff] %v34426_v53  ;;  %v34444_v21 = vsub.f32 %v10856_v17, %v34426_v53 }
 0x1ed   : > { %30987 = vmatprep.mubr.msk.f32.mxu1 %vm33017_vm0, %v36652_v35  ;;  %30960 = vmatprep.subr.mxu0 %v36652_v35  ;;  %36750 = vst [vmem:[#allocation147_spill] sm:$0xff] %v34424_v58  ;;  %v34441_v7 = vsub.f32 %v10404_v34, %v34424_v58 }
 0x1ee   : > { %30990 = vmatprep.subr.mxu1 %v36652_v35  ;;  %36755 = vst [vmem:[#allocation152_spill] sm:$0xff] %v34444_v21  ;;  %v34462_v17 = vand.u32 4294901760, %v34444_v21 }
 0x1ef   : > { %36754 = vst [vmem:[#allocation151_spill] sm:$0xff] %v34441_v7  ;;  %v34459_v34 = vand.u32 4294901760, %v34441_v7 }
 0x1f0   : > { %36761 = vst [vmem:[#allocation158_spill] sm:$0xff] %v34462_v17 }
 0x1f1   : > { %36760 = vst [vmem:[#allocation157_spill] sm:$0xff] %v34459_v34 }
 0x1f2   : > { %30958 = vmatmul.mubr.f32.vlgmr.msra.gmra.mrb[20].mxu0 %v34339_v32 }
 0x1f3   : > { %30988 = vmatmul.mubr.f32.vlgmr.msra.gmra.mrb[20].mxu1 %v34342_v9  ;;  %30961 = vmatpush3.msra.mxu0 %v34347_v6 }
 0x1f4   : > { %30991 = vmatpush3.msra.mxu1 %v34350_v24  ;;  %30962 = vmatprep.mubr.msk.f32.mxu0 %vm33017_vm0, %v36652_v35  ;;  %v34450_v24 = vsub.f32 %v10859_v36, %v34432_v54 }
 0x1f5   : > { %30992 = vmatprep.mubr.msk.f32.mxu1 %vm33017_vm0, %v36652_v35  ;;  %30965 = vmatprep.subr.mxu0 %v36652_v35 }
 0x1f6   : > { %30995 = vmatprep.subr.mxu1 %v36652_v35  ;;  %36757 = vst [vmem:[#allocation154_spill] sm:$0xff] %v34450_v24  ;;  %v34470_v36 = vand.u32 4294901760, %v34450_v24 }
 0x1f8   : > { %36763 = vst [vmem:[#allocation160_spill] sm:$0xff] %v34470_v36 }
 0x1f9   : > { %v34452_v6 = vpop.f32.mrb[10].mxu0 }
 0x1fa   : > { %36758 = vst [vmem:[#allocation155_spill] sm:$0xff] %v34452_v6  ;;  %v34454_v9 = vpop.f32.mrb[10].mxu1  ;;  %v30669_v32 = vpop.f32.mrb[11].mxu0  ;;  %30963 = vmatmul.mubr.f32.vlgmr.msra.gmra.mrb[20].mxu0 %v34304_v0 }
 0x1fb   : > { %36759 = vst [vmem:[#allocation156_spill] sm:$0xff] %v34454_v9  ;;  %v30699_v8 = vpop.f32.mrb[11].mxu1  ;;  %30993 = vmatmul.mubr.f32.vlgmr.msra.gmra.mrb[20].mxu1 %v34306_v30  ;;  %30966 = vmatpush3.msra.mxu0 %v34310_v1  ;;  %v10930_v32 = vsub.f32 %v34444_v21, %v34462_v17  ;;  %v10941_v1 = vsub.f32 %v34450_v24, %v34470_v36 }
 0x1fc   : > { %30996 = vmatpush3.msra.mxu1 %v34312_v45  ;;  %30967 = vmatprep.mubr.msk.f32.mxu0 %vm33017_vm0, %v36652_v35  ;;  %v10478_v8 = vsub.f32 %v34441_v7, %v34459_v34  ;;  %v10489_v45 = vsub.f32 %v34447_v33, %v34467_v5 }
 0x1fd   : > { %30997 = vmatprep.mubr.msk.f32.mxu1 %vm33017_vm0, %v36652_v35  ;;  %31000 = vmatprep.subr.mxu0 %v36652_v35  ;;  %v34490_v6 = vand.u32 4294901760, %v10930_v32  ;;  %v34496_v29 = vand.u32 4294901760, %v10941_v1  ;;  %v416_v1 = vld [vmem:[%s34031_s10 + $0x10] sm:$0x3]  ;;  %v449_v32 = vld [vmem:[%s34040_s13 + $0x24] sm:$0xf] }
 0x1fe   : > { %31030 = vmatprep.subr.mxu1 %v36652_v35  ;;  %v34488_v9 = vand.u32 4294901760, %v10478_v8  ;;  %v34494_v4 = vand.u32 4294901760, %v10489_v45  ;;  %v417_v45 = vld [vmem:[%s34031_s10 + $0x12] sm:$0x3]  ;;  %v448_v8 = vld [vmem:[%s34040_s13 + $0x20] sm:$0xf] }
 0x1ff   : > { %36765 = vst [vmem:[#allocation162_spill] sm:$0xff] %v34490_v6  ;;  %36767 = vst [vmem:[#allocation164_spill] sm:$0xff] %v34496_v29 }
 0x200   : > { %36764 = vst [vmem:[#allocation161_spill] sm:$0xff] %v34488_v9  ;;  %36766 = vst [vmem:[#allocation163_spill] sm:$0xff] %v34494_v4 }
 0x202   : > { %30968 = vmatmul.mubr.f32.vlgmr.msra.gmra.mrb[20].mxu0 %v34304_v0 }
 0x203   : > { %30998 = vmatmul.mubr.f32.vlgmr.msra.gmra.mrb[20].mxu1 %v34306_v30  ;;  %31001 = vmatpush3.msra.mxu0 %v34430_v49 }
 0x204   : > { %31031 = vmatpush3.msra.mxu1 %v34432_v54  ;;  %31002 = vmatprep.mubr.msk.f32.mxu0 %vm33017_vm0, %v36652_v35 }
 0x205   : > { %31032 = vmatprep.mubr.msk.f32.mxu1 %vm33017_vm0, %v36652_v35  ;;  %31005 = vmatprep.subr.mxu0 %v36652_v35 }
 0x206   : > { %31035 = vmatprep.subr.mxu1 %v36652_v35  ;;  %31003 = vmatmul.mubr.f32.vlgmr.msra.gmra.mrb[22].mxu0 %v34488_v9 }
 0x207   : > { %31033 = vmatmul.mubr.f32.vlgmr.msra.gmra.mrb[22].mxu1 %v34490_v6  ;;  %31006 = vmatpush3.msra.mxu0 %v34494_v4  ;;  %v11763_v4 = vsel %vm461_vm2, %v449_v32, 0 }
 0x208   : > { %31036 = vmatpush3.msra.mxu1 %v34496_v29  ;;  %31007 = vmatprep.mubr.msk.f32.mxu0 %vm33017_vm0, %v36652_v35  ;;  %v11311_v29 = vsel %vm461_vm2, %v448_v8, 0 }
 0x209   : > { %31037 = vmatprep.mubr.msk.f32.mxu1 %vm33017_vm0, %v36652_v35  ;;  %31010 = vmatprep.subr.mxu0 %v36652_v35  ;;  %v34550_v6 = vand.u32 4294901760, %v11311_v29 }
 0x20a   : > { %31040 = vmatprep.subr.mxu1 %v36652_v35 }
 0x20b   : > { %36770 = vst [vmem:[#allocation167_spill] sm:$0xff] %v34550_v6  ;;  %v34567_v32 = vsub.f32 %v11311_v29, %v34550_v6 }
 0x20d   : > { %36774 = vst [vmem:[#allocation171_spill] sm:$0xff] %v34567_v32 }
 0x20e   : > { %31008 = vmatmul.mubr.f32.vlgmr.msra.gmra.mrb[22].mxu0 %v34424_v58 }
 0x20f   : > { %31038 = vmatmul.mubr.f32.vlgmr.msra.gmra.mrb[22].mxu1 %v34426_v53  ;;  %31011 = vmatpush3.msra.mxu0 %v34447_v33  ;;  %v11760_v33 = vsel %vm457_vm1, %v417_v45, 0 }
 0x210   : > { %31041 = vmatpush3.msra.mxu1 %v34450_v24  ;;  %31012 = vmatprep.mubr.msk.f32.mxu0 %vm33017_vm0, %v36652_v35  ;;  %v11308_v24 = vsel %vm457_vm1, %v416_v1, 0  ;;  %v34552_v1 = vand.u32 4294901760, %v11763_v4 }
 0x211   : > { %31042 = vmatprep.mubr.msk.f32.mxu1 %vm33017_vm0, %v36652_v35  ;;  %31015 = vmatprep.subr.mxu0 %v36652_v35 }
 0x212   : > { %31045 = vmatprep.subr.mxu1 %v36652_v35  ;;  %36771 = vst [vmem:[#allocation168_spill] sm:$0xff] %v34552_v1 }
 0x216   : > { %31013 = vmatmul.mubr.f32.vlgmr.msra.gmra.mrb[22].mxu0 %v34441_v7  ;;  %v34546_v7 = vand.u32 4294901760, %v11760_v33 }
 0x217   : > { %31043 = vmatmul.mubr.f32.vlgmr.msra.gmra.mrb[22].mxu1 %v34444_v21  ;;  %31016 = vmatpush3.msra.mxu0 %v34430_v49  ;;  %v34544_v21 = vand.u32 4294901760, %v11308_v24 }
 0x218   : > { %31046 = vmatpush3.msra.mxu1 %v34432_v54  ;;  %31017 = vmatprep.mubr.msk.f32.mxu0 %vm33017_vm0, %v36652_v35  ;;  %36769 = vst [vmem:[#allocation166_spill] sm:$0xff] %v34546_v7  ;;  %v34564_v8 = vsub.f32 %v11760_v33, %v34546_v7 }
 0x219   : > { %31047 = vmatprep.mubr.msk.f32.mxu1 %vm33017_vm0, %v36652_v35  ;;  %31020 = vmatprep.subr.mxu0 %v36652_v35  ;;  %36768 = vst [vmem:[#allocation165_spill] sm:$0xff] %v34544_v21  ;;  %v34561_v45 = vsub.f32 %v11308_v24, %v34544_v21 }
 0x21a   : > { %31050 = vmatprep.subr.mxu1 %v36652_v35  ;;  %36773 = vst [vmem:[#allocation170_spill] sm:$0xff] %v34564_v8  ;;  %v34582_v33 = vand.u32 4294901760, %v34564_v8 }
 0x21b   : > { %36772 = vst [vmem:[#allocation169_spill] sm:$0xff] %v34561_v45  ;;  %v34579_v24 = vand.u32 4294901760, %v34561_v45 }
 0x21c   : > { %36779 = vst [vmem:[#allocation176_spill] sm:$0xff] %v34582_v33 }
 0x21d   : > { %36778 = vst [vmem:[#allocation175_spill] sm:$0xff] %v34579_v24 }
 0x21e   : > { %31018 = vmatmul.mubr.f32.vlgmr.msra.gmra.mrb[22].mxu0 %v34459_v34 }
 0x21f   : > { %31048 = vmatmul.mubr.f32.vlgmr.msra.gmra.mrb[22].mxu1 %v34462_v17  ;;  %31021 = vmatpush3.msra.mxu0 %v34467_v5 }
 0x220   : > { %31051 = vmatpush3.msra.mxu1 %v34470_v36  ;;  %31022 = vmatprep.mubr.msk.f32.mxu0 %vm33017_vm0, %v36652_v35  ;;  %v34570_v36 = vsub.f32 %v11763_v4, %v34552_v1  ;;  %v34587_v4 = vand.u32 4294901760, %v34567_v32 }
 0x221   : > { %31052 = vmatprep.mubr.msk.f32.mxu1 %vm33017_vm0, %v36652_v35  ;;  %31025 = vmatprep.subr.mxu0 %v36652_v35 }
 0x222   : > { %31055 = vmatprep.subr.mxu1 %v36652_v35  ;;  %36775 = vst [vmem:[#allocation172_spill] sm:$0xff] %v34570_v36  ;;  %36780 = vst [vmem:[#allocation177_spill] sm:$0xff] %v34587_v4  ;;  %v34590_v29 = vand.u32 4294901760, %v34570_v36 }
 0x224   : > { %36781 = vst [vmem:[#allocation178_spill] sm:$0xff] %v34590_v29 }
 0x225   : > { %v34572_v5 = vpop.f32.mrb[12].mxu0 }
 0x226   : > { %36776 = vst [vmem:[#allocation173_spill] sm:$0xff] %v34572_v5  ;;  %v34574_v17 = vpop.f32.mrb[12].mxu1  ;;  %v30729_v34 = vpop.f32.mrb[13].mxu0  ;;  %31023 = vmatmul.mubr.f32.vlgmr.msra.gmra.mrb[22].mxu0 %v34424_v58 }
 0x227   : > { %36777 = vst [vmem:[#allocation174_spill] sm:$0xff] %v34574_v17  ;;  %v30759_v9 = vpop.f32.mrb[13].mxu1  ;;  %31053 = vmatmul.mubr.f32.vlgmr.msra.gmra.mrb[22].mxu1 %v34426_v53  ;;  %31026 = vmatpush3.msra.mxu0 %v34430_v49  ;;  %v11834_v34 = vsub.f32 %v34564_v8, %v34582_v33  ;;  %v11845_v49 = vsub.f32 %v34570_v36, %v34590_v29 }
 0x228   : > { %31056 = vmatpush3.msra.mxu1 %v34432_v54  ;;  %31027 = vmatprep.mubr.msk.f32.mxu0 %vm33017_vm0, %v36652_v35  ;;  %v11382_v9 = vsub.f32 %v34561_v45, %v34579_v24  ;;  %v11393_v54 = vsub.f32 %v34567_v32, %v34587_v4 }
 0x229   : > { %31057 = vmatprep.mubr.msk.f32.mxu1 %vm33017_vm0, %v36652_v35  ;;  %31060 = vmatprep.subr.mxu0 %v36652_v35  ;;  %v34610_v5 = vand.u32 4294901760, %v11834_v34  ;;  %v34616_v0 = vand.u32 4294901760, %v11845_v49  ;;  %v418_v49 = vld [vmem:[%s34031_s10 + $0x14] sm:$0x3]  ;;  %v451_v34 = vld [vmem:[%s34040_s13 + $0x2c] sm:$0xf] }
 0x22a   : > { %31090 = vmatprep.subr.mxu1 %v36652_v35  ;;  %v34608_v17 = vand.u32 4294901760, %v11382_v9  ;;  %v34614_v30 = vand.u32 4294901760, %v11393_v54  ;;  %v419_v54 = vld [vmem:[%s34031_s10 + $0x16] sm:$0x3]  ;;  %v450_v9 = vld [vmem:[%s34040_s13 + $0x28] sm:$0xf] }
 0x22b   : > { %36783 = vst [vmem:[#allocation180_spill] sm:$0xff] %v34610_v5  ;;  %36785 = vst [vmem:[#allocation182_spill] sm:$0xff] %v34616_v0 }
 0x22c   : > { %36782 = vst [vmem:[#allocation179_spill] sm:$0xff] %v34608_v17  ;;  %36784 = vst [vmem:[#allocation181_spill] sm:$0xff] %v34614_v30 }
 0x22e   : > { %31028 = vmatmul.mubr.f32.vlgmr.msra.gmra.mrb[22].mxu0 %v34424_v58 }
 0x22f   : > { %31058 = vmatmul.mubr.f32.vlgmr.msra.gmra.mrb[22].mxu1 %v34426_v53  ;;  %31061 = vmatpush3.msra.mxu0 %v34550_v6 }
 0x230   : > { %31091 = vmatpush3.msra.mxu1 %v34552_v1  ;;  %31062 = vmatprep.mubr.msk.f32.mxu0 %vm33017_vm0, %v36652_v35 }
 0x231   : > { %31092 = vmatprep.mubr.msk.f32.mxu1 %vm33017_vm0, %v36652_v35  ;;  %31065 = vmatprep.subr.mxu0 %v36652_v35 }
 0x232   : > { %31095 = vmatprep.subr.mxu1 %v36652_v35  ;;  %31063 = vmatmul.mubr.f32.vlgmr.msra.gmra.mrb[24].mxu0 %v34608_v17 }
 0x233   : > { %31093 = vmatmul.mubr.f32.vlgmr.msra.gmra.mrb[24].mxu1 %v34610_v5  ;;  %31066 = vmatpush3.msra.mxu0 %v34614_v30  ;;  %v12667_v30 = vsel %vm461_vm2, %v451_v34, 0 }
 0x234   : > { %31096 = vmatpush3.msra.mxu1 %v34616_v0  ;;  %31067 = vmatprep.mubr.msk.f32.mxu0 %vm33017_vm0, %v36652_v35  ;;  %v12215_v0 = vsel %vm461_vm2, %v450_v9, 0 }
 0x235   : > { %31097 = vmatprep.mubr.msk.f32.mxu1 %vm33017_vm0, %v36652_v35  ;;  %31070 = vmatprep.subr.mxu0 %v36652_v35  ;;  %v34670_v5 = vand.u32 4294901760, %v12215_v0 }
 0x236   : > { %31100 = vmatprep.subr.mxu1 %v36652_v35 }
 0x237   : > { %36787 = vst [vmem:[#allocation184_spill] sm:$0xff] %v34670_v5  ;;  %v34687_v34 = vsub.f32 %v12215_v0, %v34670_v5 }
 0x239   : > { %36791 = vst [vmem:[#allocation188_spill] sm:$0xff] %v34687_v34  ;;  %v34707_v0 = vand.u32 4294901760, %v34687_v34 }
 0x23a   : > { %31068 = vmatmul.mubr.f32.vlgmr.msra.gmra.mrb[24].mxu0 %v34544_v21 }
 0x23b   : > { %31098 = vmatmul.mubr.f32.vlgmr.msra.gmra.mrb[24].mxu1 %v34546_v7  ;;  %31071 = vmatpush3.msra.mxu0 %v34567_v32  ;;  %v12664_v32 = vsel %vm457_vm1, %v419_v54, 0  ;;  %36797 = vst [vmem:[#allocation194_spill] sm:$0xff] %v34707_v0 }
 0x23c   : > { %31101 = vmatpush3.msra.mxu1 %v34570_v36  ;;  %31072 = vmatprep.mubr.msk.f32.mxu0 %vm33017_vm0, %v36652_v35  ;;  %v12212_v36 = vsel %vm457_vm1, %v418_v49, 0  ;;  %v34672_v49 = vand.u32 4294901760, %v12667_v30 }
 0x23d   : > { %31102 = vmatprep.mubr.msk.f32.mxu1 %vm33017_vm0, %v36652_v35  ;;  %31075 = vmatprep.subr.mxu0 %v36652_v35 }
 0x23e   : > { %31105 = vmatprep.subr.mxu1 %v36652_v35  ;;  %36788 = vst [vmem:[#allocation185_spill] sm:$0xff] %v34672_v49 }
 0x242   : > { %31073 = vmatmul.mubr.f32.vlgmr.msra.gmra.mrb[24].mxu0 %v34561_v45  ;;  %v34666_v45 = vand.u32 4294901760, %v12664_v32 }
 0x243   : > { %31103 = vmatmul.mubr.f32.vlgmr.msra.gmra.mrb[24].mxu1 %v34564_v8  ;;  %31076 = vmatpush3.msra.mxu0 %v34550_v6  ;;  %v34664_v8 = vand.u32 4294901760, %v12212_v36 }
 0x244   : > { %31106 = vmatpush3.msra.mxu1 %v34552_v1  ;;  %31077 = vmatprep.mubr.msk.f32.mxu0 %vm33017_vm0, %v36652_v35  ;;  %36786 = vst [vmem:[#allocation183_spill] sm:$0xff] %v34666_v45  ;;  %v34684_v9 = vsub.f32 %v12664_v32, %v34666_v45 }
 0x245   : > { %31107 = vmatprep.mubr.msk.f32.mxu1 %vm33017_vm0, %v36652_v35  ;;  %31080 = vmatprep.subr.mxu0 %v36652_v35  ;;  %v34681_v54 = vsub.f32 %v12212_v36, %v34664_v8 }
 0x246   : > { %31110 = vmatprep.subr.mxu1 %v36652_v35  ;;  %36790 = vst [vmem:[#allocation187_spill] sm:$0xff] %v34684_v9  ;;  %v34702_v32 = vand.u32 4294901760, %v34684_v9 }
 0x247   : > { %36789 = vst [vmem:[#allocation186_spill] sm:$0xff] %v34681_v54  ;;  %v34699_v36 = vand.u32 4294901760, %v34681_v54 }
 0x248   : > { %36796 = vst [vmem:[#allocation193_spill] sm:$0xff] %v34702_v32 }
 0x249   : > { %36795 = vst [vmem:[#allocation192_spill] sm:$0xff] %v34699_v36 }
 0x24a   : > { %31078 = vmatmul.mubr.f32.vlgmr.msra.gmra.mrb[24].mxu0 %v34579_v24 }
 0x24b   : > { %31108 = vmatmul.mubr.f32.vlgmr.msra.gmra.mrb[24].mxu1 %v34582_v33  ;;  %31081 = vmatpush3.msra.mxu0 %v34587_v4 }
 0x24c   : > { %31111 = vmatpush3.msra.mxu1 %v34590_v29  ;;  %31082 = vmatprep.mubr.msk.f32.mxu0 %vm33017_vm0, %v36652_v35  ;;  %v34690_v29 = vsub.f32 %v12667_v30, %v34672_v49 }
 0x24d   : > { %31112 = vmatprep.mubr.msk.f32.mxu1 %vm33017_vm0, %v36652_v35  ;;  %31085 = vmatprep.subr.mxu0 %v36652_v35 }
 0x24e   : > { %31115 = vmatprep.subr.mxu1 %v36652_v35  ;;  %36792 = vst [vmem:[#allocation189_spill] sm:$0xff] %v34690_v29  ;;  %v34710_v30 = vand.u32 4294901760, %v34690_v29 }
 0x250   : > { %36798 = vst [vmem:[#allocation195_spill] sm:$0xff] %v34710_v30 }
 0x251   : > { %v34692_v4 = vpop.f32.mrb[14].mxu0 }
 0x252   : > { %36793 = vst [vmem:[#allocation190_spill] sm:$0xff] %v34692_v4  ;;  %v34694_v33 = vpop.f32.mrb[14].mxu1  ;;  %v30789_v24 = vpop.f32.mrb[15].mxu0  ;;  %31083 = vmatmul.mubr.f32.vlgmr.msra.gmra.mrb[24].mxu0 %v34544_v21 }
 0x253   : > { %36794 = vst [vmem:[#allocation191_spill] sm:$0xff] %v34694_v33  ;;  %v30819_v17 = vpop.f32.mrb[15].mxu1  ;;  %31113 = vmatmul.mubr.f32.vlgmr.msra.gmra.mrb[24].mxu1 %v34546_v7  ;;  %31086 = vmatpush3.msra.mxu0 %v34550_v6  ;;  %v12738_v24 = vsub.f32 %v34684_v9, %v34702_v32  ;;  %v12749_v6 = vsub.f32 %v34690_v29, %v34710_v30 }
 0x254   : > { %31116 = vmatpush3.msra.mxu1 %v34552_v1  ;;  %31087 = vmatprep.mubr.msk.f32.mxu0 %vm33017_vm0, %v36652_v35  ;;  %v12286_v17 = vsub.f32 %v34681_v54, %v34699_v36  ;;  %v12297_v1 = vsub.f32 %v34687_v34, %v34707_v0 }
 0x255   : > { %31117 = vmatprep.mubr.msk.f32.mxu1 %vm33017_vm0, %v36652_v35  ;;  %31120 = vmatprep.subr.mxu0 %v36652_v35  ;;  %v34730_v4 = vand.u32 4294901760, %v12738_v24  ;;  %v34736_v58 = vand.u32 4294901760, %v12749_v6  ;;  %v420_v6 = vld [vmem:[%s34031_s10 + $0x18] sm:$0x3]  ;;  %v453_v24 = vld [vmem:[%s34040_s13 + $0x34] sm:$0xf] }
 0x256   : > { %31150 = vmatprep.subr.mxu1 %v36652_v35  ;;  %v34728_v33 = vand.u32 4294901760, %v12286_v17  ;;  %v34734_v53 = vand.u32 4294901760, %v12297_v1  ;;  %v421_v1 = vld [vmem:[%s34031_s10 + $0x1a] sm:$0x3]  ;;  %v452_v17 = vld [vmem:[%s34040_s13 + $0x30] sm:$0xf] }
 0x257   : > { %36800 = vst [vmem:[#allocation197_spill] sm:$0xff] %v34730_v4  ;;  %36802 = vst [vmem:[#allocation199_spill] sm:$0xff] %v34736_v58 }
 0x258   : > { %36799 = vst [vmem:[#allocation196_spill] sm:$0xff] %v34728_v33  ;;  %36801 = vst [vmem:[#allocation198_spill] sm:$0xff] %v34734_v53 }
 0x25a   : > { %31088 = vmatmul.mubr.f32.vlgmr.msra.gmra.mrb[24].mxu0 %v34544_v21 }
 0x25b   : > { %31118 = vmatmul.mubr.f32.vlgmr.msra.gmra.mrb[24].mxu1 %v34546_v7  ;;  %31121 = vmatpush3.msra.mxu0 %v34670_v5 }
 0x25c   : > { %31151 = vmatpush3.msra.mxu1 %v34672_v49  ;;  %31122 = vmatprep.mubr.msk.f32.mxu0 %vm33017_vm0, %v36652_v35 }
 0x25d   : > { %31152 = vmatprep.mubr.msk.f32.mxu1 %vm33017_vm0, %v36652_v35  ;;  %31125 = vmatprep.subr.mxu0 %v36652_v35 }
 0x25e   : > { %31155 = vmatprep.subr.mxu1 %v36652_v35  ;;  %31123 = vmatmul.mubr.f32.vlgmr.msra.gmra.mrb[26].mxu0 %v34728_v33 }
 0x25f   : > { %31153 = vmatmul.mubr.f32.vlgmr.msra.gmra.mrb[26].mxu1 %v34730_v4  ;;  %31126 = vmatpush3.msra.mxu0 %v34734_v53  ;;  %v13571_v53 = vsel %vm461_vm2, %v453_v24, 0 }
 0x260   : > { %31156 = vmatpush3.msra.mxu1 %v34736_v58  ;;  %31127 = vmatprep.mubr.msk.f32.mxu0 %vm33017_vm0, %v36652_v35  ;;  %v13119_v58 = vsel %vm461_vm2, %v452_v17, 0 }
 0x261   : > { %31157 = vmatprep.mubr.msk.f32.mxu1 %vm33017_vm0, %v36652_v35  ;;  %31130 = vmatprep.subr.mxu0 %v36652_v35  ;;  %v34790_v4 = vand.u32 4294901760, %v13119_v58 }
 0x262   : > { %31160 = vmatprep.subr.mxu1 %v36652_v35 }
 0x263   : > { %v34807_v24 = vsub.f32 %v13119_v58, %v34790_v4 }
 0x265   : > { %36805 = vst [vmem:[#allocation202_spill] sm:$0xff] %v34807_v24 }
 0x266   : > { %31128 = vmatmul.mubr.f32.vlgmr.msra.gmra.mrb[26].mxu0 %v34664_v8 }
 0x267   : > { %31158 = vmatmul.mubr.f32.vlgmr.msra.gmra.mrb[26].mxu1 %v34666_v45  ;;  %31131 = vmatpush3.msra.mxu0 %v34687_v34  ;;  %v13568_v34 = vsel %vm457_vm1, %v421_v1, 0 }
 0x268   : > { %31161 = vmatpush3.msra.mxu1 %v34690_v29  ;;  %31132 = vmatprep.mubr.msk.f32.mxu0 %vm33017_vm0, %v36652_v35  ;;  %v13116_v29 = vsel %vm457_vm1, %v420_v6, 0  ;;  %v34792_v6 = vand.u32 4294901760, %v13571_v53 }
 0x269   : > { %31162 = vmatprep.mubr.msk.f32.mxu1 %vm33017_vm0, %v36652_v35  ;;  %31135 = vmatprep.subr.mxu0 %v36652_v35 }
 0x26a   : > { %31165 = vmatprep.subr.mxu1 %v36652_v35 }
 0x26e   : > { %31133 = vmatmul.mubr.f32.vlgmr.msra.gmra.mrb[26].mxu0 %v34681_v54  ;;  %v34786_v54 = vand.u32 4294901760, %v13568_v34 }
 0x26f   : > { %31163 = vmatmul.mubr.f32.vlgmr.msra.gmra.mrb[26].mxu1 %v34684_v9  ;;  %31136 = vmatpush3.msra.mxu0 %v34670_v5  ;;  %v34784_v9 = vand.u32 4294901760, %v13116_v29 }
 0x270   : > { %31166 = vmatpush3.msra.mxu1 %v34672_v49  ;;  %31137 = vmatprep.mubr.msk.f32.mxu0 %vm33017_vm0, %v36652_v35  ;;  %v34804_v17 = vsub.f32 %v13568_v34, %v34786_v54 }
 0x271   : > { %31167 = vmatprep.mubr.msk.f32.mxu1 %vm33017_vm0, %v36652_v35  ;;  %31140 = vmatprep.subr.mxu0 %v36652_v35  ;;  %v34801_v1 = vsub.f32 %v13116_v29, %v34784_v9 }
 0x272   : > { %31170 = vmatprep.subr.mxu1 %v36652_v35  ;;  %36804 = vst [vmem:[#allocation201_spill] sm:$0xff] %v34804_v17 }
 0x273   : > { %36803 = vst [vmem:[#allocation200_spill] sm:$0xff] %v34801_v1  ;;  %v34819_v58 = vand.u32 4294901760, %v34801_v1 }
 0x275   : > { %36807 = vst [vmem:[#allocation204_spill] sm:$0xff] %v34819_v58 }
 0x276   : > { %31138 = vmatmul.mubr.f32.vlgmr.msra.gmra.mrb[26].mxu0 %v34699_v36 }
 0x277   : > { %31168 = vmatmul.mubr.f32.vlgmr.msra.gmra.mrb[26].mxu1 %v34702_v32  ;;  %31141 = vmatpush3.msra.mxu0 %v34707_v0  ;;  %v34812_v0 = vpop.permute.xlu0 %22077 }
 0x278   : > { %31171 = vmatpush3.msra.mxu1 %v34710_v30  ;;  %31142 = vmatprep.mubr.msk.f32.mxu0 %vm33017_vm0, %v36652_v35  ;;  %v34810_v30 = vsub.f32 %v13571_v53, %v34792_v6  ;;  %v34822_v53 = vand.u32 4294901760, %v34804_v17 }
 0x279   : > { %31172 = vmatprep.mubr.msk.f32.mxu1 %vm33017_vm0, %v36652_v35  ;;  %31145 = vmatprep.subr.mxu0 %v36652_v35 }
 0x27a   : > { %31175 = vmatprep.subr.mxu1 %v36652_v35  ;;  %36806 = vst [vmem:[#allocation203_spill] sm:$0xff] %v34810_v30  ;;  %36808 = vst [vmem:[#allocation205_spill] sm:$0xff] %v34822_v53 }
 0x27d   : > { %v8139_v32 = vpop.f32.mrb[16].mxu0 }
 0x27e   : > { %v8591_v36 = vpop.f32.mrb[16].mxu1  ;;  %v22059_v33 = vsub.f32 %v33835_v51, %v8139_v32  ;;  %v30849_v21 = vpop.f32.mrb[17].mxu0  ;;  %31143 = vmatmul.mubr.f32.vlgmr.msra.gmra.mrb[26].mxu0 %v34664_v8  ;;  %v34827_v51 = vand.u32 4294901760, %v34807_v24 }
 0x27f   : > { %v22060_v7 = vsub.f32 %v33837_v41, %v8591_v36  ;;  %v30879_v29 = vpop.f32.mrb[17].mxu1  ;;  %31173 = vmatmul.mubr.f32.vlgmr.msra.gmra.mrb[26].mxu1 %v34666_v45  ;;  %31146 = vmatpush3.msra.mxu0 %v34670_v5  ;;  %v34830_v41 = vand.u32 4294901760, %v34810_v30  ;;  %v13190_v36 = vsub.f32 %v34801_v1, %v34819_v58 }
 0x280   : > { %31176 = vmatpush3.msra.mxu1 %v34672_v49  ;;  %36809 = vst [vmem:[#allocation206_spill] sm:$0xff] %v34827_v51  ;;  %v34833_v21 = vmul.f32 %v34812_v0, %v22059_v33  ;;  %31147 = vmatprep.mubr.msk.f32.mxu0 %vm33017_vm0, %v36652_v35  ;;  %v13642_v33 = vsub.f32 %v34804_v17, %v34822_v53 }
 0x281   : > { %36810 = vst [vmem:[#allocation207_spill] sm:$0xff] %v34830_v41  ;;  %v34836_v34 = vmul.f32 %v34812_v0, %v22060_v7  ;;  %31177 = vmatprep.mubr.msk.f32.mxu1 %vm33017_vm0, %v36652_v35  ;;  %31180 = vmatprep.subr.mxu0 %v36652_v35  ;;  %v13201_v7 = vsub.f32 %v34807_v24, %v34827_v51  ;;  %v34854_v29 = vand.u32 4294901760, %v13190_v36  ;;  %v422_v36 = vld [vmem:[%s34031_s10 + $0x1c] sm:$0x3] }
 0x282   : > { %36811 = vst [vmem:[#allocation208_spill] sm:$0xff] %v34833_v21  ;;  %31210 = vmatprep.subr.mxu1 %v36652_v35  ;;  %v13653_v32 = vsub.f32 %v34810_v30, %v34830_v41 }
 0x283   : > { %36812 = vst [vmem:[#allocation209_spill] sm:$0xff] %v34836_v34  ;;  %36813 = vst [vmem:[#allocation210_spill] sm:$0xff] %v34854_v29  ;;  %v34856_v34 = vand.u32 4294901760, %v13642_v33  ;;  %v34860_v21 = vand.u32 4294901760, %v13201_v7  ;;  %v423_v33 = vld [vmem:[%s34031_s10 + $0x1e] sm:$0x3] }
 0x284   : > { %v34862_v49 = vand.u32 4294901760, %v13653_v32  ;;  %v454_v7 = vld [vmem:[%s34040_s13 + $0x38] sm:$0xf]  ;;  %v455_v32 = vld [vmem:[%s34040_s13 + $0x3c] sm:$0xf] }
 0x285   : > { %36814 = vst [vmem:[#allocation211_spill] sm:$0xff] %v34856_v34  ;;  %36815 = vst [vmem:[#allocation212_spill] sm:$0xff] %v34860_v21 }
 0x286   : > { %31148 = vmatmul.mubr.f32.vlgmr.msra.gmra.mrb[26].mxu0 %v34664_v8  ;;  %36816 = vst [vmem:[#allocation213_spill] sm:$0xff] %v34862_v49 }
 0x287   : > { %31178 = vmatmul.mubr.f32.vlgmr.msra.gmra.mrb[26].mxu1 %v34666_v45  ;;  %31181 = vmatpush3.msra.mxu0 %v34790_v4 }
 0x288   : > { %31211 = vmatpush3.msra.mxu1 %v34792_v6  ;;  %31182 = vmatprep.mubr.msk.f32.mxu0 %vm33017_vm0, %v36652_v35 }
 0x289   : > { %31212 = vmatprep.mubr.msk.f32.mxu1 %vm33017_vm0, %v36652_v35  ;;  %31185 = vmatprep.subr.mxu0 %v36652_v35 }
 0x28a   : > { %31215 = vmatprep.subr.mxu1 %v36652_v35  ;;  %31183 = vmatmul.mubr.f32.vlgmr.msra.gmra.mrb[28].mxu0 %v34854_v29 }
 0x28b   : > { %31213 = vmatmul.mubr.f32.vlgmr.msra.gmra.mrb[28].mxu1 %v34856_v34  ;;  %31186 = vmatpush3.msra.mxu0 %v34860_v21  ;;  %v14475_v21 = vsel %vm461_vm2, %v455_v32, 0 }
 0x28c   : > { %31216 = vmatpush3.msra.mxu1 %v34862_v49  ;;  %31187 = vmatprep.mubr.msk.f32.mxu0 %vm33017_vm0, %v36652_v35  ;;  %v14023_v49 = vsel %vm461_vm2, %v454_v7, 0 }
 0x28d   : > { %31217 = vmatprep.mubr.msk.f32.mxu1 %vm33017_vm0, %v36652_v35  ;;  %31190 = vmatprep.subr.mxu0 %v36652_v35 }
 0x28e   : > { %31220 = vmatprep.subr.mxu1 %v36652_v35 }
 0x292   : > { %31188 = vmatmul.mubr.f32.vlgmr.msra.gmra.mrb[28].mxu0 %v34784_v9 }
 0x293   : > { %31218 = vmatmul.mubr.f32.vlgmr.msra.gmra.mrb[28].mxu1 %v34786_v54  ;;  %31191 = vmatpush3.msra.mxu0 %v34807_v24  ;;  %v14472_v24 = vsel %vm457_vm1, %v423_v33, 0 }
 0x294   : > { %31221 = vmatpush3.msra.mxu1 %v34810_v30  ;;  %31192 = vmatprep.mubr.msk.f32.mxu0 %vm33017_vm0, %v36652_v35  ;;  %v14020_v30 = vsel %vm457_vm1, %v422_v36, 0  ;;  %v34918_v36 = vand.u32 4294901760, %v14475_v21 }
 0x295   : > { %31222 = vmatprep.mubr.msk.f32.mxu1 %vm33017_vm0, %v36652_v35  ;;  %31195 = vmatprep.subr.mxu0 %v36652_v35  ;;  %v34910_v5 = vand.u32 4294901760, %v14020_v30 }
 0x296   : > { %31225 = vmatprep.subr.mxu1 %v36652_v35 }
 0x297   : > { %v34927_v33 = vsub.f32 %v14020_v30, %v34910_v5 }
 0x299   : > { %v34943_v30 = vand.u32 4294901760, %v34927_v33 }
 0x29a   : > { %31193 = vmatmul.mubr.f32.vlgmr.msra.gmra.mrb[28].mxu0 %v34801_v1  ;;  %v34916_v1 = vand.u32 4294901760, %v14023_v49 }
 0x29b   : > { %31223 = vmatmul.mubr.f32.vlgmr.msra.gmra.mrb[28].mxu1 %v34804_v17  ;;  %31196 = vmatpush3.msra.mxu0 %v34790_v4  ;;  %v34912_v17 = vand.u32 4294901760, %v14472_v24 }
 0x29c   : > { %31226 = vmatpush3.msra.mxu1 %v34792_v6  ;;  %31197 = vmatprep.mubr.msk.f32.mxu0 %vm33017_vm0, %v36652_v35  ;;  %v34933_v32 = vsub.f32 %v14023_v49, %v34916_v1 }
 0x29d   : > { %31227 = vmatprep.mubr.msk.f32.mxu1 %vm33017_vm0, %v36652_v35  ;;  %31200 = vmatprep.subr.mxu0 %v36652_v35  ;;  %v34930_v7 = vsub.f32 %v14472_v24, %v34912_v17 }
 0x29e   : > { %31230 = vmatprep.subr.mxu1 %v36652_v35  ;;  %36817 = vst [vmem:[#allocation214_spill] sm:$0xff] %v34933_v32 }
 0x29f   : > { %v34946_v49 = vand.u32 4294901760, %v34930_v7 }
 0x2a2   : > { %31198 = vmatmul.mubr.f32.vlgmr.msra.gmra.mrb[28].mxu0 %v34819_v58 }
 0x2a3   : > { %31228 = vmatmul.mubr.f32.vlgmr.msra.gmra.mrb[28].mxu1 %v34822_v53  ;;  %31201 = vmatpush3.msra.mxu0 %v34827_v51 }
 0x2a4   : > { %31231 = vmatpush3.msra.mxu1 %v34830_v41  ;;  %31202 = vmatprep.mubr.msk.f32.mxu0 %vm33017_vm0, %v36652_v35  ;;  %v34936_v41 = vsub.f32 %v14475_v21, %v34918_v36 }
 0x2a5   : > { %31232 = vmatprep.mubr.msk.f32.mxu1 %vm33017_vm0, %v36652_v35  ;;  %31205 = vmatprep.subr.mxu0 %v36652_v35 }
 0x2a6   : > { %31235 = vmatprep.subr.mxu1 %v36652_v35  ;;  %36818 = vst [vmem:[#allocation215_spill] sm:$0xff] %v34936_v41 }
 0x2a9   : > { %v9043_v51 = vpop.f32.mrb[18].mxu0 }
 0x2aa   : > { %v9495_v53 = vpop.f32.mrb[18].mxu1  ;;  %v22061_v58 = vsub.f32 %v33955_v31, %v9043_v51  ;;  %v30909_v29 = vpop.f32.mrb[19].mxu0  ;;  %31203 = vmatmul.mubr.f32.vlgmr.msra.gmra.mrb[28].mxu0 %v34784_v9  ;;  %v34951_v31 = vand.u32 4294901760, %v34933_v32 }
 0x2ab   : > { %v22062_v34 = vsub.f32 %v33957_v13, %v9495_v53  ;;  %v30939_v45 = vpop.f32.mrb[19].mxu1  ;;  %31233 = vmatmul.mubr.f32.vlgmr.msra.gmra.mrb[28].mxu1 %v34786_v54  ;;  %31206 = vmatpush3.msra.mxu0 %v34790_v4  ;;  %v34954_v13 = vand.u32 4294901760, %v34936_v41  ;;  %v14094_v53 = vsub.f32 %v34927_v33, %v34943_v30 }
 0x2ac   : > { %31236 = vmatpush3.msra.mxu1 %v34792_v6  ;;  %36819 = vst [vmem:[#allocation216_spill] sm:$0xff] %v34951_v31  ;;  %v34957_v45 = vmul.f32 %v34812_v0, %v22061_v58  ;;  %31207 = vmatprep.mubr.msk.f32.mxu0 %vm33017_vm0, %v36652_v35  ;;  %v14546_v58 = vsub.f32 %v34930_v7, %v34946_v49 }
 0x2ad   : > { %36820 = vst [vmem:[#allocation217_spill] sm:$0xff] %v34954_v13  ;;  %v34960_v24 = vmul.f32 %v34812_v0, %v22062_v34  ;;  %31237 = vmatprep.mubr.msk.f32.mxu1 %vm33017_vm0, %v36652_v35  ;;  %31240 = vmatprep.subr.mxu0 %v36652_v35  ;;  %v14105_v51 = vsub.f32 %v34933_v32, %v34951_v31  ;;  %v34978_v34 = vand.u32 4294901760, %v14094_v53 }
 0x2ae   : > { %36821 = vst [vmem:[#allocation218_spill] sm:$0xff] %v34957_v45  ;;  %31270 = vmatprep.subr.mxu1 %v36652_v35  ;;  %v14557_v21 = vsub.f32 %v34936_v41, %v34954_v13  ;;  %v34980_v29 = vand.u32 4294901760, %v14546_v58 }
 0x2af   : > { %36822 = vst [vmem:[#allocation219_spill] sm:$0xff] %v34960_v24  ;;  %v34984_v24 = vand.u32 4294901760, %v14105_v51 }
 0x2b0   : > { %v34986_v45 = vand.u32 4294901760, %v14557_v21 }
 0x2b2   : > { %31208 = vmatmul.mubr.f32.vlgmr.msra.gmra.mrb[28].mxu0 %v34784_v9 }
 0x2b3   : > { %31238 = vmatmul.mubr.f32.vlgmr.msra.gmra.mrb[28].mxu1 %v34786_v54  ;;  %31241 = vmatpush3.msra.mxu0 %v34916_v1 }
 0x2b4   : > { %31271 = vmatpush3.msra.mxu1 %v34918_v36  ;;  %31242 = vmatprep.mubr.msk.f32.mxu0 %vm33017_vm0, %v36652_v35 }
 0x2b5   : > { %31272 = vmatprep.mubr.msk.f32.mxu1 %vm33017_vm0, %v36652_v35  ;;  %31245 = vmatprep.subr.mxu0 %v36652_v35 }
 0x2b6   : > { %31275 = vmatprep.subr.mxu1 %v36652_v35  ;;  %31243 = vmatmul.mubr.f32.vlgmr.msra.gmra.mrb[30].mxu0 %v34978_v34 }
 0x2b7   : > { %31273 = vmatmul.mubr.f32.vlgmr.msra.gmra.mrb[30].mxu1 %v34980_v29  ;;  %31246 = vmatpush3.msra.mxu0 %v34984_v24 }
 0x2b8   : > { %31276 = vmatpush3.msra.mxu1 %v34986_v45  ;;  %31247 = vmatprep.mubr.msk.f32.mxu0 %vm33017_vm0, %v36652_v35 }
 0x2b9   : > { %31277 = vmatprep.mubr.msk.f32.mxu1 %vm33017_vm0, %v36652_v35  ;;  %31250 = vmatprep.subr.mxu0 %v36652_v35 }
 0x2ba   : > { %31280 = vmatprep.subr.mxu1 %v36652_v35 }
 0x2be   : > { %31248 = vmatmul.mubr.f32.vlgmr.msra.gmra.mrb[30].mxu0 %v34910_v5 }
 0x2bf   : > { %31278 = vmatmul.mubr.f32.vlgmr.msra.gmra.mrb[30].mxu1 %v34912_v17  ;;  %31251 = vmatpush3.msra.mxu0 %v34933_v32 }
 0x2c0   : > { %31281 = vmatpush3.msra.mxu1 %v34936_v41  ;;  %31252 = vmatprep.mubr.msk.f32.mxu0 %vm33017_vm0, %v36652_v35 }
 0x2c1   : > { %31282 = vmatprep.mubr.msk.f32.mxu1 %vm33017_vm0, %v36652_v35  ;;  %31255 = vmatprep.subr.mxu0 %v36652_v35 }
 0x2c2   : > { %31285 = vmatprep.subr.mxu1 %v36652_v35 }
 0x2c6   : > { %31253 = vmatmul.mubr.f32.vlgmr.msra.gmra.mrb[30].mxu0 %v34927_v33 }
 0x2c7   : > { %31283 = vmatmul.mubr.f32.vlgmr.msra.gmra.mrb[30].mxu1 %v34930_v7  ;;  %31256 = vmatpush3.msra.mxu0 %v34916_v1 }
 0x2c8   : > { %31286 = vmatpush3.msra.mxu1 %v34918_v36  ;;  %31257 = vmatprep.mubr.msk.f32.mxu0 %vm33017_vm0, %v36652_v35 }
 0x2c9   : > { %31287 = vmatprep.mubr.msk.f32.mxu1 %vm33017_vm0, %v36652_v35  ;;  %31260 = vmatprep.subr.mxu0 %v36652_v35 }
 0x2ca   : > { %31290 = vmatprep.subr.mxu1 %v36652_v35 }
 0x2ce   : > { %31258 = vmatmul.mubr.f32.vlgmr.msra.gmra.mrb[30].mxu0 %v34943_v30 }
 0x2cf   : > { %31288 = vmatmul.mubr.f32.vlgmr.msra.gmra.mrb[30].mxu1 %v34946_v49  ;;  %31261 = vmatpush3.msra.mxu0 %v34951_v31 }
 0x2d0   : > { %31291 = vmatpush3.msra.mxu1 %v34954_v13  ;;  %31262 = vmatprep.mubr.msk.f32.mxu0 %vm33017_vm0, %v36652_v35 }
 0x2d1   : > { %31292 = vmatprep.mubr.msk.f32.mxu1 %vm33017_vm0, %v36652_v35  ;;  %31265 = vmatprep.subr.mxu0 %v36652_v35 }
 0x2d2   : > { %31295 = vmatprep.subr.mxu1 %v36652_v35 }
 0x2d5   : > { %v9947_v53 = vpop.f32.mrb[20].mxu0 }
 0x2d6   : > { %v10399_v58 = vpop.f32.mrb[20].mxu1  ;;  %v22063_v51 = vsub.f32 %v34088_v59, %v9947_v53  ;;  %v30969_v41 = vpop.f32.mrb[21].mxu0  ;;  %31263 = vmatmul.mubr.f32.vlgmr.msra.gmra.mrb[30].mxu0 %v34910_v5  ;;  %v36831_v59 = vld [vmem:[#allocation131_spill] sm:$0xff] }
 0x2d7   : > { %v22064_v21 = vsub.f32 %v34090_v42, %v10399_v58  ;;  %v30999_v31 = vpop.f32.mrb[21].mxu1  ;;  %31293 = vmatmul.mubr.f32.vlgmr.msra.gmra.mrb[30].mxu1 %v34912_v17  ;;  %31266 = vmatpush3.msra.mxu0 %v34916_v1  ;;  %v36832_v42 = vld [vmem:[#allocation24_spill] sm:$0xff] }
 0x2d8   : > { %31296 = vmatpush3.msra.mxu1 %v34918_v36  ;;  %v35041_v13 = vmul.f32 %v34812_v0, %v22063_v51  ;;  %31267 = vmatprep.mubr.msk.f32.mxu0 %vm33017_vm0, %v36652_v35  ;;  %v36841_v41 = vld [vmem:[#allocation156_spill] sm:$0xff] }
 0x2d9   : > { %v35044_v32 = vmul.f32 %v34812_v0, %v22064_v21  ;;  %31297 = vmatprep.mubr.msk.f32.mxu1 %vm33017_vm0, %v36652_v35  ;;  %31300 = vmatprep.subr.mxu0 %v36652_v35 }
 0x2da   : > { %31330 = vmatprep.subr.mxu1 %v36652_v35  ;;  %29257 = vst.msk [vmem:[%s33119_s18 + $0x8] sm:$0x3] (!%p29568_p7), %vm29252_vm3, %v35041_v13 }
 0x2db   : > { %29258 = vst.msk [vmem:[%s33119_s18 + $0xa] sm:$0x3] (!%p29568_p7), %vm29252_vm3, %v35044_v32 }
 0x2de   : > { %31268 = vmatmul.mubr.f32.vlgmr.msra.gmra.mrb[30].mxu0 %v34910_v5 }
 0x2df   : > { %31298 = vmatmul.mubr.f32.vlgmr.msra.gmra.mrb[30].mxu1 %v34912_v17  ;;  %31301 = vmatpush3.msra.mxu0 %v33139_v11 }
 0x2e0   : > { %31331 = vmatpush3.msra.mxu1 %v33141_v12  ;;  %31302 = vmatprep.mubr.msk.f32.mxu0 %vm33017_vm0, %v36652_v35 }
 0x2e1   : > { %31332 = vmatprep.mubr.msk.f32.mxu1 %vm33017_vm0, %v36652_v35  ;;  %31305 = vmatprep.subr.mxu0 %v36652_v35 }
 0x2e2   : > { %31335 = vmatprep.subr.mxu1 %v36652_v35  ;;  %31303 = vmatmul.mubr.f32.vlgmr.msra.gmra.mrb[32].mxu0 %v34125_v18 }
 0x2e3   : > { %31333 = vmatmul.mubr.f32.vlgmr.msra.gmra.mrb[32].mxu1 %v34127_v61  ;;  %31306 = vmatpush3.msra.mxu0 %v33183_v27 }
 0x2e4   : > { %31336 = vmatpush3.msra.mxu1 %v33185_v28  ;;  %31307 = vmatprep.mubr.msk.f32.mxu0 %vm33017_vm0, %v36652_v35 }
 0x2e5   : > { %31337 = vmatprep.mubr.msk.f32.mxu1 %vm33017_vm0, %v36652_v35  ;;  %31310 = vmatprep.subr.mxu0 %v36652_v35 }
 0x2e6   : > { %31340 = vmatprep.subr.mxu1 %v36652_v35 }
 0x2ea   : > { %31308 = vmatmul.mubr.f32.vlgmr.msra.gmra.mrb[32].mxu0 %v34060_v3 }
 0x2eb   : > { %31338 = vmatmul.mubr.f32.vlgmr.msra.gmra.mrb[32].mxu1 %v34062_v2  ;;  %31311 = vmatpush3.msra.mxu0 %v33152_v15 }
 0x2ec   : > { %31341 = vmatpush3.msra.mxu1 %v33155_v16  ;;  %31312 = vmatprep.mubr.msk.f32.mxu0 %vm33017_vm0, %v36652_v35 }
 0x2ed   : > { %31342 = vmatprep.mubr.msk.f32.mxu1 %vm33017_vm0, %v36652_v35  ;;  %31315 = vmatprep.subr.mxu0 %v36652_v35 }
 0x2ee   : > { %31345 = vmatprep.subr.mxu1 %v36652_v35 }
 0x2f2   : > { %31313 = vmatmul.mubr.f32.vlgmr.msra.gmra.mrb[32].mxu0 %v34077_v22  ;;  %v36833_v22 = vld [vmem:[#allocation25_spill] sm:$0xff] }
 0x2f3   : > { %31343 = vmatmul.mubr.f32.vlgmr.msra.gmra.mrb[32].mxu1 %v34080_v60  ;;  %31316 = vmatpush3.msra.mxu0 %v33139_v11  ;;  %v36834_v60 = vld [vmem:[#allocation134_spill] sm:$0xff] }
 0x2f4   : > { %31346 = vmatpush3.msra.mxu1 %v33141_v12  ;;  %31317 = vmatprep.mubr.msk.f32.mxu0 %vm33017_vm0, %v36652_v35 }
 0x2f5   : > { %31347 = vmatprep.mubr.msk.f32.mxu1 %vm33017_vm0, %v36652_v35  ;;  %31320 = vmatprep.subr.mxu0 %v36652_v35 }
 0x2f6   : > { %31350 = vmatprep.subr.mxu1 %v36652_v35 }
 0x2fa   : > { %31318 = vmatmul.mubr.f32.vlgmr.msra.gmra.mrb[32].mxu0 %v34095_v46  ;;  %v36836_v46 = vld [vmem:[#allocation139_spill] sm:$0xff] }
 0x2fb   : > { %31348 = vmatmul.mubr.f32.vlgmr.msra.gmra.mrb[32].mxu1 %v34098_v25  ;;  %31321 = vmatpush3.msra.mxu0 %v33166_v19  ;;  %v36837_v25 = vld [vmem:[#allocation140_spill] sm:$0xff] }
 0x2fc   : > { %31351 = vmatpush3.msra.mxu1 %v33169_v20  ;;  %31322 = vmatprep.mubr.msk.f32.mxu0 %vm33017_vm0, %v36652_v35 }
 0x2fd   : > { %31352 = vmatprep.mubr.msk.f32.mxu1 %vm33017_vm0, %v36652_v35  ;;  %31325 = vmatprep.subr.mxu0 %v36652_v35 }
 0x2fe   : > { %31355 = vmatprep.subr.mxu1 %v36652_v35 }
 0x301   : > { %v10851_v15 = vpop.f32.mrb[22].mxu0 }
 0x302   : > { %v11303_v16 = vpop.f32.mrb[22].mxu1  ;;  %v22065_v18 = vsub.f32 %v34212_v14, %v10851_v15  ;;  %v31029_v28 = vpop.f32.mrb[23].mxu0  ;;  %31323 = vmatmul.mubr.f32.vlgmr.msra.gmra.mrb[32].mxu0 %v34060_v3  ;;  %v36838_v14 = vld [vmem:[#allocation28_spill] sm:$0xff] }
 0x303   : > { %v22066_v27 = vsub.f32 %v34214_v23, %v11303_v16  ;;  %v31059_v19 = vpop.f32.mrb[23].mxu1  ;;  %31353 = vmatmul.mubr.f32.vlgmr.msra.gmra.mrb[32].mxu1 %v34062_v2  ;;  %31326 = vmatpush3.msra.mxu0 %v33139_v11  ;;  %v36830_v23 = vld [vmem:[#allocation130_spill] sm:$0xff]  ;;  %v36842_v15 = vld [vmem:[#allocation36_spill] sm:$0xff]  ;;  %v36843_v16 = vld [vmem:[#allocation37_spill] sm:$0xff] }
 0x304   : > { %31356 = vmatpush3.msra.mxu1 %v33141_v12  ;;  %v35109_v20 = vmul.f32 %v34812_v0, %v22065_v18  ;;  %31327 = vmatprep.mubr.msk.f32.mxu0 %vm33017_vm0, %v36652_v35  ;;  %v36844_v18 = vld [vmem:[#allocation161_spill] sm:$0xff]  ;;  %v36846_v28 = vld [vmem:[#allocation48_spill] sm:$0xff] }
 0x305   : > { %v35112_v61 = vmul.f32 %v34812_v0, %v22066_v27  ;;  %31357 = vmatprep.mubr.msk.f32.mxu1 %vm33017_vm0, %v36652_v35  ;;  %31360 = vmatprep.subr.mxu0 %v36652_v35  ;;  %v36845_v27 = vld [vmem:[#allocation162_spill] sm:$0xff]  ;;  %v36847_v19 = vld [vmem:[#allocation49_spill] sm:$0xff] }
 0x306   : > { %31390 = vmatprep.subr.mxu1 %v36652_v35  ;;  %29259 = vst.msk [vmem:[%s33119_s18 + $0xc] sm:$0x3] (!%p29568_p7), %vm29252_vm3, %v35109_v20 }
 0x307   : > { %29260 = vst.msk [vmem:[%s33119_s18 + $0xe] sm:$0x3] (!%p29568_p7), %vm29252_vm3, %v35112_v61 }
 0x30a   : > { %31328 = vmatmul.mubr.f32.vlgmr.msra.gmra.mrb[32].mxu0 %v34060_v3  ;;  %v36826_v3 = vld [vmem:[#allocation143_spill] sm:$0xff] }
 0x30b   : > { %31358 = vmatmul.mubr.f32.vlgmr.msra.gmra.mrb[32].mxu1 %v34062_v2  ;;  %31361 = vmatpush3.msra.mxu0 %v33233_v39 }
 0x30c   : > { %31391 = vmatpush3.msra.mxu1 %v33235_v40  ;;  %31362 = vmatprep.mubr.msk.f32.mxu0 %vm33017_vm0, %v36652_v35 }
 0x30d   : > { %31392 = vmatprep.mubr.msk.f32.mxu1 %vm33017_vm0, %v36652_v35  ;;  %31365 = vmatprep.subr.mxu0 %v36652_v35 }
 0x30e   : > { %31395 = vmatprep.subr.mxu1 %v36652_v35  ;;  %31363 = vmatmul.mubr.f32.vlgmr.msra.gmra.mrb[34].mxu0 %v34248_v57  ;;  %v36828_v57 = vld [vmem:[#allocation32_spill] sm:$0xff] }
 0x30f   : > { %31393 = vmatmul.mubr.f32.vlgmr.msra.gmra.mrb[34].mxu1 %v34250_v50  ;;  %31366 = vmatpush3.msra.mxu0 %v33293_v55  ;;  %v36827_v50 = vld [vmem:[#allocation144_spill] sm:$0xff] }
 0x310   : > { %31396 = vmatpush3.msra.mxu1 %v33295_v56  ;;  %31367 = vmatprep.mubr.msk.f32.mxu0 %vm33017_vm0, %v36652_v35 }
 0x311   : > { %31397 = vmatprep.mubr.msk.f32.mxu1 %vm33017_vm0, %v36652_v35  ;;  %31370 = vmatprep.subr.mxu0 %v36652_v35 }
 0x312   : > { %31400 = vmatprep.subr.mxu1 %v36652_v35 }
 0x316   : > { %31368 = vmatmul.mubr.f32.vlgmr.msra.gmra.mrb[34].mxu0 %v34184_v10 }
 0x317   : > { %31398 = vmatmul.mubr.f32.vlgmr.msra.gmra.mrb[34].mxu1 %v34186_v37  ;;  %31371 = vmatpush3.msra.mxu0 %v33250_v43 }
 0x318   : > { %31401 = vmatpush3.msra.mxu1 %v33253_v44  ;;  %31372 = vmatprep.mubr.msk.f32.mxu0 %vm33017_vm0, %v36652_v35  ;;  %v36823_v44 = vld [vmem:[#allocation138_spill] sm:$0xff] }
 0x319   : > { %31402 = vmatprep.mubr.msk.f32.mxu1 %vm33017_vm0, %v36652_v35  ;;  %31375 = vmatprep.subr.mxu0 %v36652_v35 }
 0x31a   : > { %31405 = vmatprep.subr.mxu1 %v36652_v35 }
 0x31e   : > { %31373 = vmatmul.mubr.f32.vlgmr.msra.gmra.mrb[34].mxu0 %v34201_v26  ;;  %v36839_v26 = vld [vmem:[#allocation29_spill] sm:$0xff] }
 0x31f   : > { %31403 = vmatmul.mubr.f32.vlgmr.msra.gmra.mrb[34].mxu1 %v34204_v38  ;;  %31376 = vmatpush3.msra.mxu0 %v33233_v39 }
 0x320   : > { %31406 = vmatpush3.msra.mxu1 %v33235_v40  ;;  %31377 = vmatprep.mubr.msk.f32.mxu0 %vm33017_vm0, %v36652_v35 }
 0x321   : > { %31407 = vmatprep.mubr.msk.f32.mxu1 %vm33017_vm0, %v36652_v35  ;;  %31380 = vmatprep.subr.mxu0 %v36652_v35 }
 0x322   : > { %31410 = vmatprep.subr.mxu1 %v36652_v35 }
 0x326   : > { %31378 = vmatmul.mubr.f32.vlgmr.msra.gmra.mrb[34].mxu0 %v34219_v52 }
 0x327   : > { %31408 = vmatmul.mubr.f32.vlgmr.msra.gmra.mrb[34].mxu1 %v34222_v63  ;;  %31381 = vmatpush3.msra.mxu0 %v33266_v47  ;;  %v36840_v63 = vld [vmem:[#allocation155_spill] sm:$0xff] }
 0x328   : > { %31411 = vmatpush3.msra.mxu1 %v33269_v48  ;;  %31382 = vmatprep.mubr.msk.f32.mxu0 %vm33017_vm0, %v36652_v35 }
 0x329   : > { %31412 = vmatprep.mubr.msk.f32.mxu1 %vm33017_vm0, %v36652_v35  ;;  %31385 = vmatprep.subr.mxu0 %v36652_v35 }
 0x32a   : > { %31415 = vmatprep.subr.mxu1 %v36652_v35 }
 0x32d   : > { %v11755_v11 = vpop.f32.mrb[24].mxu0 }
 0x32e   : > { %v12207_v12 = vpop.f32.mrb[24].mxu1  ;;  %v22067_v43 = vsub.f32 %v34332_v62, %v11755_v11  ;;  %v31089_v56 = vpop.f32.mrb[25].mxu0  ;;  %31383 = vmatmul.mubr.f32.vlgmr.msra.gmra.mrb[34].mxu0 %v34184_v10  ;;  %v36848_v11 = vld [vmem:[#allocation147_spill] sm:$0xff] }
 0x32f   : > { %v22068_v55 = vsub.f32 %v36823_v44, %v12207_v12  ;;  %v31119_v47 = vpop.f32.mrb[25].mxu1  ;;  %31413 = vmatmul.mubr.f32.vlgmr.msra.gmra.mrb[34].mxu1 %v34186_v37  ;;  %31386 = vmatpush3.msra.mxu0 %v33233_v39  ;;  %v36824_v39 = vld [vmem:[#allocation20_spill] sm:$0xff]  ;;  %v36851_v44 = vld [vmem:[#allocation41_spill] sm:$0xff] }
 0x330   : > { %31416 = vmatpush3.msra.mxu1 %v33235_v40  ;;  %v35177_v48 = vmul.f32 %v34812_v0, %v22067_v43  ;;  %31387 = vmatprep.mubr.msk.f32.mxu0 %vm33017_vm0, %v36652_v35  ;;  %v36825_v40 = vld [vmem:[#allocation21_spill] sm:$0xff]  ;;  %v36849_v12 = vld [vmem:[#allocation148_spill] sm:$0xff] }
 0x331   : > { %v35180_v2 = vmul.f32 %v34812_v0, %v22068_v55  ;;  %31417 = vmatprep.mubr.msk.f32.mxu1 %vm33017_vm0, %v36652_v35  ;;  %31420 = vmatprep.subr.mxu0 %v36652_v35  ;;  %v36850_v43 = vld [vmem:[#allocation40_spill] sm:$0xff]  ;;  %v36852_v55 = vld [vmem:[#allocation151_spill] sm:$0xff]  ;;  %v36854_v47 = vld [vmem:[#allocation157_spill] sm:$0xff] }
 0x332   : > { %31450 = vmatprep.subr.mxu1 %v36652_v35  ;;  %v36853_v56 = vld [vmem:[#allocation152_spill] sm:$0xff]  ;;  %29261 = vst.msk [vmem:[%s33119_s18 + $0x10] sm:$0x3] (!%p29568_p7), %vm29252_vm3, %v35177_v48 }
 0x333   : > { %29262 = vst.msk [vmem:[%s33119_s18 + $0x12] sm:$0x3] (!%p29568_p7), %vm29252_vm3, %v35180_v2 }
 0x336   : > { %31388 = vmatmul.mubr.f32.vlgmr.msra.gmra.mrb[34].mxu0 %v34184_v10  ;;  %v36835_v10 = vld [vmem:[#allocation135_spill] sm:$0xff] }
 0x337   : > { %31418 = vmatmul.mubr.f32.vlgmr.msra.gmra.mrb[34].mxu1 %v34186_v37  ;;  %31421 = vmatpush3.msra.mxu0 %v36824_v39  ;;  %v36829_v37 = vld [vmem:[#allocation33_spill] sm:$0xff] }
 0x338   : > { %31451 = vmatpush3.msra.mxu1 %v36825_v40  ;;  %31422 = vmatprep.mubr.msk.f32.mxu0 %vm33017_vm0, %v36652_v35 }
 0x339   : > { %31452 = vmatprep.mubr.msk.f32.mxu1 %vm33017_vm0, %v36652_v35  ;;  %31425 = vmatprep.subr.mxu0 %v36652_v35 }
 0x33a   : > { %31455 = vmatprep.subr.mxu1 %v36652_v35  ;;  %31423 = vmatmul.mubr.f32.vlgmr.msra.gmra.mrb[36].mxu0 %v36826_v3  ;;  %v36857_v3 = vld [vmem:[#allocation45_spill] sm:$0xff] }
 0x33b   : > { %31453 = vmatmul.mubr.f32.vlgmr.msra.gmra.mrb[36].mxu1 %v36827_v50  ;;  %31426 = vmatpush3.msra.mxu0 %v36828_v57 }
 0x33c   : > { %31456 = vmatpush3.msra.mxu1 %v36829_v37  ;;  %31427 = vmatprep.mubr.msk.f32.mxu0 %vm33017_vm0, %v36652_v35  ;;  %v36858_v37 = vld [vmem:[#allocation173_spill] sm:$0xff] }
 0x33d   : > { %31457 = vmatprep.mubr.msk.f32.mxu1 %vm33017_vm0, %v36652_v35  ;;  %31430 = vmatprep.subr.mxu0 %v36652_v35 }
 0x33e   : > { %31460 = vmatprep.subr.mxu1 %v36652_v35 }
 0x342   : > { %31428 = vmatmul.mubr.f32.vlgmr.msra.gmra.mrb[36].mxu0 %v36830_v23 }
 0x343   : > { %31458 = vmatmul.mubr.f32.vlgmr.msra.gmra.mrb[36].mxu1 %v36831_v59  ;;  %31431 = vmatpush3.msra.mxu0 %v36832_v42 }
 0x344   : > { %31461 = vmatpush3.msra.mxu1 %v36833_v22  ;;  %31432 = vmatprep.mubr.msk.f32.mxu0 %vm33017_vm0, %v36652_v35 }
 0x345   : > { %31462 = vmatprep.mubr.msk.f32.mxu1 %vm33017_vm0, %v36652_v35  ;;  %31435 = vmatprep.subr.mxu0 %v36652_v35 }
 0x346   : > { %31465 = vmatprep.subr.mxu1 %v36652_v35 }
 0x34a   : > { %31433 = vmatmul.mubr.f32.vlgmr.msra.gmra.mrb[36].mxu0 %v36834_v60 }
 0x34b   : > { %31463 = vmatmul.mubr.f32.vlgmr.msra.gmra.mrb[36].mxu1 %v36835_v10  ;;  %31436 = vmatpush3.msra.mxu0 %v36824_v39 }
 0x34c   : > { %31466 = vmatpush3.msra.mxu1 %v36825_v40  ;;  %31437 = vmatprep.mubr.msk.f32.mxu0 %vm33017_vm0, %v36652_v35 }
 0x34d   : > { %31467 = vmatprep.mubr.msk.f32.mxu1 %vm33017_vm0, %v36652_v35  ;;  %31440 = vmatprep.subr.mxu0 %v36652_v35 }
 0x34e   : > { %31470 = vmatprep.subr.mxu1 %v36652_v35 }
 0x352   : > { %31438 = vmatmul.mubr.f32.vlgmr.msra.gmra.mrb[36].mxu0 %v36836_v46 }
 0x353   : > { %31468 = vmatmul.mubr.f32.vlgmr.msra.gmra.mrb[36].mxu1 %v36837_v25  ;;  %31441 = vmatpush3.msra.mxu0 %v36838_v14  ;;  %v36860_v25 = vld [vmem:[#allocation52_spill] sm:$0xff]  ;;  %v36861_v14 = vld [vmem:[#allocation53_spill] sm:$0xff] }
 0x354   : > { %31471 = vmatpush3.msra.mxu1 %v36839_v26  ;;  %31442 = vmatprep.mubr.msk.f32.mxu0 %vm33017_vm0, %v36652_v35  ;;  %v36862_v26 = vld [vmem:[#allocation179_spill] sm:$0xff] }
 0x355   : > { %31472 = vmatprep.mubr.msk.f32.mxu1 %vm33017_vm0, %v36652_v35  ;;  %31445 = vmatprep.subr.mxu0 %v36652_v35 }
 0x356   : > { %31475 = vmatprep.subr.mxu1 %v36652_v35 }
 0x359   : > { %v12659_v38 = vpop.f32.mrb[26].mxu0 }
 0x35a   : > { %v13111_v52 = vpop.f32.mrb[26].mxu1  ;;  %v22069_v62 = vsub.f32 %v36840_v63, %v12659_v38  ;;  %v31149_v53 = vpop.f32.mrb[27].mxu0  ;;  %31443 = vmatmul.mubr.f32.vlgmr.msra.gmra.mrb[36].mxu0 %v36830_v23  ;;  %v36863_v38 = vld [vmem:[#allocation180_spill] sm:$0xff]  ;;  %v36865_v63 = vld [vmem:[#allocation65_spill] sm:$0xff] }
 0x35b   : > { %v22070_v31 = vsub.f32 %v36841_v41, %v13111_v52  ;;  %v31179_v58 = vpop.f32.mrb[27].mxu1  ;;  %31473 = vmatmul.mubr.f32.vlgmr.msra.gmra.mrb[36].mxu1 %v36831_v59  ;;  %31446 = vmatpush3.msra.mxu0 %v36824_v39  ;;  %v36855_v39 = vld [vmem:[#allocation158_spill] sm:$0xff]  ;;  %v36864_v52 = vld [vmem:[#allocation64_spill] sm:$0xff]  ;;  %v36869_v53 = vld [vmem:[#allocation57_spill] sm:$0xff] }
 0x35c   : > { %31476 = vmatpush3.msra.mxu1 %v36825_v40  ;;  %v35245_v51 = vmul.f32 %v34812_v0, %v22069_v62  ;;  %31447 = vmatprep.mubr.msk.f32.mxu0 %vm33017_vm0, %v36652_v35  ;;  %v36856_v40 = vld [vmem:[#allocation44_spill] sm:$0xff]  ;;  %v36866_v62 = vld [vmem:[#allocation165_spill] sm:$0xff]  ;;  %v36867_v41 = vld [vmem:[#allocation166_spill] sm:$0xff] }
 0x35d   : > { %v35248_v21 = vmul.f32 %v34812_v0, %v22070_v31  ;;  %31477 = vmatprep.mubr.msk.f32.mxu1 %vm33017_vm0, %v36652_v35  ;;  %31480 = vmatprep.subr.mxu0 %v36652_v35  ;;  %v36868_v31 = vld [vmem:[#allocation56_spill] sm:$0xff]  ;;  %v36870_v58 = vld [vmem:[#allocation169_spill] sm:$0xff] }
 0x35e   : > { %31510 = vmatprep.subr.mxu1 %v36652_v35  ;;  %29263 = vst.msk [vmem:[%s33119_s18 + $0x14] sm:$0x3] (!%p29568_p7), %vm29252_vm3, %v35245_v51 }
 0x35f   : > { %29264 = vst.msk [vmem:[%s33119_s18 + $0x16] sm:$0x3] (!%p29568_p7), %vm29252_vm3, %v35248_v21 }
 0x362   : > { %31448 = vmatmul.mubr.f32.vlgmr.msra.gmra.mrb[36].mxu0 %v36830_v23 }
 0x363   : > { %31478 = vmatmul.mubr.f32.vlgmr.msra.gmra.mrb[36].mxu1 %v36831_v59  ;;  %31481 = vmatpush3.msra.mxu0 %v36842_v15  ;;  %v36859_v59 = vld [vmem:[#allocation174_spill] sm:$0xff] }
 0x364   : > { %31511 = vmatpush3.msra.mxu1 %v36843_v16  ;;  %31482 = vmatprep.mubr.msk.f32.mxu0 %vm33017_vm0, %v36652_v35 }
 0x365   : > { %31512 = vmatprep.mubr.msk.f32.mxu1 %vm33017_vm0, %v36652_v35  ;;  %31485 = vmatprep.subr.mxu0 %v36652_v35 }
 0x366   : > { %31515 = vmatprep.subr.mxu1 %v36652_v35  ;;  %31483 = vmatmul.mubr.f32.vlgmr.msra.gmra.mrb[38].mxu0 %v36844_v18  ;;  %v36873_v18 = vld [vmem:[#allocation176_spill] sm:$0xff] }
 0x367   : > { %31513 = vmatmul.mubr.f32.vlgmr.msra.gmra.mrb[38].mxu1 %v36845_v27  ;;  %31486 = vmatpush3.msra.mxu0 %v36846_v28  ;;  %v36874_v27 = vld [vmem:[#allocation60_spill] sm:$0xff]  ;;  %v36875_v28 = vld [vmem:[#allocation61_spill] sm:$0xff] }
 0x368   : > { %31516 = vmatpush3.msra.mxu1 %v36847_v19  ;;  %31487 = vmatprep.mubr.msk.f32.mxu0 %vm33017_vm0, %v36652_v35 }
 0x369   : > { %31517 = vmatprep.mubr.msk.f32.mxu1 %vm33017_vm0, %v36652_v35  ;;  %31490 = vmatprep.subr.mxu0 %v36652_v35 }
 0x36a   : > { %31520 = vmatprep.subr.mxu1 %v36652_v35 }
 0x36e   : > { %31488 = vmatmul.mubr.f32.vlgmr.msra.gmra.mrb[38].mxu0 %v36848_v11 }
 0x36f   : > { %31518 = vmatmul.mubr.f32.vlgmr.msra.gmra.mrb[38].mxu1 %v36849_v12  ;;  %31491 = vmatpush3.msra.mxu0 %v36850_v43 }
 0x370   : > { %31521 = vmatpush3.msra.mxu1 %v36851_v44  ;;  %31492 = vmatprep.mubr.msk.f32.mxu0 %vm33017_vm0, %v36652_v35  ;;  %v36877_v44 = vld [vmem:[#allocation191_spill] sm:$0xff] }
 0x371   : > { %31522 = vmatprep.mubr.msk.f32.mxu1 %vm33017_vm0, %v36652_v35  ;;  %31495 = vmatprep.subr.mxu0 %v36652_v35 }
 0x372   : > { %31525 = vmatprep.subr.mxu1 %v36652_v35 }
 0x376   : > { %31493 = vmatmul.mubr.f32.vlgmr.msra.gmra.mrb[38].mxu0 %v36852_v55 }
 0x377   : > { %31523 = vmatmul.mubr.f32.vlgmr.msra.gmra.mrb[38].mxu1 %v36853_v56  ;;  %31496 = vmatpush3.msra.mxu0 %v36842_v15 }
 0x378   : > { %31526 = vmatpush3.msra.mxu1 %v36843_v16  ;;  %31497 = vmatprep.mubr.msk.f32.mxu0 %vm33017_vm0, %v36652_v35 }
 0x379   : > { %31527 = vmatprep.mubr.msk.f32.mxu1 %vm33017_vm0, %v36652_v35  ;;  %31500 = vmatprep.subr.mxu0 %v36652_v35 }
 0x37a   : > { %31530 = vmatprep.subr.mxu1 %v36652_v35 }
 0x37e   : > { %31498 = vmatmul.mubr.f32.vlgmr.msra.gmra.mrb[38].mxu0 %v36854_v47 }
 0x37f   : > { %31528 = vmatmul.mubr.f32.vlgmr.msra.gmra.mrb[38].mxu1 %v36855_v39  ;;  %31501 = vmatpush3.msra.mxu0 %v36856_v40 }
 0x380   : > { %31531 = vmatpush3.msra.mxu1 %v36857_v3  ;;  %31502 = vmatprep.mubr.msk.f32.mxu0 %vm33017_vm0, %v36652_v35  ;;  %v36878_v3 = vld [vmem:[#allocation68_spill] sm:$0xff] }
 0x381   : > { %31532 = vmatprep.mubr.msk.f32.mxu1 %vm33017_vm0, %v36652_v35  ;;  %31505 = vmatprep.subr.mxu0 %v36652_v35 }
 0x382   : > { %31535 = vmatprep.subr.mxu1 %v36652_v35 }
 0x385   : > { %v13563_v50 = vpop.f32.mrb[28].mxu0 }
 0x386   : > { %v14015_v57 = vpop.f32.mrb[28].mxu1  ;;  %v22071_v23 = vsub.f32 %v36858_v37, %v13563_v50  ;;  %v31209_v22 = vpop.f32.mrb[29].mxu0  ;;  %31503 = vmatmul.mubr.f32.vlgmr.msra.gmra.mrb[38].mxu0 %v36848_v11  ;;  %v36879_v50 = vld [vmem:[#allocation69_spill] sm:$0xff] }
 0x387   : > { %v22072_v42 = vsub.f32 %v36859_v59, %v14015_v57  ;;  %v31239_v60 = vpop.f32.mrb[29].mxu1  ;;  %31533 = vmatmul.mubr.f32.vlgmr.msra.gmra.mrb[38].mxu1 %v36849_v12  ;;  %31506 = vmatpush3.msra.mxu0 %v36842_v15  ;;  %v36871_v15 = vld [vmem:[#allocation170_spill] sm:$0xff]  ;;  %v36880_v57 = vld [vmem:[#allocation196_spill] sm:$0xff]  ;;  %v36881_v37 = vld [vmem:[#allocation197_spill] sm:$0xff] }
 0x388   : > { %31536 = vmatpush3.msra.mxu1 %v36843_v16  ;;  %v35313_v10 = vmul.f32 %v34812_v0, %v22071_v23  ;;  %31507 = vmatprep.mubr.msk.f32.mxu0 %vm33017_vm0, %v36652_v35  ;;  %v36872_v16 = vld [vmem:[#allocation175_spill] sm:$0xff]  ;;  %v36882_v23 = vld [vmem:[#allocation80_spill] sm:$0xff]  ;;  %v36883_v59 = vld [vmem:[#allocation81_spill] sm:$0xff] }
 0x389   : > { %v35316_v46 = vmul.f32 %v34812_v0, %v22072_v42  ;;  %31537 = vmatprep.mubr.msk.f32.mxu1 %vm33017_vm0, %v36652_v35  ;;  %31540 = vmatprep.subr.mxu0 %v36652_v35  ;;  %v36884_v42 = vld [vmem:[#allocation183_spill] sm:$0xff]  ;;  %v36885_v22 = vld [vmem:[#allocation72_spill] sm:$0xff]  ;;  %v36886_v60 = vld [vmem:[#allocation73_spill] sm:$0xff] }
 0x38a   : > { %31570 = vmatprep.subr.mxu1 %v36652_v35  ;;  %29265 = vst.msk [vmem:[%s33119_s18 + $0x18] sm:$0x3] (!%p29568_p7), %vm29252_vm3, %v35313_v10 }
 0x38b   : > { %29266 = vst.msk [vmem:[%s33119_s18 + $0x1a] sm:$0x3] (!%p29568_p7), %vm29252_vm3, %v35316_v46 }
 0x38e   : > { %31508 = vmatmul.mubr.f32.vlgmr.msra.gmra.mrb[38].mxu0 %v36848_v11 }
 0x38f   : > { %31538 = vmatmul.mubr.f32.vlgmr.msra.gmra.mrb[38].mxu1 %v36849_v12  ;;  %31541 = vmatpush3.msra.mxu0 %v36860_v25  ;;  %v36876_v12 = vld [vmem:[#allocation190_spill] sm:$0xff] }
 0x390   : > { %31571 = vmatpush3.msra.mxu1 %v36861_v14  ;;  %31542 = vmatprep.mubr.msk.f32.mxu0 %vm33017_vm0, %v36652_v35 }
 0x391   : > { %31572 = vmatprep.mubr.msk.f32.mxu1 %vm33017_vm0, %v36652_v35  ;;  %31545 = vmatprep.subr.mxu0 %v36652_v35 }
 0x392   : > { %31575 = vmatprep.subr.mxu1 %v36652_v35  ;;  %31543 = vmatmul.mubr.f32.vlgmr.msra.gmra.mrb[40].mxu0 %v36862_v26  ;;  %v36889_v26 = vld [vmem:[#allocation192_spill] sm:$0xff] }
 0x393   : > { %31573 = vmatmul.mubr.f32.vlgmr.msra.gmra.mrb[40].mxu1 %v36863_v38  ;;  %31546 = vmatpush3.msra.mxu0 %v36864_v52  ;;  %v36890_v38 = vld [vmem:[#allocation193_spill] sm:$0xff]  ;;  %v36891_v52 = vld [vmem:[#allocation76_spill] sm:$0xff] }
 0x394   : > { %31576 = vmatpush3.msra.mxu1 %v36865_v63  ;;  %31547 = vmatprep.mubr.msk.f32.mxu0 %vm33017_vm0, %v36652_v35  ;;  %v36892_v63 = vld [vmem:[#allocation77_spill] sm:$0xff] }
 0x395   : > { %31577 = vmatprep.mubr.msk.f32.mxu1 %vm33017_vm0, %v36652_v35  ;;  %31550 = vmatprep.subr.mxu0 %v36652_v35 }
 0x396   : > { %31580 = vmatprep.subr.mxu1 %v36652_v35 }
 0x39a   : > { %31548 = vmatmul.mubr.f32.vlgmr.msra.gmra.mrb[40].mxu0 %v36866_v62 }
 0x39b   : > { %31578 = vmatmul.mubr.f32.vlgmr.msra.gmra.mrb[40].mxu1 %v36867_v41  ;;  %31551 = vmatpush3.msra.mxu0 %v36868_v31  ;;  %v36895_v31 = vld [vmem:[#allocation210_spill] sm:$0xff] }
 0x39c   : > { %31581 = vmatpush3.msra.mxu1 %v36869_v53  ;;  %31552 = vmatprep.mubr.msk.f32.mxu0 %vm33017_vm0, %v36652_v35  ;;  %v36896_v53 = vld [vmem:[#allocation211_spill] sm:$0xff] }
 0x39d   : > { %31582 = vmatprep.mubr.msk.f32.mxu1 %vm33017_vm0, %v36652_v35  ;;  %31555 = vmatprep.subr.mxu0 %v36652_v35 }
 0x39e   : > { %31585 = vmatprep.subr.mxu1 %v36652_v35 }
 0x3a2   : > { %31553 = vmatmul.mubr.f32.vlgmr.msra.gmra.mrb[40].mxu0 %v36870_v58  ;;  %v36898_v58 = vld [vmem:[#allocation97_spill] sm:$0xff] }
 0x3a3   : > { %31583 = vmatmul.mubr.f32.vlgmr.msra.gmra.mrb[40].mxu1 %v36871_v15  ;;  %31556 = vmatpush3.msra.mxu0 %v36860_v25  ;;  %v36899_v15 = vld [vmem:[#allocation88_spill] sm:$0xff] }
 0x3a4   : > { %31586 = vmatpush3.msra.mxu1 %v36861_v14  ;;  %31557 = vmatprep.mubr.msk.f32.mxu0 %vm33017_vm0, %v36652_v35 }
 0x3a5   : > { %31587 = vmatprep.mubr.msk.f32.mxu1 %vm33017_vm0, %v36652_v35  ;;  %31560 = vmatprep.subr.mxu0 %v36652_v35 }
 0x3a6   : > { %31590 = vmatprep.subr.mxu1 %v36652_v35 }
 0x3aa   : > { %31558 = vmatmul.mubr.f32.vlgmr.msra.gmra.mrb[40].mxu0 %v36872_v16  ;;  %v36900_v16 = vld [vmem:[#allocation89_spill] sm:$0xff] }
 0x3ab   : > { %31588 = vmatmul.mubr.f32.vlgmr.msra.gmra.mrb[40].mxu1 %v36873_v18  ;;  %31561 = vmatpush3.msra.mxu0 %v36874_v27  ;;  %v36901_v18 = vld [vmem:[#allocation200_spill] sm:$0xff]  ;;  %v36902_v27 = vld [vmem:[#allocation201_spill] sm:$0xff] }
 0x3ac   : > { %31591 = vmatpush3.msra.mxu1 %v36875_v28  ;;  %31562 = vmatprep.mubr.msk.f32.mxu0 %vm33017_vm0, %v36652_v35  ;;  %v36903_v28 = vld [vmem:[#allocation204_spill] sm:$0xff] }
 0x3ad   : > { %31592 = vmatprep.mubr.msk.f32.mxu1 %vm33017_vm0, %v36652_v35  ;;  %31565 = vmatprep.subr.mxu0 %v36652_v35 }
 0x3ae   : > { %31595 = vmatprep.subr.mxu1 %v36652_v35 }
 0x3b1   : > { %v14467_v19 = vpop.f32.mrb[30].mxu0 }
 0x3b2   : > { %v14919_v11 = vpop.f32.mrb[30].mxu1  ;;  %v22073_v43 = vsub.f32 %v36876_v12, %v14467_v19  ;;  %v31269_v56 = vpop.f32.mrb[31].mxu0  ;;  %31563 = vmatmul.mubr.f32.vlgmr.msra.gmra.mrb[40].mxu0 %v36866_v62  ;;  %v36904_v19 = vld [vmem:[#allocation205_spill] sm:$0xff] }
 0x3b3   : > { %v22074_v55 = vsub.f32 %v36877_v44, %v14919_v11  ;;  %v31299_v47 = vpop.f32.mrb[31].mxu1  ;;  %31593 = vmatmul.mubr.f32.vlgmr.msra.gmra.mrb[40].mxu1 %v36867_v41  ;;  %31566 = vmatpush3.msra.mxu0 %v36860_v25  ;;  %v36887_v25 = vld [vmem:[#allocation186_spill] sm:$0xff]  ;;  %v36905_v11 = vld [vmem:[#allocation92_spill] sm:$0xff]  ;;  %v36906_v12 = vld [vmem:[#allocation93_spill] sm:$0xff] }
 0x3b4   : > { %31596 = vmatpush3.msra.mxu1 %v36861_v14  ;;  %v35381_v39 = vmul.f32 %v34812_v0, %v22073_v43  ;;  %31567 = vmatprep.mubr.msk.f32.mxu0 %vm33017_vm0, %v36652_v35  ;;  %v36888_v14 = vld [vmem:[#allocation187_spill] sm:$0xff]  ;;  %v36907_v43 = vld [vmem:[#allocation100_spill] sm:$0xff]  ;;  %v36908_v44 = vld [vmem:[#allocation101_spill] sm:$0xff] }
 0x3b5   : > { %v35384_v40 = vmul.f32 %v34812_v0, %v22074_v55  ;;  %31597 = vmatprep.mubr.msk.f32.mxu1 %vm33017_vm0, %v36652_v35  ;;  %31600 = vmatprep.subr.mxu0 %v36652_v35  ;;  %v36917_v55 = vld [vmem:[#allocation8_spill] sm:$0xff]  ;;  %v36918_v56 = vld [vmem:[#allocation9_spill] sm:$0xff]  ;;  %v36921_v47 = vld [vmem:[#allocation2_spill] sm:$0xff] }
 0x3b6   : > { %31630 = vmatprep.subr.mxu1 %v36652_v35  ;;  %29267 = vst.msk [vmem:[%s33119_s18 + $0x1c] sm:$0x3] (!%p29568_p7), %vm29252_vm3, %v35381_v39 }
 0x3b7   : > { %29268 = vst.msk [vmem:[%s33119_s18 + $0x1e] sm:$0x3] (!%p29568_p7), %vm29252_vm3, %v35384_v40 }
 0x3ba   : > { %31568 = vmatmul.mubr.f32.vlgmr.msra.gmra.mrb[40].mxu0 %v36866_v62  ;;  %v36893_v62 = vld [vmem:[#allocation84_spill] sm:$0xff] }
 0x3bb   : > { %31598 = vmatmul.mubr.f32.vlgmr.msra.gmra.mrb[40].mxu1 %v36867_v41  ;;  %31601 = vmatpush3.msra.mxu0 %v36878_v3  ;;  %v36894_v41 = vld [vmem:[#allocation85_spill] sm:$0xff] }
 0x3bc   : > { %31631 = vmatpush3.msra.mxu1 %v36879_v50  ;;  %31602 = vmatprep.mubr.msk.f32.mxu0 %vm33017_vm0, %v36652_v35 }
 0x3bd   : > { %31632 = vmatprep.mubr.msk.f32.mxu1 %vm33017_vm0, %v36652_v35  ;;  %31605 = vmatprep.subr.mxu0 %v36652_v35 }
 0x3be   : > { %31635 = vmatprep.subr.mxu1 %v36652_v35  ;;  %31603 = vmatmul.mubr.f32.vlgmr.msra.gmra.mrb[42].mxu0 %v36880_v57  ;;  %v36924_v57 = vld [vmem:[#allocation117_spill] sm:$0xff] }
 0x3bf   : > { %31633 = vmatmul.mubr.f32.vlgmr.msra.gmra.mrb[42].mxu1 %v36881_v37  ;;  %31606 = vmatpush3.msra.mxu0 %v36882_v23  ;;  %v36925_v37 = vld [vmem:[#allocation4_spill] sm:$0xff]  ;;  %v36926_v23 = vld [vmem:[#allocation5_spill] sm:$0xff] }
 0x3c0   : > { %31636 = vmatpush3.msra.mxu1 %v36883_v59  ;;  %31607 = vmatprep.mubr.msk.f32.mxu0 %vm33017_vm0, %v36652_v35  ;;  %v36927_v59 = vld [vmem:[#allocation6_spill] sm:$0xff] }
 0x3c1   : > { %31637 = vmatprep.mubr.msk.f32.mxu1 %vm33017_vm0, %v36652_v35  ;;  %31610 = vmatprep.subr.mxu0 %v36652_v35 }
 0x3c2   : > { %31640 = vmatprep.subr.mxu1 %v36652_v35 }
 0x3c6   : > { %31608 = vmatmul.mubr.f32.vlgmr.msra.gmra.mrb[42].mxu0 %v34664_v8 }
 0x3c7   : > { %31638 = vmatmul.mubr.f32.vlgmr.msra.gmra.mrb[42].mxu1 %v36884_v42  ;;  %31611 = vmatpush3.msra.mxu0 %v36885_v22  ;;  %v36929_v22 = vld [vmem:[#allocation118_spill] sm:$0xff] }
 0x3c8   : > { %31641 = vmatpush3.msra.mxu1 %v36886_v60  ;;  %31612 = vmatprep.mubr.msk.f32.mxu0 %vm33017_vm0, %v36652_v35  ;;  %v36930_v60 = vld [vmem:[#allocation119_spill] sm:$0xff] }
 0x3c9   : > { %31642 = vmatprep.mubr.msk.f32.mxu1 %vm33017_vm0, %v36652_v35  ;;  %31615 = vmatprep.subr.mxu0 %v36652_v35 }
 0x3ca   : > { %31645 = vmatprep.subr.mxu1 %v36652_v35 }
 0x3ce   : > { %31613 = vmatmul.mubr.f32.vlgmr.msra.gmra.mrb[42].mxu0 %v36887_v25  ;;  %v36931_v25 = vld [vmem:[#allocation122_spill] sm:$0xff] }
 0x3cf   : > { %31643 = vmatmul.mubr.f32.vlgmr.msra.gmra.mrb[42].mxu1 %v36888_v14  ;;  %31616 = vmatpush3.msra.mxu0 %v36878_v3  ;;  %v36932_v14 = vld [vmem:[#allocation123_spill] sm:$0xff] }
 0x3d0   : > { %31646 = vmatpush3.msra.mxu1 %v36879_v50  ;;  %31617 = vmatprep.mubr.msk.f32.mxu0 %vm33017_vm0, %v36652_v35 }
 0x3d1   : > { %31647 = vmatprep.mubr.msk.f32.mxu1 %vm33017_vm0, %v36652_v35  ;;  %31620 = vmatprep.subr.mxu0 %v36652_v35 }
 0x3d2   : > { %31650 = vmatprep.subr.mxu1 %v36652_v35 }
 0x3d6   : > { %31618 = vmatmul.mubr.f32.vlgmr.msra.gmra.mrb[42].mxu0 %v36889_v26  ;;  %v36933_v26 = vld [vmem:[#allocation16_spill] sm:$0xff] }
 0x3d7   : > { %31648 = vmatmul.mubr.f32.vlgmr.msra.gmra.mrb[42].mxu1 %v36890_v38  ;;  %31621 = vmatpush3.msra.mxu0 %v36891_v52  ;;  %v36934_v38 = vld [vmem:[#allocation17_spill] sm:$0xff]  ;;  %v36935_v52 = vld [vmem:[#allocation128_spill] sm:$0xff] }
 0x3d8   : > { %31651 = vmatpush3.msra.mxu1 %v36892_v63  ;;  %31622 = vmatprep.mubr.msk.f32.mxu0 %vm33017_vm0, %v36652_v35  ;;  %v36936_v63 = vld [vmem:[#allocation129_spill] sm:$0xff] }
 0x3d9   : > { %31652 = vmatprep.mubr.msk.f32.mxu1 %vm33017_vm0, %v36652_v35  ;;  %31625 = vmatprep.subr.mxu0 %v36652_v35 }
 0x3da   : > { %31655 = vmatprep.subr.mxu1 %v36652_v35 }
 0x3de   : > { %31623 = vmatmul.mubr.f32.vlgmr.msra.gmra.mrb[42].mxu0 %v34664_v8 }
 0x3df   : > { %31653 = vmatmul.mubr.f32.vlgmr.msra.gmra.mrb[42].mxu1 %v36884_v42  ;;  %31626 = vmatpush3.msra.mxu0 %v36878_v3  ;;  %v36922_v3 = vld [vmem:[#allocation3_spill] sm:$0xff] }
 0x3e0   : > { %31656 = vmatpush3.msra.mxu1 %v36879_v50  ;;  %31627 = vmatprep.mubr.msk.f32.mxu0 %vm33017_vm0, %v36652_v35  ;;  %v36923_v50 = vld [vmem:[#allocation116_spill] sm:$0xff] }
 0x3e1   : > { %31657 = vmatprep.mubr.msk.f32.mxu1 %vm33017_vm0, %v36652_v35  ;;  %31660 = vmatprep.subr.mxu0 %v36652_v35 }
 0x3e2   : > { %31690 = vmatprep.subr.mxu1 %v36652_v35 }
 0x3e6   : > { %31628 = vmatmul.mubr.f32.vlgmr.msra.gmra.mrb[42].mxu0 %v34664_v8  ;;  %v36897_v8 = vld [vmem:[#allocation96_spill] sm:$0xff] }
 0x3e7   : > { %31658 = vmatmul.mubr.f32.vlgmr.msra.gmra.mrb[42].mxu1 %v36884_v42  ;;  %31661 = vmatpush3.msra.mxu0 %v36893_v62  ;;  %v36928_v42 = vld [vmem:[#allocation7_spill] sm:$0xff] }
 0x3e8   : > { %31691 = vmatpush3.msra.mxu1 %v36894_v41  ;;  %31662 = vmatprep.mubr.msk.f32.mxu0 %vm33017_vm0, %v36652_v35 }
 0x3e9   : > { %31692 = vmatprep.mubr.msk.f32.mxu1 %vm33017_vm0, %v36652_v35  ;;  %31665 = vmatprep.subr.mxu0 %v36652_v35 }
 0x3ea   : > { %31695 = vmatprep.subr.mxu1 %v36652_v35  ;;  %31663 = vmatmul.mubr.f32.vlgmr.msra.gmra.mrb[44].mxu0 %v36895_v31  ;;  %v36939_v31 = vld [vmem:[#allocation124_spill] sm:$0xff] }
 0x3eb   : > { %31693 = vmatmul.mubr.f32.vlgmr.msra.gmra.mrb[44].mxu1 %v36896_v53  ;;  %31666 = vmatpush3.msra.mxu0 %v36897_v8  ;;  %v36940_v53 = vld [vmem:[#allocation125_spill] sm:$0xff]  ;;  %v36941_v8 = vld [vmem:[#allocation12_spill] sm:$0xff] }
 0x3ec   : > { %31696 = vmatpush3.msra.mxu1 %v36898_v58  ;;  %31667 = vmatprep.mubr.msk.f32.mxu0 %vm33017_vm0, %v36652_v35  ;;  %v36942_v58 = vld [vmem:[#allocation13_spill] sm:$0xff] }
 0x3ed   : > { %31697 = vmatprep.mubr.msk.f32.mxu1 %vm33017_vm0, %v36652_v35  ;;  %31670 = vmatprep.subr.mxu0 %v36652_v35 }
 0x3ee   : > { %31700 = vmatprep.subr.mxu1 %v36652_v35 }
 0x3f2   : > { %31668 = vmatmul.mubr.f32.vlgmr.msra.gmra.mrb[44].mxu0 %v34784_v9 }
 0x3f3   : > { %31698 = vmatmul.mubr.f32.vlgmr.msra.gmra.mrb[44].mxu1 %v34786_v54  ;;  %31671 = vmatpush3.msra.mxu0 %v36899_v15  ;;  %v36943_v15 = vld [vmem:[#allocation14_spill] sm:$0xff] }
 0x3f4   : > { %31701 = vmatpush3.msra.mxu1 %v36900_v16  ;;  %31672 = vmatprep.mubr.msk.f32.mxu0 %vm33017_vm0, %v36652_v35  ;;  %v36944_v16 = vld [vmem:[#allocation15_spill] sm:$0xff] }
 0x3f5   : > { %31702 = vmatprep.mubr.msk.f32.mxu1 %vm33017_vm0, %v36652_v35  ;;  %31675 = vmatprep.subr.mxu0 %v36652_v35 }
 0x3f6   : > { %31705 = vmatprep.subr.mxu1 %v36652_v35 }
 0x3fa   : > { %31673 = vmatmul.mubr.f32.vlgmr.msra.gmra.mrb[44].mxu0 %v36901_v18  ;;  %v36945_v18 = vld [vmem:[#allocation126_spill] sm:$0xff] }
 0x3fb   : > { %31703 = vmatmul.mubr.f32.vlgmr.msra.gmra.mrb[44].mxu1 %v36902_v27  ;;  %31676 = vmatpush3.msra.mxu0 %v36893_v62  ;;  %v36946_v27 = vld [vmem:[#allocation127_spill] sm:$0xff] }
 0x3fc   : > { %31706 = vmatpush3.msra.mxu1 %v36894_v41  ;;  %31677 = vmatprep.mubr.msk.f32.mxu0 %vm33017_vm0, %v36652_v35 }
 0x3fd   : > { %31707 = vmatprep.mubr.msk.f32.mxu1 %vm33017_vm0, %v36652_v35  ;;  %31680 = vmatprep.subr.mxu0 %v36652_v35 }
 0x3fe   : > { %31710 = vmatprep.subr.mxu1 %v36652_v35 }
 0x402   : > { %31678 = vmatmul.mubr.f32.vlgmr.msra.gmra.mrb[44].mxu0 %v36903_v28  ;;  %v36947_v28 = vld [vmem:[#allocation132_spill] sm:$0xff] }
 0x403   : > { %31708 = vmatmul.mubr.f32.vlgmr.msra.gmra.mrb[44].mxu1 %v36904_v19  ;;  %31681 = vmatpush3.msra.mxu0 %v36905_v11  ;;  %v36948_v19 = vld [vmem:[#allocation133_spill] sm:$0xff]  ;;  %v36949_v11 = vld [vmem:[#allocation30_spill] sm:$0xff] }
 0x404   : > { %31711 = vmatpush3.msra.mxu1 %v36906_v12  ;;  %31682 = vmatprep.mubr.msk.f32.mxu0 %vm33017_vm0, %v36652_v35  ;;  %v36950_v12 = vld [vmem:[#allocation31_spill] sm:$0xff] }
 0x405   : > { %31712 = vmatprep.mubr.msk.f32.mxu1 %vm33017_vm0, %v36652_v35  ;;  %31685 = vmatprep.subr.mxu0 %v36652_v35 }
 0x406   : > { %31715 = vmatprep.subr.mxu1 %v36652_v35 }
 0x40a   : > { %31683 = vmatmul.mubr.f32.vlgmr.msra.gmra.mrb[44].mxu0 %v34784_v9 }
 0x40b   : > { %31713 = vmatmul.mubr.f32.vlgmr.msra.gmra.mrb[44].mxu1 %v34786_v54  ;;  %31686 = vmatpush3.msra.mxu0 %v36893_v62  ;;  %v36937_v62 = vld [vmem:[#allocation10_spill] sm:$0xff] }
 0x40c   : > { %31716 = vmatpush3.msra.mxu1 %v36894_v41  ;;  %31687 = vmatprep.mubr.msk.f32.mxu0 %vm33017_vm0, %v36652_v35  ;;  %v36938_v41 = vld [vmem:[#allocation11_spill] sm:$0xff] }
 0x40d   : > { %31717 = vmatprep.mubr.msk.f32.mxu1 %vm33017_vm0, %v36652_v35  ;;  %31720 = vmatprep.subr.mxu0 %v36652_v35 }
 0x40e   : > { %31750 = vmatprep.subr.mxu1 %v36652_v35 }
 0x412   : > { %31688 = vmatmul.mubr.f32.vlgmr.msra.gmra.mrb[44].mxu0 %v34784_v9  ;;  %v36909_v9 = vld [vmem:[#allocation112_spill] sm:$0xff] }
 0x413   : > { %31718 = vmatmul.mubr.f32.vlgmr.msra.gmra.mrb[44].mxu1 %v34786_v54  ;;  %31721 = vmatpush3.msra.mxu0 %v36907_v43  ;;  %v36910_v54 = vld [vmem:[#allocation113_spill] sm:$0xff] }
 0x414   : > { %31751 = vmatpush3.msra.mxu1 %v36908_v44  ;;  %31722 = vmatprep.mubr.msk.f32.mxu0 %vm33017_vm0, %v36652_v35 }
 0x415   : > { %31752 = vmatprep.mubr.msk.f32.mxu1 %vm33017_vm0, %v36652_v35  ;;  %31725 = vmatprep.subr.mxu0 %v36652_v35 }
 0x416   : > { %31755 = vmatprep.subr.mxu1 %v36652_v35  ;;  %31723 = vmatmul.mubr.f32.vlgmr.msra.gmra.mrb[46].mxu0 %v34978_v34  ;;  %v36911_v34 = vld [vmem:[#allocation104_spill] sm:$0xff] }
 0x417   : > { %31753 = vmatmul.mubr.f32.vlgmr.msra.gmra.mrb[46].mxu1 %v34980_v29  ;;  %31726 = vmatpush3.msra.mxu0 %v36909_v9  ;;  %v36912_v29 = vld [vmem:[#allocation105_spill] sm:$0xff]  ;;  %v36953_v9 = vld [vmem:[#allocation18_spill] sm:$0xff] }
 0x418   : > { %31756 = vmatpush3.msra.mxu1 %v36910_v54  ;;  %31727 = vmatprep.mubr.msk.f32.mxu0 %vm33017_vm0, %v36652_v35  ;;  %v36954_v54 = vld [vmem:[#allocation19_spill] sm:$0xff] }
 0x419   : > { %31757 = vmatprep.mubr.msk.f32.mxu1 %vm33017_vm0, %v36652_v35  ;;  %31730 = vmatprep.subr.mxu0 %v36652_v35 }
 0x41a   : > { %31760 = vmatprep.subr.mxu1 %v36652_v35 }
 0x41e   : > { %31728 = vmatmul.mubr.f32.vlgmr.msra.gmra.mrb[46].mxu0 %v34910_v5 }
 0x41f   : > { %31758 = vmatmul.mubr.f32.vlgmr.msra.gmra.mrb[46].mxu1 %v34912_v17  ;;  %31731 = vmatpush3.msra.mxu0 %v36911_v34  ;;  %v36955_v34 = vld [vmem:[#allocation136_spill] sm:$0xff] }
 0x420   : > { %31761 = vmatpush3.msra.mxu1 %v36912_v29  ;;  %31732 = vmatprep.mubr.msk.f32.mxu0 %vm33017_vm0, %v36652_v35  ;;  %v36956_v29 = vld [vmem:[#allocation137_spill] sm:$0xff] }
 0x421   : > { %31762 = vmatprep.mubr.msk.f32.mxu1 %vm33017_vm0, %v36652_v35  ;;  %31735 = vmatprep.subr.mxu0 %v36652_v35 }
 0x422   : > { %31765 = vmatprep.subr.mxu1 %v36652_v35 }
 0x426   : > { %31733 = vmatmul.mubr.f32.vlgmr.msra.gmra.mrb[46].mxu0 %v34927_v33  ;;  %v36913_v33 = vld [vmem:[#allocation108_spill] sm:$0xff] }
 0x427   : > { %31763 = vmatmul.mubr.f32.vlgmr.msra.gmra.mrb[46].mxu1 %v34930_v7  ;;  %31736 = vmatpush3.msra.mxu0 %v36907_v43  ;;  %v36914_v7 = vld [vmem:[#allocation109_spill] sm:$0xff] }
 0x428   : > { %31766 = vmatpush3.msra.mxu1 %v36908_v44  ;;  %31737 = vmatprep.mubr.msk.f32.mxu0 %vm33017_vm0, %v36652_v35 }
 0x429   : > { %31767 = vmatprep.mubr.msk.f32.mxu1 %vm33017_vm0, %v36652_v35  ;;  %31740 = vmatprep.subr.mxu0 %v36652_v35 }
 0x42a   : > { %31770 = vmatprep.subr.mxu1 %v36652_v35 }
 0x42e   : > { %31738 = vmatmul.mubr.f32.vlgmr.msra.gmra.mrb[46].mxu0 %v34943_v30  ;;  %v36915_v30 = vld [vmem:[#allocation114_spill] sm:$0xff] }
 0x42f   : > { %31768 = vmatmul.mubr.f32.vlgmr.msra.gmra.mrb[46].mxu1 %v34946_v49  ;;  %31741 = vmatpush3.msra.mxu0 %v36913_v33  ;;  %v36916_v49 = vld [vmem:[#allocation115_spill] sm:$0xff]  ;;  %v36957_v33 = vld [vmem:[#allocation22_spill] sm:$0xff] }
 0x430   : > { %31771 = vmatpush3.msra.mxu1 %v36914_v7  ;;  %31742 = vmatprep.mubr.msk.f32.mxu0 %vm33017_vm0, %v36652_v35  ;;  %v36958_v7 = vld [vmem:[#allocation23_spill] sm:$0xff] }
 0x431   : > { %31772 = vmatprep.mubr.msk.f32.mxu1 %vm33017_vm0, %v36652_v35  ;;  %31745 = vmatprep.subr.mxu0 %v36652_v35 }
 0x432   : > { %31775 = vmatprep.subr.mxu1 %v36652_v35 }
 0x436   : > { %31743 = vmatmul.mubr.f32.vlgmr.msra.gmra.mrb[46].mxu0 %v34910_v5 }
 0x437   : > { %31773 = vmatmul.mubr.f32.vlgmr.msra.gmra.mrb[46].mxu1 %v34912_v17  ;;  %31746 = vmatpush3.msra.mxu0 %v36907_v43  ;;  %v36951_v43 = vld [vmem:[#allocation145_spill] sm:$0xff] }
 0x438   : > { %31776 = vmatpush3.msra.mxu1 %v36908_v44  ;;  %31747 = vmatprep.mubr.msk.f32.mxu0 %vm33017_vm0, %v36652_v35  ;;  %v36952_v44 = vld [vmem:[#allocation146_spill] sm:$0xff] }
 0x439   : > { %31777 = vmatprep.mubr.msk.f32.mxu1 %vm33017_vm0, %v36652_v35  ;;  %31780 = vmatprep.subr.mxu0 %v36652_v35 }
 0x43a   : > { %31810 = vmatprep.subr.mxu1 %v36652_v35 }
 0x43e   : > { %31748 = vmatmul.mubr.f32.vlgmr.msra.gmra.mrb[46].mxu0 %v34910_v5  ;;  %v36919_v5 = vld [vmem:[#allocation120_spill] sm:$0xff] }
 0x43f   : > { %31778 = vmatmul.mubr.f32.vlgmr.msra.gmra.mrb[46].mxu1 %v34912_v17  ;;  %31781 = vmatpush3.msra.mxu0 %v36915_v30  ;;  %v36920_v17 = vld [vmem:[#allocation121_spill] sm:$0xff] }
 0x440   : > { %31811 = vmatpush3.msra.mxu1 %v36916_v49  ;;  %31782 = vmatprep.mubr.msk.f32.mxu0 %vm33017_vm0, %v36652_v35 }
 0x441   : > { %31812 = vmatprep.mubr.msk.f32.mxu1 %vm33017_vm0, %v36652_v35  ;;  %31785 = vmatprep.subr.mxu0 %v36652_v35 }
 0x442   : > { %31815 = vmatprep.subr.mxu1 %v36652_v35  ;;  %31783 = vmatmul.mubr.f32.vlgmr.msra.gmra.mrb[32].mxu0 %v36917_v55  ;;  %v36961_v55 = vld [vmem:[#allocation141_spill] sm:$0xff] }
 0x443   : > { %31813 = vmatmul.mubr.f32.vlgmr.msra.gmra.mrb[32].mxu1 %v36918_v56  ;;  %31786 = vmatpush3.msra.mxu0 %v36919_v5  ;;  %v36962_v56 = vld [vmem:[#allocation142_spill] sm:$0xff]  ;;  %v36963_v5 = vld [vmem:[#allocation149_spill] sm:$0xff] }
 0x444   : > { %31816 = vmatpush3.msra.mxu1 %v36920_v17  ;;  %31787 = vmatprep.mubr.msk.f32.mxu0 %vm33017_vm0, %v36652_v35  ;;  %v36964_v17 = vld [vmem:[#allocation150_spill] sm:$0xff] }
 0x445   : > { %31817 = vmatprep.mubr.msk.f32.mxu1 %vm33017_vm0, %v36652_v35  ;;  %31790 = vmatprep.subr.mxu0 %v36652_v35 }
 0x446   : > { %31820 = vmatprep.subr.mxu1 %v36652_v35 }
 0x44a   : > { %31788 = vmatmul.mubr.f32.vlgmr.msra.gmra.mrb[32].mxu0 %v36921_v47 }
 0x44b   : > { %31818 = vmatmul.mubr.f32.vlgmr.msra.gmra.mrb[32].mxu1 %v36922_v3  ;;  %31791 = vmatpush3.msra.mxu0 %v36923_v50  ;;  %v36967_v50 = vld [vmem:[#allocation163_spill] sm:$0xff] }
 0x44c   : > { %31821 = vmatpush3.msra.mxu1 %v36924_v57  ;;  %31792 = vmatprep.mubr.msk.f32.mxu0 %vm33017_vm0, %v36652_v35  ;;  %v36968_v57 = vld [vmem:[#allocation164_spill] sm:$0xff] }
 0x44d   : > { %31822 = vmatprep.mubr.msk.f32.mxu1 %vm33017_vm0, %v36652_v35  ;;  %31795 = vmatprep.subr.mxu0 %v36652_v35 }
 0x44e   : > { %31825 = vmatprep.subr.mxu1 %v36652_v35 }
 0x452   : > { %31793 = vmatmul.mubr.f32.vlgmr.msra.gmra.mrb[32].mxu0 %v36925_v37  ;;  %v36969_v37 = vld [vmem:[#allocation34_spill] sm:$0xff] }
 0x453   : > { %31823 = vmatmul.mubr.f32.vlgmr.msra.gmra.mrb[32].mxu1 %v36926_v23  ;;  %31796 = vmatpush3.msra.mxu0 %v36915_v30  ;;  %v36970_v23 = vld [vmem:[#allocation35_spill] sm:$0xff] }
 0x454   : > { %31826 = vmatpush3.msra.mxu1 %v36916_v49  ;;  %31797 = vmatprep.mubr.msk.f32.mxu0 %vm33017_vm0, %v36652_v35 }
 0x455   : > { %31827 = vmatprep.mubr.msk.f32.mxu1 %vm33017_vm0, %v36652_v35  ;;  %31800 = vmatprep.subr.mxu0 %v36652_v35 }
 0x456   : > { %31830 = vmatprep.subr.mxu1 %v36652_v35 }
 0x45a   : > { %31798 = vmatmul.mubr.f32.vlgmr.msra.gmra.mrb[32].mxu0 %v36927_v59  ;;  %v36971_v59 = vld [vmem:[#allocation153_spill] sm:$0xff] }
 0x45b   : > { %31828 = vmatmul.mubr.f32.vlgmr.msra.gmra.mrb[32].mxu1 %v36928_v42  ;;  %31801 = vmatpush3.msra.mxu0 %v36929_v22  ;;  %v36972_v42 = vld [vmem:[#allocation154_spill] sm:$0xff] }
 0x45c   : > { %31831 = vmatpush3.msra.mxu1 %v36930_v60  ;;  %31802 = vmatprep.mubr.msk.f32.mxu0 %vm33017_vm0, %v36652_v35  ;;  %v36973_v22 = vld [vmem:[#allocation38_spill] sm:$0xff]  ;;  %v36974_v60 = vld [vmem:[#allocation39_spill] sm:$0xff] }
 0x45d   : > { %31832 = vmatprep.mubr.msk.f32.mxu1 %vm33017_vm0, %v36652_v35  ;;  %31805 = vmatprep.subr.mxu0 %v36652_v35 }
 0x45e   : > { %31835 = vmatprep.subr.mxu1 %v36652_v35 }
 0x462   : > { %31803 = vmatmul.mubr.f32.vlgmr.msra.gmra.mrb[32].mxu0 %v36921_v47 }
 0x463   : > { %31833 = vmatmul.mubr.f32.vlgmr.msra.gmra.mrb[32].mxu1 %v36922_v3  ;;  %31806 = vmatpush3.msra.mxu0 %v36915_v30  ;;  %v36959_v30 = vld [vmem:[#allocation26_spill] sm:$0xff] }
 0x464   : > { %31836 = vmatpush3.msra.mxu1 %v36916_v49  ;;  %31807 = vmatprep.mubr.msk.f32.mxu0 %vm33017_vm0, %v36652_v35  ;;  %v36960_v49 = vld [vmem:[#allocation27_spill] sm:$0xff] }
 0x465   : > { %31837 = vmatprep.mubr.msk.f32.mxu1 %vm33017_vm0, %v36652_v35  ;;  %31840 = vmatprep.subr.mxu0 %v36652_v35 }
 0x466   : > { %31870 = vmatprep.subr.mxu1 %v36652_v35 }
 0x46a   : > { %31808 = vmatmul.mubr.f32.vlgmr.msra.gmra.mrb[32].mxu0 %v36921_v47  ;;  %v36965_v47 = vld [vmem:[#allocation46_spill] sm:$0xff] }
 0x46b   : > { %31838 = vmatmul.mubr.f32.vlgmr.msra.gmra.mrb[32].mxu1 %v36922_v3  ;;  %31841 = vmatpush3.msra.mxu0 %v36931_v25  ;;  %v36966_v3 = vld [vmem:[#allocation47_spill] sm:$0xff] }
 0x46c   : > { %31871 = vmatpush3.msra.mxu1 %v36932_v14  ;;  %31842 = vmatprep.mubr.msk.f32.mxu0 %vm33017_vm0, %v36652_v35 }
 0x46d   : > { %31872 = vmatprep.mubr.msk.f32.mxu1 %vm33017_vm0, %v36652_v35  ;;  %31845 = vmatprep.subr.mxu0 %v36652_v35 }
 0x46e   : > { %31875 = vmatprep.subr.mxu1 %v36652_v35  ;;  %31843 = vmatmul.mubr.f32.vlgmr.msra.gmra.mrb[34].mxu0 %v36933_v26  ;;  %v36977_v26 = vld [vmem:[#allocation159_spill] sm:$0xff] }
 0x46f   : > { %31873 = vmatmul.mubr.f32.vlgmr.msra.gmra.mrb[34].mxu1 %v36934_v38  ;;  %31846 = vmatpush3.msra.mxu0 %v36935_v52  ;;  %v36978_v38 = vld [vmem:[#allocation160_spill] sm:$0xff]  ;;  %v36979_v52 = vld [vmem:[#allocation167_spill] sm:$0xff] }
 0x470   : > { %31876 = vmatpush3.msra.mxu1 %v36936_v63  ;;  %31847 = vmatprep.mubr.msk.f32.mxu0 %vm33017_vm0, %v36652_v35  ;;  %v36980_v63 = vld [vmem:[#allocation168_spill] sm:$0xff] }
 0x471   : > { %31877 = vmatprep.mubr.msk.f32.mxu1 %vm33017_vm0, %v36652_v35  ;;  %31850 = vmatprep.subr.mxu0 %v36652_v35 }
 0x472   : > { %31880 = vmatprep.subr.mxu1 %v36652_v35 }
 0x476   : > { %31848 = vmatmul.mubr.f32.vlgmr.msra.gmra.mrb[34].mxu0 %v36937_v62 }
 0x477   : > { %31878 = vmatmul.mubr.f32.vlgmr.msra.gmra.mrb[34].mxu1 %v36938_v41  ;;  %31851 = vmatpush3.msra.mxu0 %v36939_v31  ;;  %v36983_v31 = vld [vmem:[#allocation181_spill] sm:$0xff] }
 0x478   : > { %31881 = vmatpush3.msra.mxu1 %v36940_v53  ;;  %31852 = vmatprep.mubr.msk.f32.mxu0 %vm33017_vm0, %v36652_v35  ;;  %v36984_v53 = vld [vmem:[#allocation182_spill] sm:$0xff] }
 0x479   : > { %31882 = vmatprep.mubr.msk.f32.mxu1 %vm33017_vm0, %v36652_v35  ;;  %31855 = vmatprep.subr.mxu0 %v36652_v35 }
 0x47a   : > { %31885 = vmatprep.subr.mxu1 %v36652_v35 }
 0x47e   : > { %31853 = vmatmul.mubr.f32.vlgmr.msra.gmra.mrb[34].mxu0 %v36941_v8  ;;  %v36985_v8 = vld [vmem:[#allocation50_spill] sm:$0xff] }
 0x47f   : > { %31883 = vmatmul.mubr.f32.vlgmr.msra.gmra.mrb[34].mxu1 %v36942_v58  ;;  %31856 = vmatpush3.msra.mxu0 %v36931_v25  ;;  %v36986_v58 = vld [vmem:[#allocation51_spill] sm:$0xff] }
 0x480   : > { %31886 = vmatpush3.msra.mxu1 %v36932_v14  ;;  %31857 = vmatprep.mubr.msk.f32.mxu0 %vm33017_vm0, %v36652_v35 }
 0x481   : > { %31887 = vmatprep.mubr.msk.f32.mxu1 %vm33017_vm0, %v36652_v35  ;;  %31860 = vmatprep.subr.mxu0 %v36652_v35 }
 0x482   : > { %31890 = vmatprep.subr.mxu1 %v36652_v35 }
 0x486   : > { %31858 = vmatmul.mubr.f32.vlgmr.msra.gmra.mrb[34].mxu0 %v36943_v15  ;;  %v36987_v15 = vld [vmem:[#allocation171_spill] sm:$0xff] }
 0x487   : > { %31888 = vmatmul.mubr.f32.vlgmr.msra.gmra.mrb[34].mxu1 %v36944_v16  ;;  %31861 = vmatpush3.msra.mxu0 %v36945_v18  ;;  %v36988_v16 = vld [vmem:[#allocation172_spill] sm:$0xff]  ;;  %v36989_v18 = vld [vmem:[#allocation54_spill] sm:$0xff] }
 0x488   : > { %31891 = vmatpush3.msra.mxu1 %v36946_v27  ;;  %31862 = vmatprep.mubr.msk.f32.mxu0 %vm33017_vm0, %v36652_v35  ;;  %v36990_v27 = vld [vmem:[#allocation55_spill] sm:$0xff] }
 0x489   : > { %31892 = vmatprep.mubr.msk.f32.mxu1 %vm33017_vm0, %v36652_v35  ;;  %31865 = vmatprep.subr.mxu0 %v36652_v35 }
 0x48a   : > { %31895 = vmatprep.subr.mxu1 %v36652_v35 }
 0x48e   : > { %31863 = vmatmul.mubr.f32.vlgmr.msra.gmra.mrb[34].mxu0 %v36937_v62 }
 0x48f   : > { %31893 = vmatmul.mubr.f32.vlgmr.msra.gmra.mrb[34].mxu1 %v36938_v41  ;;  %31866 = vmatpush3.msra.mxu0 %v36931_v25  ;;  %v36975_v25 = vld [vmem:[#allocation42_spill] sm:$0xff] }
 0x490   : > { %31896 = vmatpush3.msra.mxu1 %v36932_v14  ;;  %31867 = vmatprep.mubr.msk.f32.mxu0 %vm33017_vm0, %v36652_v35  ;;  %v36976_v14 = vld [vmem:[#allocation43_spill] sm:$0xff] }
 0x491   : > { %31897 = vmatprep.mubr.msk.f32.mxu1 %vm33017_vm0, %v36652_v35  ;;  %31900 = vmatprep.subr.mxu0 %v36652_v35 }
 0x492   : > { %31930 = vmatprep.subr.mxu1 %v36652_v35 }
 0x496   : > { %31868 = vmatmul.mubr.f32.vlgmr.msra.gmra.mrb[34].mxu0 %v36937_v62  ;;  %v36981_v62 = vld [vmem:[#allocation62_spill] sm:$0xff] }
 0x497   : > { %31898 = vmatmul.mubr.f32.vlgmr.msra.gmra.mrb[34].mxu1 %v36938_v41  ;;  %31901 = vmatpush3.msra.mxu0 %v36947_v28  ;;  %v36982_v41 = vld [vmem:[#allocation63_spill] sm:$0xff] }
 0x498   : > { %31931 = vmatpush3.msra.mxu1 %v36948_v19  ;;  %31902 = vmatprep.mubr.msk.f32.mxu0 %vm33017_vm0, %v36652_v35 }
 0x499   : > { %31932 = vmatprep.mubr.msk.f32.mxu1 %vm33017_vm0, %v36652_v35  ;;  %31905 = vmatprep.subr.mxu0 %v36652_v35 }
 0x49a   : > { %31935 = vmatprep.subr.mxu1 %v36652_v35  ;;  %31903 = vmatmul.mubr.f32.vlgmr.msra.gmra.mrb[36].mxu0 %v36949_v11  ;;  %v36993_v11 = vld [vmem:[#allocation177_spill] sm:$0xff] }
 0x49b   : > { %31933 = vmatmul.mubr.f32.vlgmr.msra.gmra.mrb[36].mxu1 %v36950_v12  ;;  %31906 = vmatpush3.msra.mxu0 %v36951_v43  ;;  %v36994_v12 = vld [vmem:[#allocation178_spill] sm:$0xff]  ;;  %v36995_v43 = vld [vmem:[#allocation184_spill] sm:$0xff] }
 0x49c   : > { %31936 = vmatpush3.msra.mxu1 %v36952_v44  ;;  %31907 = vmatprep.mubr.msk.f32.mxu0 %vm33017_vm0, %v36652_v35  ;;  %v36996_v44 = vld [vmem:[#allocation185_spill] sm:$0xff] }
 0x49d   : > { %31937 = vmatprep.mubr.msk.f32.mxu1 %vm33017_vm0, %v36652_v35  ;;  %31910 = vmatprep.subr.mxu0 %v36652_v35 }
 0x49e   : > { %31940 = vmatprep.subr.mxu1 %v36652_v35 }
 0x4a2   : > { %31908 = vmatmul.mubr.f32.vlgmr.msra.gmra.mrb[36].mxu0 %v36953_v9 }
 0x4a3   : > { %31938 = vmatmul.mubr.f32.vlgmr.msra.gmra.mrb[36].mxu1 %v36954_v54  ;;  %31911 = vmatpush3.msra.mxu0 %v36955_v34  ;;  %v36999_v34 = vld [vmem:[#allocation198_spill] sm:$0xff] }
 0x4a4   : > { %31941 = vmatpush3.msra.mxu1 %v36956_v29  ;;  %31912 = vmatprep.mubr.msk.f32.mxu0 %vm33017_vm0, %v36652_v35  ;;  %v37000_v29 = vld [vmem:[#allocation199_spill] sm:$0xff] }
 0x4a5   : > { %31942 = vmatprep.mubr.msk.f32.mxu1 %vm33017_vm0, %v36652_v35  ;;  %31915 = vmatprep.subr.mxu0 %v36652_v35 }
 0x4a6   : > { %31945 = vmatprep.subr.mxu1 %v36652_v35 }
 0x4aa   : > { %31913 = vmatmul.mubr.f32.vlgmr.msra.gmra.mrb[36].mxu0 %v36957_v33  ;;  %v37001_v33 = vld [vmem:[#allocation66_spill] sm:$0xff] }
 0x4ab   : > { %31943 = vmatmul.mubr.f32.vlgmr.msra.gmra.mrb[36].mxu1 %v36958_v7  ;;  %31916 = vmatpush3.msra.mxu0 %v36947_v28  ;;  %v37002_v7 = vld [vmem:[#allocation67_spill] sm:$0xff] }
 0x4ac   : > { %31946 = vmatpush3.msra.mxu1 %v36948_v19  ;;  %31917 = vmatprep.mubr.msk.f32.mxu0 %vm33017_vm0, %v36652_v35 }
 0x4ad   : > { %31947 = vmatprep.mubr.msk.f32.mxu1 %vm33017_vm0, %v36652_v35  ;;  %31920 = vmatprep.subr.mxu0 %v36652_v35 }
 0x4ae   : > { %31950 = vmatprep.subr.mxu1 %v36652_v35 }
 0x4b2   : > { %31918 = vmatmul.mubr.f32.vlgmr.msra.gmra.mrb[36].mxu0 %v36959_v30  ;;  %v37003_v30 = vld [vmem:[#allocation188_spill] sm:$0xff] }
 0x4b3   : > { %31948 = vmatmul.mubr.f32.vlgmr.msra.gmra.mrb[36].mxu1 %v36960_v49  ;;  %31921 = vmatpush3.msra.mxu0 %v36961_v55  ;;  %v37004_v49 = vld [vmem:[#allocation189_spill] sm:$0xff]  ;;  %v37005_v55 = vld [vmem:[#allocation70_spill] sm:$0xff] }
 0x4b4   : > { %31951 = vmatpush3.msra.mxu1 %v36962_v56  ;;  %31922 = vmatprep.mubr.msk.f32.mxu0 %vm33017_vm0, %v36652_v35  ;;  %v37006_v56 = vld [vmem:[#allocation71_spill] sm:$0xff] }
 0x4b5   : > { %31952 = vmatprep.mubr.msk.f32.mxu1 %vm33017_vm0, %v36652_v35  ;;  %31925 = vmatprep.subr.mxu0 %v36652_v35 }
 0x4b6   : > { %31955 = vmatprep.subr.mxu1 %v36652_v35 }
 0x4ba   : > { %31923 = vmatmul.mubr.f32.vlgmr.msra.gmra.mrb[36].mxu0 %v36953_v9 }
 0x4bb   : > { %31953 = vmatmul.mubr.f32.vlgmr.msra.gmra.mrb[36].mxu1 %v36954_v54  ;;  %31926 = vmatpush3.msra.mxu0 %v36947_v28  ;;  %v36991_v28 = vld [vmem:[#allocation58_spill] sm:$0xff] }
 0x4bc   : > { %31956 = vmatpush3.msra.mxu1 %v36948_v19  ;;  %31927 = vmatprep.mubr.msk.f32.mxu0 %vm33017_vm0, %v36652_v35  ;;  %v36992_v19 = vld [vmem:[#allocation59_spill] sm:$0xff] }
 0x4bd   : > { %31957 = vmatprep.mubr.msk.f32.mxu1 %vm33017_vm0, %v36652_v35  ;;  %31960 = vmatprep.subr.mxu0 %v36652_v35 }
 0x4be   : > { %31990 = vmatprep.subr.mxu1 %v36652_v35 }
 0x4c2   : > { %31928 = vmatmul.mubr.f32.vlgmr.msra.gmra.mrb[36].mxu0 %v36953_v9  ;;  %v36997_v9 = vld [vmem:[#allocation78_spill] sm:$0xff] }
 0x4c3   : > { %31958 = vmatmul.mubr.f32.vlgmr.msra.gmra.mrb[36].mxu1 %v36954_v54  ;;  %31961 = vmatpush3.msra.mxu0 %v36963_v5  ;;  %v36998_v54 = vld [vmem:[#allocation79_spill] sm:$0xff] }
 0x4c4   : > { %31991 = vmatpush3.msra.mxu1 %v36964_v17  ;;  %31962 = vmatprep.mubr.msk.f32.mxu0 %vm33017_vm0, %v36652_v35 }
 0x4c5   : > { %31992 = vmatprep.mubr.msk.f32.mxu1 %vm33017_vm0, %v36652_v35  ;;  %31965 = vmatprep.subr.mxu0 %v36652_v35 }
 0x4c6   : > { %31995 = vmatprep.subr.mxu1 %v36652_v35  ;;  %31963 = vmatmul.mubr.f32.vlgmr.msra.gmra.mrb[38].mxu0 %v36965_v47  ;;  %v37009_v47 = vld [vmem:[#allocation194_spill] sm:$0xff] }
 0x4c7   : > { %31993 = vmatmul.mubr.f32.vlgmr.msra.gmra.mrb[38].mxu1 %v36966_v3  ;;  %31966 = vmatpush3.msra.mxu0 %v36967_v50  ;;  %v37010_v3 = vld [vmem:[#allocation195_spill] sm:$0xff] }
 0x4c8   : > { %31996 = vmatpush3.msra.mxu1 %v36968_v57  ;;  %31967 = vmatprep.mubr.msk.f32.mxu0 %vm33017_vm0, %v36652_v35 }
 0x4c9   : > { %31997 = vmatprep.mubr.msk.f32.mxu1 %vm33017_vm0, %v36652_v35  ;;  %31970 = vmatprep.subr.mxu0 %v36652_v35 }
 0x4ca   : > { %32000 = vmatprep.subr.mxu1 %v36652_v35 }
 0x4ce   : > { %31968 = vmatmul.mubr.f32.vlgmr.msra.gmra.mrb[38].mxu0 %v36969_v37 }
 0x4cf   : > { %31998 = vmatmul.mubr.f32.vlgmr.msra.gmra.mrb[38].mxu1 %v36970_v23  ;;  %31971 = vmatpush3.msra.mxu0 %v36971_v59 }
 0x4d0   : > { %32001 = vmatpush3.msra.mxu1 %v36972_v42  ;;  %31972 = vmatprep.mubr.msk.f32.mxu0 %vm33017_vm0, %v36652_v35 }
 0x4d1   : > { %32002 = vmatprep.mubr.msk.f32.mxu1 %vm33017_vm0, %v36652_v35  ;;  %31975 = vmatprep.subr.mxu0 %v36652_v35 }
 0x4d2   : > { %32005 = vmatprep.subr.mxu1 %v36652_v35 }
 0x4d6   : > { %31973 = vmatmul.mubr.f32.vlgmr.msra.gmra.mrb[38].mxu0 %v36973_v22  ;;  %v37011_v22 = vld [vmem:[#allocation94_spill] sm:$0xff] }
 0x4d7   : > { %32003 = vmatmul.mubr.f32.vlgmr.msra.gmra.mrb[38].mxu1 %v36974_v60  ;;  %31976 = vmatpush3.msra.mxu0 %v36963_v5  ;;  %v37012_v60 = vld [vmem:[#allocation95_spill] sm:$0xff] }
 0x4d8   : > { %32006 = vmatpush3.msra.mxu1 %v36964_v17  ;;  %31977 = vmatprep.mubr.msk.f32.mxu0 %vm33017_vm0, %v36652_v35 }
 0x4d9   : > { %32007 = vmatprep.mubr.msk.f32.mxu1 %vm33017_vm0, %v36652_v35  ;;  %31980 = vmatprep.subr.mxu0 %v36652_v35 }
 0x4da   : > { %32010 = vmatprep.subr.mxu1 %v36652_v35 }
 0x4de   : > { %31978 = vmatmul.mubr.f32.vlgmr.msra.gmra.mrb[38].mxu0 %v36975_v25  ;;  %v37013_v25 = vld [vmem:[#allocation212_spill] sm:$0xff] }
 0x4df   : > { %32008 = vmatmul.mubr.f32.vlgmr.msra.gmra.mrb[38].mxu1 %v36976_v14  ;;  %31981 = vmatpush3.msra.mxu0 %v36977_v26  ;;  %v37014_v14 = vld [vmem:[#allocation213_spill] sm:$0xff]  ;;  %v37015_v26 = vld [vmem:[#allocation82_spill] sm:$0xff] }
 0x4e0   : > { %32011 = vmatpush3.msra.mxu1 %v36978_v38  ;;  %31982 = vmatprep.mubr.msk.f32.mxu0 %vm33017_vm0, %v36652_v35  ;;  %v37016_v38 = vld [vmem:[#allocation83_spill] sm:$0xff] }
 0x4e1   : > { %32012 = vmatprep.mubr.msk.f32.mxu1 %vm33017_vm0, %v36652_v35  ;;  %31985 = vmatprep.subr.mxu0 %v36652_v35 }
 0x4e2   : > { %32015 = vmatprep.subr.mxu1 %v36652_v35 }
 0x4e6   : > { %31983 = vmatmul.mubr.f32.vlgmr.msra.gmra.mrb[38].mxu0 %v36969_v37 }
 0x4e7   : > { %32013 = vmatmul.mubr.f32.vlgmr.msra.gmra.mrb[38].mxu1 %v36970_v23  ;;  %31986 = vmatpush3.msra.mxu0 %v36963_v5  ;;  %v37007_v5 = vld [vmem:[#allocation74_spill] sm:$0xff] }
 0x4e8   : > { %32016 = vmatpush3.msra.mxu1 %v36964_v17  ;;  %31987 = vmatprep.mubr.msk.f32.mxu0 %vm33017_vm0, %v36652_v35  ;;  %v37008_v17 = vld [vmem:[#allocation75_spill] sm:$0xff] }
 0x4e9   : > { %32017 = vmatprep.mubr.msk.f32.mxu1 %vm33017_vm0, %v36652_v35  ;;  %32020 = vmatprep.subr.mxu0 %v36652_v35 }
 0x4ea   : > { %32050 = vmatprep.subr.mxu1 %v36652_v35 }
 0x4ee   : > { %31988 = vmatmul.mubr.f32.vlgmr.msra.gmra.mrb[38].mxu0 %v36969_v37 }
 0x4ef   : > { %32018 = vmatmul.mubr.f32.vlgmr.msra.gmra.mrb[38].mxu1 %v36970_v23  ;;  %32021 = vmatpush3.msra.mxu0 %v36979_v52 }
 0x4f0   : > { %32051 = vmatpush3.msra.mxu1 %v36980_v63  ;;  %32022 = vmatprep.mubr.msk.f32.mxu0 %vm33017_vm0, %v36652_v35 }
 0x4f1   : > { %32052 = vmatprep.mubr.msk.f32.mxu1 %vm33017_vm0, %v36652_v35  ;;  %32025 = vmatprep.subr.mxu0 %v36652_v35 }
 0x4f2   : > { %32055 = vmatprep.subr.mxu1 %v36652_v35  ;;  %32023 = vmatmul.mubr.f32.vlgmr.msra.gmra.mrb[40].mxu0 %v36981_v62  ;;  %v37019_v62 = vld [vmem:[#allocation86_spill] sm:$0xff] }
 0x4f3   : > { %32053 = vmatmul.mubr.f32.vlgmr.msra.gmra.mrb[40].mxu1 %v36982_v41  ;;  %32026 = vmatpush3.msra.mxu0 %v36983_v31  ;;  %v37020_v41 = vld [vmem:[#allocation87_spill] sm:$0xff]  ;;  %v37021_v31 = vld [vmem:[#allocation90_spill] sm:$0xff] }
 0x4f4   : > { %32056 = vmatpush3.msra.mxu1 %v36984_v53  ;;  %32027 = vmatprep.mubr.msk.f32.mxu0 %vm33017_vm0, %v36652_v35  ;;  %v37022_v53 = vld [vmem:[#allocation91_spill] sm:$0xff] }
 0x4f5   : > { %32057 = vmatprep.mubr.msk.f32.mxu1 %vm33017_vm0, %v36652_v35  ;;  %32030 = vmatprep.subr.mxu0 %v36652_v35 }
 0x4f6   : > { %32060 = vmatprep.subr.mxu1 %v36652_v35 }
 0x4fa   : > { %32028 = vmatmul.mubr.f32.vlgmr.msra.gmra.mrb[40].mxu0 %v36985_v8 }
 0x4fb   : > { %32058 = vmatmul.mubr.f32.vlgmr.msra.gmra.mrb[40].mxu1 %v36986_v58  ;;  %32031 = vmatpush3.msra.mxu0 %v36987_v15 }
 0x4fc   : > { %32061 = vmatpush3.msra.mxu1 %v36988_v16  ;;  %32032 = vmatprep.mubr.msk.f32.mxu0 %vm33017_vm0, %v36652_v35 }
 0x4fd   : > { %32062 = vmatprep.mubr.msk.f32.mxu1 %vm33017_vm0, %v36652_v35  ;;  %32035 = vmatprep.subr.mxu0 %v36652_v35 }
 0x4fe   : > { %32065 = vmatprep.subr.mxu1 %v36652_v35 }
 0x502   : > { %32033 = vmatmul.mubr.f32.vlgmr.msra.gmra.mrb[40].mxu0 %v36989_v18 }
 0x503   : > { %32063 = vmatmul.mubr.f32.vlgmr.msra.gmra.mrb[40].mxu1 %v36990_v27  ;;  %32036 = vmatpush3.msra.mxu0 %v36979_v52 }
 0x504   : > { %32066 = vmatpush3.msra.mxu1 %v36980_v63  ;;  %32037 = vmatprep.mubr.msk.f32.mxu0 %vm33017_vm0, %v36652_v35 }
 0x505   : > { %32067 = vmatprep.mubr.msk.f32.mxu1 %vm33017_vm0, %v36652_v35  ;;  %32040 = vmatprep.subr.mxu0 %v36652_v35 }
 0x506   : > { %32070 = vmatprep.subr.mxu1 %v36652_v35 }
 0x50a   : > { %32038 = vmatmul.mubr.f32.vlgmr.msra.gmra.mrb[40].mxu0 %v36991_v28 }
 0x50b   : > { %32068 = vmatmul.mubr.f32.vlgmr.msra.gmra.mrb[40].mxu1 %v36992_v19  ;;  %32041 = vmatpush3.msra.mxu0 %v36993_v11  ;;  %v37027_v11 = vld [vmem:[#allocation98_spill] sm:$0xff] }
 0x50c   : > { %32071 = vmatpush3.msra.mxu1 %v36994_v12  ;;  %32042 = vmatprep.mubr.msk.f32.mxu0 %vm33017_vm0, %v36652_v35  ;;  %v37028_v12 = vld [vmem:[#allocation99_spill] sm:$0xff] }
 0x50d   : > { %32072 = vmatprep.mubr.msk.f32.mxu1 %vm33017_vm0, %v36652_v35  ;;  %32045 = vmatprep.subr.mxu0 %v36652_v35 }
 0x50e   : > { %32075 = vmatprep.subr.mxu1 %v36652_v35 }
 0x512   : > { %32043 = vmatmul.mubr.f32.vlgmr.msra.gmra.mrb[40].mxu0 %v36985_v8 }
 0x513   : > { %32073 = vmatmul.mubr.f32.vlgmr.msra.gmra.mrb[40].mxu1 %v36986_v58  ;;  %32046 = vmatpush3.msra.mxu0 %v36979_v52  ;;  %v37017_v52 = vld [vmem:[#allocation202_spill] sm:$0xff] }
 0x514   : > { %32076 = vmatpush3.msra.mxu1 %v36980_v63  ;;  %32047 = vmatprep.mubr.msk.f32.mxu0 %vm33017_vm0, %v36652_v35  ;;  %v37018_v63 = vld [vmem:[#allocation203_spill] sm:$0xff] }
 0x515   : > { %32077 = vmatprep.mubr.msk.f32.mxu1 %vm33017_vm0, %v36652_v35  ;;  %32080 = vmatprep.subr.mxu0 %v36652_v35 }
 0x516   : > { %32110 = vmatprep.subr.mxu1 %v36652_v35 }
 0x51a   : > { %32048 = vmatmul.mubr.f32.vlgmr.msra.gmra.mrb[40].mxu0 %v36985_v8  ;;  %v37023_v8 = vld [vmem:[#allocation206_spill] sm:$0xff] }
 0x51b   : > { %32078 = vmatmul.mubr.f32.vlgmr.msra.gmra.mrb[40].mxu1 %v36986_v58  ;;  %32081 = vmatpush3.msra.mxu0 %v36995_v43  ;;  %v37024_v58 = vld [vmem:[#allocation207_spill] sm:$0xff] }
 0x51c   : > { %32111 = vmatpush3.msra.mxu1 %v36996_v44  ;;  %32082 = vmatprep.mubr.msk.f32.mxu0 %vm33017_vm0, %v36652_v35 }
 0x51d   : > { %32112 = vmatprep.mubr.msk.f32.mxu1 %vm33017_vm0, %v36652_v35  ;;  %32085 = vmatprep.subr.mxu0 %v36652_v35 }
 0x51e   : > { %32115 = vmatprep.subr.mxu1 %v36652_v35  ;;  %32083 = vmatmul.mubr.f32.vlgmr.msra.gmra.mrb[42].mxu0 %v36997_v9  ;;  %v37033_v9 = vld [vmem:[#allocation106_spill] sm:$0xff] }
 0x51f   : > { %32113 = vmatmul.mubr.f32.vlgmr.msra.gmra.mrb[42].mxu1 %v36998_v54  ;;  %32086 = vmatpush3.msra.mxu0 %v36999_v34  ;;  %v37034_v54 = vld [vmem:[#allocation107_spill] sm:$0xff]  ;;  %v37035_v34 = vld [vmem:[#allocation216_spill] sm:$0xff] }
 0x520   : > { %32116 = vmatpush3.msra.mxu1 %v37000_v29  ;;  %32087 = vmatprep.mubr.msk.f32.mxu0 %vm33017_vm0, %v36652_v35  ;;  %v37036_v29 = vld [vmem:[#allocation217_spill] sm:$0xff] }
 0x521   : > { %32117 = vmatprep.mubr.msk.f32.mxu1 %vm33017_vm0, %v36652_v35  ;;  %32090 = vmatprep.subr.mxu0 %v36652_v35 }
 0x522   : > { %32120 = vmatprep.subr.mxu1 %v36652_v35 }
 0x526   : > { %32088 = vmatmul.mubr.f32.vlgmr.msra.gmra.mrb[42].mxu0 %v37001_v33 }
 0x527   : > { %32118 = vmatmul.mubr.f32.vlgmr.msra.gmra.mrb[42].mxu1 %v37002_v7  ;;  %32091 = vmatpush3.msra.mxu0 %v37003_v30 }
 0x528   : > { %32121 = vmatpush3.msra.mxu1 %v37004_v49  ;;  %32092 = vmatprep.mubr.msk.f32.mxu0 %vm33017_vm0, %v36652_v35 }
 0x529   : > { %32122 = vmatprep.mubr.msk.f32.mxu1 %vm33017_vm0, %v36652_v35  ;;  %32095 = vmatprep.subr.mxu0 %v36652_v35 }
 0x52a   : > { %32125 = vmatprep.subr.mxu1 %v36652_v35 }
 0x52e   : > { %32093 = vmatmul.mubr.f32.vlgmr.msra.gmra.mrb[42].mxu0 %v37005_v55 }
 0x52f   : > { %32123 = vmatmul.mubr.f32.vlgmr.msra.gmra.mrb[42].mxu1 %v37006_v56  ;;  %32096 = vmatpush3.msra.mxu0 %v36995_v43 }
 0x530   : > { %32126 = vmatpush3.msra.mxu1 %v36996_v44  ;;  %32097 = vmatprep.mubr.msk.f32.mxu0 %vm33017_vm0, %v36652_v35 }
 0x531   : > { %32127 = vmatprep.mubr.msk.f32.mxu1 %vm33017_vm0, %v36652_v35  ;;  %32100 = vmatprep.subr.mxu0 %v36652_v35 }
 0x532   : > { %32130 = vmatprep.subr.mxu1 %v36652_v35 }
 0x536   : > { %32098 = vmatmul.mubr.f32.vlgmr.msra.gmra.mrb[42].mxu0 %v37007_v5 }
 0x537   : > { %32128 = vmatmul.mubr.f32.vlgmr.msra.gmra.mrb[42].mxu1 %v37008_v17  ;;  %32101 = vmatpush3.msra.mxu0 %v37009_v47 }
 0x538   : > { %32131 = vmatpush3.msra.mxu1 %v37010_v3  ;;  %32102 = vmatprep.mubr.msk.f32.mxu0 %vm33017_vm0, %v36652_v35 }
 0x539   : > { %32132 = vmatprep.mubr.msk.f32.mxu1 %vm33017_vm0, %v36652_v35  ;;  %32105 = vmatprep.subr.mxu0 %v36652_v35 }
 0x53a   : > { %32135 = vmatprep.subr.mxu1 %v36652_v35 }
 0x53d   : > { %v22538_v50 = vpop.f32.mrb[32].mxu0 }
 0x53e   : > { %v22984_v57 = vpop.f32.mrb[32].mxu1  ;;  %v35923_v37 = vmul.f32 %v22538_v50, %v34812_v0  ;;  %v31809_v59 = vpop.f32.mrb[33].mxu0  ;;  %32103 = vmatmul.mubr.f32.vlgmr.msra.gmra.mrb[42].mxu0 %v37001_v33 }
 0x53f   : > { %v35926_v23 = vmul.f32 %v22984_v57, %v34812_v0  ;;  %v31839_v42 = vpop.f32.mrb[33].mxu1  ;;  %32133 = vmatmul.mubr.f32.vlgmr.msra.gmra.mrb[42].mxu1 %v37002_v7  ;;  %32106 = vmatpush3.msra.mxu0 %v36995_v43  ;;  %v37029_v43 = vld [vmem:[#allocation214_spill] sm:$0xff] }
 0x540   : > { %32136 = vmatpush3.msra.mxu1 %v36996_v44  ;;  %32107 = vmatprep.mubr.msk.f32.mxu0 %vm33017_vm0, %v36652_v35  ;;  %v37030_v44 = vld [vmem:[#allocation215_spill] sm:$0xff]  ;;  %29269 = vst.msk [vmem:[%s33129_s22] sm:$0x3] (!%p29568_p7), %vm29252_vm3, %v35923_v37 }
 0x541   : > { %32137 = vmatprep.mubr.msk.f32.mxu1 %vm33017_vm0, %v36652_v35  ;;  %32140 = vmatprep.subr.mxu0 %v36652_v35  ;;  %29270 = vst.msk [vmem:[%s33129_s22 + $0x2] sm:$0x3] (!%p29568_p7), %vm29252_vm3, %v35926_v23 }
 0x542   : > { %32170 = vmatprep.subr.mxu1 %v36652_v35 }
 0x546   : > { %32108 = vmatmul.mubr.f32.vlgmr.msra.gmra.mrb[42].mxu0 %v37001_v33 }
 0x547   : > { %32138 = vmatmul.mubr.f32.vlgmr.msra.gmra.mrb[42].mxu1 %v37002_v7  ;;  %32141 = vmatpush3.msra.mxu0 %v34790_v4 }
 0x548   : > { %32171 = vmatpush3.msra.mxu1 %v34792_v6  ;;  %32142 = vmatprep.mubr.msk.f32.mxu0 %vm33017_vm0, %v36652_v35 }
 0x549   : > { %32172 = vmatprep.mubr.msk.f32.mxu1 %vm33017_vm0, %v36652_v35  ;;  %32145 = vmatprep.subr.mxu0 %v36652_v35 }
 0x54a   : > { %32175 = vmatprep.subr.mxu1 %v36652_v35  ;;  %32143 = vmatmul.mubr.f32.vlgmr.msra.gmra.mrb[44].mxu0 %v37011_v22 }
 0x54b   : > { %32173 = vmatmul.mubr.f32.vlgmr.msra.gmra.mrb[44].mxu1 %v37012_v60  ;;  %32146 = vmatpush3.msra.mxu0 %v37013_v25 }
 0x54c   : > { %32176 = vmatpush3.msra.mxu1 %v37014_v14  ;;  %32147 = vmatprep.mubr.msk.f32.mxu0 %vm33017_vm0, %v36652_v35 }
 0x54d   : > { %32177 = vmatprep.mubr.msk.f32.mxu1 %vm33017_vm0, %v36652_v35  ;;  %32150 = vmatprep.subr.mxu0 %v36652_v35 }
 0x54e   : > { %32180 = vmatprep.subr.mxu1 %v36652_v35 }
 0x552   : > { %32148 = vmatmul.mubr.f32.vlgmr.msra.gmra.mrb[44].mxu0 %v37015_v26 }
 0x553   : > { %32178 = vmatmul.mubr.f32.vlgmr.msra.gmra.mrb[44].mxu1 %v37016_v38  ;;  %32151 = vmatpush3.msra.mxu0 %v37017_v52 }
 0x554   : > { %32181 = vmatpush3.msra.mxu1 %v37018_v63  ;;  %32152 = vmatprep.mubr.msk.f32.mxu0 %vm33017_vm0, %v36652_v35 }
 0x555   : > { %32182 = vmatprep.mubr.msk.f32.mxu1 %vm33017_vm0, %v36652_v35  ;;  %32155 = vmatprep.subr.mxu0 %v36652_v35 }
 0x556   : > { %32185 = vmatprep.subr.mxu1 %v36652_v35 }
 0x55a   : > { %32153 = vmatmul.mubr.f32.vlgmr.msra.gmra.mrb[44].mxu0 %v37019_v62 }
 0x55b   : > { %32183 = vmatmul.mubr.f32.vlgmr.msra.gmra.mrb[44].mxu1 %v37020_v41  ;;  %32156 = vmatpush3.msra.mxu0 %v34790_v4 }
 0x55c   : > { %32186 = vmatpush3.msra.mxu1 %v34792_v6  ;;  %32157 = vmatprep.mubr.msk.f32.mxu0 %vm33017_vm0, %v36652_v35 }
 0x55d   : > { %32187 = vmatprep.mubr.msk.f32.mxu1 %vm33017_vm0, %v36652_v35  ;;  %32160 = vmatprep.subr.mxu0 %v36652_v35 }
 0x55e   : > { %32190 = vmatprep.subr.mxu1 %v36652_v35 }
 0x562   : > { %32158 = vmatmul.mubr.f32.vlgmr.msra.gmra.mrb[44].mxu0 %v37021_v31 }
 0x563   : > { %32188 = vmatmul.mubr.f32.vlgmr.msra.gmra.mrb[44].mxu1 %v37022_v53  ;;  %32161 = vmatpush3.msra.mxu0 %v37023_v8 }
 0x564   : > { %32191 = vmatpush3.msra.mxu1 %v37024_v58  ;;  %32162 = vmatprep.mubr.msk.f32.mxu0 %vm33017_vm0, %v36652_v35 }
 0x565   : > { %32192 = vmatprep.mubr.msk.f32.mxu1 %vm33017_vm0, %v36652_v35  ;;  %32165 = vmatprep.subr.mxu0 %v36652_v35 }
 0x566   : > { %32195 = vmatprep.subr.mxu1 %v36652_v35 }
 0x569   : > { %v23430_v15 = vpop.f32.mrb[34].mxu0 }
 0x56a   : > { %v23876_v16 = vpop.f32.mrb[34].mxu1  ;;  %v35989_v18 = vmul.f32 %v23430_v15, %v34812_v0  ;;  %v31869_v28 = vpop.f32.mrb[35].mxu0  ;;  %32163 = vmatmul.mubr.f32.vlgmr.msra.gmra.mrb[44].mxu0 %v37015_v26 }
 0x56b   : > { %v35992_v27 = vmul.f32 %v23876_v16, %v34812_v0  ;;  %v31899_v19 = vpop.f32.mrb[35].mxu1  ;;  %32193 = vmatmul.mubr.f32.vlgmr.msra.gmra.mrb[44].mxu1 %v37016_v38  ;;  %32166 = vmatpush3.msra.mxu0 %v34790_v4  ;;  %v37025_v4 = vld [vmem:[#allocation110_spill] sm:$0xff] }
 0x56c   : > { %32196 = vmatpush3.msra.mxu1 %v34792_v6  ;;  %32167 = vmatprep.mubr.msk.f32.mxu0 %vm33017_vm0, %v36652_v35  ;;  %v37026_v6 = vld [vmem:[#allocation111_spill] sm:$0xff]  ;;  %29271 = vst.msk [vmem:[%s33129_s22 + $0x4] sm:$0x3] (!%p29568_p7), %vm29252_vm3, %v35989_v18 }
 0x56d   : > { %32197 = vmatprep.mubr.msk.f32.mxu1 %vm33017_vm0, %v36652_v35  ;;  %32200 = vmatprep.subr.mxu0 %v36652_v35  ;;  %29272 = vst.msk [vmem:[%s33129_s22 + $0x6] sm:$0x3] (!%p29568_p7), %vm29252_vm3, %v35992_v27 }
 0x56e   : > { %32230 = vmatprep.subr.mxu1 %v36652_v35 }
 0x572   : > { %32168 = vmatmul.mubr.f32.vlgmr.msra.gmra.mrb[44].mxu0 %v37015_v26 }
 0x573   : > { %32198 = vmatmul.mubr.f32.vlgmr.msra.gmra.mrb[44].mxu1 %v37016_v38  ;;  %32201 = vmatpush3.msra.mxu0 %v34916_v1 }
 0x574   : > { %32231 = vmatpush3.msra.mxu1 %v34918_v36  ;;  %32202 = vmatprep.mubr.msk.f32.mxu0 %vm33017_vm0, %v36652_v35 }
 0x575   : > { %32232 = vmatprep.mubr.msk.f32.mxu1 %vm33017_vm0, %v36652_v35  ;;  %32205 = vmatprep.subr.mxu0 %v36652_v35 }
 0x576   : > { %32235 = vmatprep.subr.mxu1 %v36652_v35  ;;  %32203 = vmatmul.mubr.f32.vlgmr.msra.gmra.mrb[46].mxu0 %v37025_v4 }
 0x577   : > { %32233 = vmatmul.mubr.f32.vlgmr.msra.gmra.mrb[46].mxu1 %v37026_v6  ;;  %32206 = vmatpush3.msra.mxu0 %v34984_v24  ;;  %v37032_v24 = vld [vmem:[#allocation103_spill] sm:$0xff]  ;;  %v37037_v6 = vld [vmem:[#allocation208_spill] sm:$0xff] (!%p29568_p7) }
 0x578   : > { %32236 = vmatpush3.msra.mxu1 %v34986_v45  ;;  %32207 = vmatprep.mubr.msk.f32.mxu0 %vm33017_vm0, %v36652_v35  ;;  %v37031_v45 = vld [vmem:[#allocation102_spill] sm:$0xff]  ;;  %29253 = vst.msk [vmem:[%s33119_s18] sm:$0x3] (!%p29568_p7), %vm29252_vm3, %v37037_v6 }
 0x579   : > { %32237 = vmatprep.mubr.msk.f32.mxu1 %vm33017_vm0, %v36652_v35  ;;  %32210 = vmatprep.subr.mxu0 %v36652_v35 }
 0x57a   : > { %32240 = vmatprep.subr.mxu1 %v36652_v35 }
 0x57e   : > { %32208 = vmatmul.mubr.f32.vlgmr.msra.gmra.mrb[46].mxu0 %v37027_v11 }
 0x57f   : > { %32238 = vmatmul.mubr.f32.vlgmr.msra.gmra.mrb[46].mxu1 %v37028_v12  ;;  %32211 = vmatpush3.msra.mxu0 %v37029_v43 }
 0x580   : > { %32241 = vmatpush3.msra.mxu1 %v37030_v44  ;;  %32212 = vmatprep.mubr.msk.f32.mxu0 %vm33017_vm0, %v36652_v35 }
 0x581   : > { %32242 = vmatprep.mubr.msk.f32.mxu1 %vm33017_vm0, %v36652_v35  ;;  %32215 = vmatprep.subr.mxu0 %v36652_v35 }
 0x582   : > { %32245 = vmatprep.subr.mxu1 %v36652_v35 }
 0x586   : > { %32213 = vmatmul.mubr.f32.vlgmr.msra.gmra.mrb[46].mxu0 %v37031_v45 }
 0x587   : > { %32243 = vmatmul.mubr.f32.vlgmr.msra.gmra.mrb[46].mxu1 %v37032_v24  ;;  %32216 = vmatpush3.msra.mxu0 %v34916_v1 }
 0x588   : > { %32246 = vmatpush3.msra.mxu1 %v34918_v36  ;;  %32217 = vmatprep.mubr.msk.f32.mxu0 %vm33017_vm0, %v36652_v35 }
 0x589   : > { %32247 = vmatprep.mubr.msk.f32.mxu1 %vm33017_vm0, %v36652_v35  ;;  %32220 = vmatprep.subr.mxu0 %v36652_v35 }
 0x58a   : > { %32250 = vmatprep.subr.mxu1 %v36652_v35 }
 0x58e   : > { %32218 = vmatmul.mubr.f32.vlgmr.msra.gmra.mrb[46].mxu0 %v37033_v9 }
 0x58f   : > { %32248 = vmatmul.mubr.f32.vlgmr.msra.gmra.mrb[46].mxu1 %v37034_v54  ;;  %32221 = vmatpush3.msra.mxu0 %v37035_v34 }
 0x590   : > { %32251 = vmatpush3.msra.mxu1 %v37036_v29  ;;  %32222 = vmatprep.mubr.msk.f32.mxu0 %vm33017_vm0, %v36652_v35 }
 0x591   : > { %32252 = vmatprep.mubr.msk.f32.mxu1 %vm33017_vm0, %v36652_v35  ;;  %32225 = vmatprep.subr.mxu0 %v36652_v35 }
 0x592   : > { %32255 = vmatprep.subr.mxu1 %v36652_v35 }
 0x595   : > { %v24322_v33 = vpop.f32.mrb[36].mxu0 }
 0x596   : > { %v24768_v7 = vpop.f32.mrb[36].mxu1  ;;  %v36055_v30 = vmul.f32 %v24322_v33, %v34812_v0  ;;  %v31929_v55 = vpop.f32.mrb[37].mxu0  ;;  %32223 = vmatmul.mubr.f32.vlgmr.msra.gmra.mrb[46].mxu0 %v37027_v11 }
 0x597   : > { %v36058_v49 = vmul.f32 %v24768_v7, %v34812_v0  ;;  %v31959_v56 = vpop.f32.mrb[37].mxu1  ;;  %32253 = vmatmul.mubr.f32.vlgmr.msra.gmra.mrb[46].mxu1 %v37028_v12  ;;  %32226 = vmatpush3.msra.mxu0 %v34916_v1 }
 0x598   : > { %32256 = vmatpush3.msra.mxu1 %v34918_v36  ;;  %32227 = vmatprep.mubr.msk.f32.mxu0 %vm33017_vm0, %v36652_v35  ;;  %29273 = vst.msk [vmem:[%s33129_s22 + $0x8] sm:$0x3] (!%p29568_p7), %vm29252_vm3, %v36055_v30 }
 0x599   : > { %32257 = vmatprep.mubr.msk.f32.mxu1 %vm33017_vm0, %v36652_v35  ;;  %29274 = vst.msk [vmem:[%s33129_s22 + $0xa] sm:$0x3] (!%p29568_p7), %vm29252_vm3, %v36058_v49 }
 0x59e   : > { %32228 = vmatmul.mubr.f32.vlgmr.msra.gmra.mrb[46].mxu0 %v37027_v11  ;;  %v37039_v11 = vld [vmem:[#allocation218_spill] sm:$0xff] (!%p29568_p7) }
 0x59f   : > { %32258 = vmatmul.mubr.f32.vlgmr.msra.gmra.mrb[46].mxu1 %v37028_v12  ;;  %29255 = vst.msk [vmem:[%s33119_s18 + $0x4] sm:$0x3] (!%p29568_p7), %vm29252_vm3, %v37039_v11  ;;  %v37040_v12 = vld [vmem:[#allocation219_spill] sm:$0xff] (!%p29568_p7) }
 0x5a0   : > { %29256 = vst.msk [vmem:[%s33119_s18 + $0x6] sm:$0x3] (!%p29568_p7), %vm29252_vm3, %v37040_v12 }
 0x5c1   : > { %v25214_v5 = vpop.f32.mrb[38].mxu0 }
 0x5c2   : > { %v25660_v17 = vpop.f32.mrb[38].mxu1  ;;  %v36071_v47 = vmul.f32 %v25214_v5, %v34812_v0  ;;  %v31989_v1 = vpop.f32.mrb[39].mxu0 }
 0x5c3   : > { %v36074_v3 = vmul.f32 %v25660_v17, %v34812_v0  ;;  %v32019_v36 = vpop.f32.mrb[39].mxu1 }
 0x5c4   : > { %29275 = vst.msk [vmem:[%s33129_s22 + $0xc] sm:$0x3] (!%p29568_p7), %vm29252_vm3, %v36071_v47 }
 0x5c5   : > { %29276 = vst.msk [vmem:[%s33129_s22 + $0xe] sm:$0x3] (!%p29568_p7), %vm29252_vm3, %v36074_v3 }
 0x5ed   : > { %v26106_v50 = vpop.f32.mrb[40].mxu0 }
 0x5ee   : > { %v26552_v57 = vpop.f32.mrb[40].mxu1  ;;  %v36077_v59 = vmul.f32 %v26106_v50, %v34812_v0  ;;  %v32049_v42 = vpop.f32.mrb[41].mxu0 }
 0x5ef   : > { %v36080_v35 = vmul.f32 %v26552_v57, %v34812_v0  ;;  %v32079_v22 = vpop.f32.mrb[41].mxu1 }
 0x5f0   : > { %29277 = vst.msk [vmem:[%s33129_s22 + $0x10] sm:$0x3] (!%p29568_p7), %vm29252_vm3, %v36077_v59 }
 0x5f1   : > { %29278 = vst.msk [vmem:[%s33129_s22 + $0x12] sm:$0x3] (!%p29568_p7), %vm29252_vm3, %v36080_v35 }
 0x619   : > { %v26998_v60 = vpop.f32.mrb[42].mxu0 }
 0x61a   : > { %v27444_v25 = vpop.f32.mrb[42].mxu1  ;;  %v36083_v14 = vmul.f32 %v26998_v60, %v34812_v0  ;;  %v32109_v38 = vpop.f32.mrb[43].mxu0 }
 0x61b   : > { %v36086_v26 = vmul.f32 %v27444_v25, %v34812_v0  ;;  %v32139_v52 = vpop.f32.mrb[43].mxu1 }
 0x61c   : > { %29279 = vst.msk [vmem:[%s33129_s22 + $0x14] sm:$0x3] (!%p29568_p7), %vm29252_vm3, %v36083_v14 }
 0x61d   : > { %29280 = vst.msk [vmem:[%s33129_s22 + $0x16] sm:$0x3] (!%p29568_p7), %vm29252_vm3, %v36086_v26 }
 0x645   : > { %v27890_v63 = vpop.f32.mrb[44].mxu0 }
 0x646   : > { %v28336_v62 = vpop.f32.mrb[44].mxu1  ;;  %v36089_v41 = vmul.f32 %v27890_v63, %v34812_v0  ;;  %v32169_v53 = vpop.f32.mrb[45].mxu0 }
 0x647   : > { %v36092_v31 = vmul.f32 %v28336_v62, %v34812_v0  ;;  %v32199_v8 = vpop.f32.mrb[45].mxu1 }
 0x648   : > { %29281 = vst.msk [vmem:[%s33129_s22 + $0x18] sm:$0x3] (!%p29568_p7), %vm29252_vm3, %v36089_v41 }
 0x649   : > { %29282 = vst.msk [vmem:[%s33129_s22 + $0x1a] sm:$0x3] (!%p29568_p7), %vm29252_vm3, %v36092_v31 }
 0x66d   : > { %29251 = sbr.rel (%p29568_p7) target bundleno = 1654 (0x676), region = 44 }
 0x671   : > { %v28782_v58 = vpop.f32.mrb[46].mxu0 }
 0x672   : > { %v29228_v15 = vpop.f32.mrb[46].mxu1  ;;  %v36095_v16 = vmul.f32 %v28782_v58, %v34812_v0  ;;  %v32229_v19 = vpop.f32.mrb[47].mxu0 }
 0x673   : > { %v36098_v28 = vmul.f32 %v29228_v15, %v34812_v0  ;;  %v32259_v4 = vpop.f32.mrb[47].mxu1  ;;  %v37038_v0 = vld [vmem:[#allocation209_spill] sm:$0xff] (!%p29568_p7) }
 0x674   : > { %29254 = vst.msk [vmem:[%s33119_s18 + $0x2] sm:$0x3] %vm29252_vm3, %v37038_v0  ;;  %29283 = vst.msk [vmem:[%s33129_s22 + $0x1c] sm:$0x3] %vm29252_vm3, %v36095_v16 }
 0x675   : > { %29284 = vst.msk [vmem:[%s33129_s22 + $0x1e] sm:$0x3] %vm29252_vm3, %v36098_v28 }
 0x676 PF: > { %p29569_p8 = scmp.eq.s32.totalorder %s32998_s21, 0 }
 0x677   : > { %v29289_v43 = vld [vmem:[%s33119_s18] sm:$0x3] (!%p29569_p8)  ;;  %vm29321_vm4 = vcmask (!%p29569_p8), 41984   ;;  %v37041_v45 = vld [vmem:[#allocation208_spill] sm:$0xff] (!%p29569_p8)  ;;  %v37042_v9 = vld [vmem:[#allocation209_spill] sm:$0xff] (!%p29569_p8) }
 0x678   : > { %29288 = sbr.rel (%p29569_p8) target bundleno = 1679 (0x68f), region = 48  ;;  %v29305_v24 = vadd.f32 (!%p29569_p8), %v29289_v43, %v37041_v45  ;;  %v29291_v34 = vld [vmem:[%s33119_s18 + $0x4] sm:$0x3] (!%p29569_p8)  ;;  %v29292_v29 = vld [vmem:[%s33119_s18 + $0x6] sm:$0x3] (!%p29569_p8)  ;;  %v37044_v56 = vld [vmem:[#allocation219_spill] sm:$0xff] (!%p29569_p8) }
 0x679   : > { %v29293_v33 = vld [vmem:[%s33119_s18 + $0x8] sm:$0x3] (!%p29569_p8)  ;;  %v37043_v7 = vld [vmem:[#allocation218_spill] sm:$0xff] (!%p29569_p8)  ;;  %v29308_v5 = vadd.f32 (!%p29569_p8), %v29292_v29, %v37044_v56  ;;  %v29294_v1 = vld [vmem:[%s33119_s18 + $0xa] sm:$0x3] (!%p29569_p8) }
 0x67a   : > { %v29307_v55 = vadd.f32 (!%p29569_p8), %v29291_v34, %v37043_v7  ;;  %v29309_v17 = vadd.f32 (!%p29569_p8), %v29293_v33, %v35041_v13  ;;  %v29295_v36 = vld [vmem:[%s33119_s18 + $0xc] sm:$0x3] (!%p29569_p8)  ;;  %v29296_v50 = vld [vmem:[%s33119_s18 + $0xe] sm:$0x3] (!%p29569_p8)  ;;  %29322 = vst.msk [vmem:[%s33119_s18] sm:$0x3] (!%p29569_p8), %vm29321_vm4, %v29305_v24  ;;  %v29310_v57 = vadd.f32 (!%p29569_p8), %v29294_v1, %v35044_v32 }
 0x67b   : > { %v29311_v42 = vadd.f32 (!%p29569_p8), %v29295_v36, %v35109_v20  ;;  %v29312_v22 = vadd.f32 (!%p29569_p8), %v29296_v50, %v35112_v61  ;;  %v29297_v13 = vld [vmem:[%s33119_s18 + $0x10] sm:$0x3] (!%p29569_p8)  ;;  %v29298_v60 = vld [vmem:[%s33119_s18 + $0x12] sm:$0x3] (!%p29569_p8)  ;;  %v29299_v25 = vld [vmem:[%s33119_s18 + $0x14] sm:$0x3] (!%p29569_p8) }
 0x67c   : > { %29324 = vst.msk [vmem:[%s33119_s18 + $0x4] sm:$0x3] (!%p29569_p8), %vm29321_vm4, %v29307_v55  ;;  %29325 = vst.msk [vmem:[%s33119_s18 + $0x6] sm:$0x3] (!%p29569_p8), %vm29321_vm4, %v29308_v5  ;;  %v29313_v32 = vadd.f32 (!%p29569_p8), %v29297_v13, %v35177_v48  ;;  %v29314_v20 = vadd.f32 (!%p29569_p8), %v29298_v60, %v35180_v2  ;;  %v29315_v61 = vadd.f32 (!%p29569_p8), %v29299_v25, %v35245_v51  ;;  %v29300_v38 = vld [vmem:[%s33119_s18 + $0x16] sm:$0x3] (!%p29569_p8) }
 0x67d   : > { %v29290_v44 = vld [vmem:[%s33119_s18 + $0x2] sm:$0x3] (!%p29569_p8)  ;;  %29326 = vst.msk [vmem:[%s33119_s18 + $0x8] sm:$0x3] (!%p29569_p8), %vm29321_vm4, %v29309_v17  ;;  %v29301_v52 = vld [vmem:[%s33119_s18 + $0x18] sm:$0x3] (!%p29569_p8)  ;;  %v29316_v48 = vadd.f32 (!%p29569_p8), %v29300_v38, %v35248_v21 }
 0x67e   : > { %v29306_v54 = vadd.f32 (!%p29569_p8), %v29290_v44, %v37042_v9  ;;  %v29302_v63 = vld [vmem:[%s33119_s18 + $0x1a] sm:$0x3] (!%p29569_p8)  ;;  %29327 = vst.msk [vmem:[%s33119_s18 + $0xa] sm:$0x3] (!%p29569_p8), %vm29321_vm4, %v29310_v57  ;;  %29328 = vst.msk [vmem:[%s33119_s18 + $0xc] sm:$0x3] (!%p29569_p8), %vm29321_vm4, %v29311_v42  ;;  %v29317_v2 = vadd.f32 (!%p29569_p8), %v29301_v52, %v35313_v10 }
 0x67f   : > { %29329 = vst.msk [vmem:[%s33119_s18 + $0xe] sm:$0x3] %vm29321_vm4, %v29312_v22  ;;  %v29318_v51 = vadd.f32 %v29302_v63, %v35316_v46  ;;  %v29303_v62 = vld [vmem:[%s33119_s18 + $0x1c] sm:$0x3]  ;;  %v29304_v53 = vld [vmem:[%s33119_s18 + $0x1e] sm:$0x3] }
 0x680   : > { %29323 = vst.msk [vmem:[%s33119_s18 + $0x2] sm:$0x3] %vm29321_vm4, %v29306_v54  ;;  %v29338_v8 = vld [vmem:[%s33129_s22] sm:$0x3]  ;;  %29330 = vst.msk [vmem:[%s33119_s18 + $0x10] sm:$0x3] %vm29321_vm4, %v29313_v32  ;;  %v29319_v21 = vadd.f32 %v29303_v62, %v35381_v39  ;;  %v29320_v10 = vadd.f32 %v29304_v53, %v35384_v40 }
 0x681   : > { %29331 = vst.msk [vmem:[%s33119_s18 + $0x12] sm:$0x3] %vm29321_vm4, %v29314_v20  ;;  %29332 = vst.msk [vmem:[%s33119_s18 + $0x14] sm:$0x3] %vm29321_vm4, %v29315_v61  ;;  %v29354_v46 = vadd.f32 %v29338_v8, %v35923_v37  ;;  %v29339_v58 = vld [vmem:[%s33129_s22 + $0x2] sm:$0x3] }
 0x682   : > { %v29340_v15 = vld [vmem:[%s33129_s22 + $0x4] sm:$0x3]  ;;  %v29341_v19 = vld [vmem:[%s33129_s22 + $0x6] sm:$0x3]  ;;  %29333 = vst.msk [vmem:[%s33119_s18 + $0x16] sm:$0x3] %vm29321_vm4, %v29316_v48  ;;  %v29355_v39 = vadd.f32 %v29339_v58, %v35926_v23 }
 0x683   : > { %29334 = vst.msk [vmem:[%s33119_s18 + $0x18] sm:$0x3] %vm29321_vm4, %v29317_v2  ;;  %29335 = vst.msk [vmem:[%s33119_s18 + $0x1a] sm:$0x3] %vm29321_vm4, %v29318_v51  ;;  %v29356_v40 = vadd.f32 %v29340_v15, %v35989_v18  ;;  %v29357_v37 = vadd.f32 %v29341_v19, %v35992_v27  ;;  %v29342_v4 = vld [vmem:[%s33129_s22 + $0x8] sm:$0x3] }
 0x684   : > { %v29343_v6 = vld [vmem:[%s33129_s22 + $0xa] sm:$0x3]  ;;  %v29344_v0 = vld [vmem:[%s33129_s22 + $0xc] sm:$0x3]  ;;  %29336 = vst.msk [vmem:[%s33119_s18 + $0x1c] sm:$0x3] %vm29321_vm4, %v29319_v21  ;;  %v29358_v23 = vadd.f32 %v29342_v4, %v36055_v30 }
 0x685   : > { %29337 = vst.msk [vmem:[%s33119_s18 + $0x1e] sm:$0x3] %vm29321_vm4, %v29320_v10  ;;  %29370 = vst.msk [vmem:[%s33129_s22] sm:$0x3] %vm29321_vm4, %v29354_v46  ;;  %v29359_v18 = vadd.f32 %v29343_v6, %v36058_v49  ;;  %v29360_v27 = vadd.f32 %v29344_v0, %v36071_v47  ;;  %v29345_v11 = vld [vmem:[%s33129_s22 + $0xe] sm:$0x3] }
 0x686   : > { %v29346_v12 = vld [vmem:[%s33129_s22 + $0x10] sm:$0x3]  ;;  %v29347_v43 = vld [vmem:[%s33129_s22 + $0x12] sm:$0x3]  ;;  %29371 = vst.msk [vmem:[%s33129_s22 + $0x2] sm:$0x3] %vm29321_vm4, %v29355_v39  ;;  %v29361_v30 = vadd.f32 %v29345_v11, %v36074_v3 }
 0x687   : > { %29372 = vst.msk [vmem:[%s33129_s22 + $0x4] sm:$0x3] %vm29321_vm4, %v29356_v40  ;;  %29373 = vst.msk [vmem:[%s33129_s22 + $0x6] sm:$0x3] %vm29321_vm4, %v29357_v37  ;;  %v29362_v49 = vadd.f32 %v29346_v12, %v36077_v59  ;;  %v29363_v47 = vadd.f32 %v29347_v43, %v36080_v35  ;;  %v29348_v44 = vld [vmem:[%s33129_s22 + $0x14] sm:$0x3] }
 0x688   : > { %v29349_v45 = vld [vmem:[%s33129_s22 + $0x16] sm:$0x3]  ;;  %v29350_v24 = vld [vmem:[%s33129_s22 + $0x18] sm:$0x3]  ;;  %29374 = vst.msk [vmem:[%s33129_s22 + $0x8] sm:$0x3] %vm29321_vm4, %v29358_v23  ;;  %v29364_v3 = vadd.f32 %v29348_v44, %v36083_v14 }
 0x689   : > { %29375 = vst.msk [vmem:[%s33129_s22 + $0xa] sm:$0x3] %vm29321_vm4, %v29359_v18  ;;  %29376 = vst.msk [vmem:[%s33129_s22 + $0xc] sm:$0x3] %vm29321_vm4, %v29360_v27  ;;  %v29365_v59 = vadd.f32 %v29349_v45, %v36086_v26  ;;  %v29366_v35 = vadd.f32 %v29350_v24, %v36089_v41  ;;  %v29351_v9 = vld [vmem:[%s33129_s22 + $0x1a] sm:$0x3] }
 0x68a   : > { %v29352_v54 = vld [vmem:[%s33129_s22 + $0x1c] sm:$0x3]  ;;  %v29353_v34 = vld [vmem:[%s33129_s22 + $0x1e] sm:$0x3]  ;;  %29377 = vst.msk [vmem:[%s33129_s22 + $0xe] sm:$0x3] %vm29321_vm4, %v29361_v30  ;;  %v29367_v29 = vadd.f32 %v29351_v9, %v36092_v31 }
 0x68b   : > { %29378 = vst.msk [vmem:[%s33129_s22 + $0x10] sm:$0x3] %vm29321_vm4, %v29362_v49  ;;  %29379 = vst.msk [vmem:[%s33129_s22 + $0x12] sm:$0x3] %vm29321_vm4, %v29363_v47  ;;  %v29368_v33 = vadd.f32 %v29352_v54, %v36095_v16  ;;  %v29369_v14 = vadd.f32 %v29353_v34, %v36098_v28 }
 0x68c   : > { %29380 = vst.msk [vmem:[%s33129_s22 + $0x14] sm:$0x3] %vm29321_vm4, %v29364_v3  ;;  %29381 = vst.msk [vmem:[%s33129_s22 + $0x16] sm:$0x3] %vm29321_vm4, %v29365_v59 }
 0x68d   : > { %29382 = vst.msk [vmem:[%s33129_s22 + $0x18] sm:$0x3] %vm29321_vm4, %v29366_v35  ;;  %29383 = vst.msk [vmem:[%s33129_s22 + $0x1a] sm:$0x3] %vm29321_vm4, %v29367_v29 }
 0x68e   : > { %29384 = vst.msk [vmem:[%s33129_s22 + $0x1c] sm:$0x3] %vm29321_vm4, %v29368_v33  ;;  %29385 = vst.msk [vmem:[%s33129_s22 + $0x1e] sm:$0x3] %vm29321_vm4, %v29369_v14 }
 0x68f PF: > { %s17_s25 = sadd.s32 1, %s33014_s25   ;;  %s37045_s21 = smov %s33006_s23 }
 0x690   : > { %p14_p9 = scmp.ge.s32.totalorder %s17_s25, 8   ;;  %s37046_s22 = smov %s33010_s24 }
 0x691   : > { %s37047_s23 = smov %s37050_s26  ;;  %s37048_s24 = smov %s37054_s27 }
 0x692   :  { %16 = sbr.rel (!%p14_p9) target bundleno = 3 (0x3), region = 102 }

</bundles_post_ra>
